<compile_context>
chip_gen: v6e
topology: v6e:2x2x1
jax: 0.10.0
libtpu: 0.0.40
codegen_flags: <defaults>
</compile_context>

<pallas_src>
import functools

import numpy as np
import jax
import jax.numpy as jnp
from jax import lax
from jax.experimental import pallas as pl
from jax.experimental.pallas import tpu as pltpu


# ----------------------------- fused XConv kernel ----------------------------

def _xconv_fused_kernel(K, C_mid, C_inx,
                        plocal_ref, fraw_ref,
                        xc_w_ref, xc_b_ref,
                        xd1_w_ref, xd1_b_ref,
                        xd2_w_ref, xd2_b_ref,
                        bd1_w_ref, bd1_b_ref,
                        bd2_w_ref, bd2_b_ref,
                        bdd_w_ref, bdd_b_ref,
                        end_w_ref, end_b_ref,
                        o_ref):
    """Fused XConv for one (sample, P-tile) block, channel-major (C, TP) layout.

    plocal_ref : (1, K*dims, TP)  neighborhood-flattened local coords (channel-major)
    fraw_ref   : (1, K*C_in, TP)  gathered raw input features (channel-major)
    o_ref      : (1, C_out, TP)   lane-dense output (points on the 128-lane axis)
    """
    TP = o_ref.shape[2]
    pflat = plocal_ref[0]                                    # (K*dims, TP)
    fflat = fraw_ref[0]                                      # (K*C_in, TP)

    def mm(w, x):
        # bf16 MXU operands, f32 accumulation; VPU-side math stays f32.
        return jnp.dot(w.astype(jnp.bfloat16), x.astype(jnp.bfloat16),
                       preferred_element_type=jnp.float32)

    # --- X-transform MLP: Conv(dims -> K*K over the K window) + Dense + Dense ---
    # Channel-major result (K*K, TP): row i*K + j holds X[:, i, j] for the whole
    # point tile, so the X application below uses sublane-row broadcasts only.
    t = jnp.maximum(mm(xc_w_ref[...], pflat) + xc_b_ref[...], 0.0)
    t = jnp.maximum(mm(xd1_w_ref[...], t) + xd1_b_ref[...], 0.0)
    X = mm(xd2_w_ref[...], t) + xd2_b_ref[...]               # (K*K, TP), no activation

    # --- lifted per-neighbor coords: dense1 -> dense2, block-diagonal over K ----
    l0 = jnp.maximum(mm(bd1_w_ref[...], pflat) + bd1_b_ref[...], 0.0)   # (K*C_mid, TP)
    lifted = jnp.maximum(mm(bd2_w_ref[...], l0) + bd2_b_ref[...], 0.0)  # (K*C_mid, TP)

    # --- folded PointCNN input Dense (C_in -> C_out//2) applied per neighbor ----
    region = jnp.maximum(mm(bdd_w_ref[...], fflat) + bdd_b_ref[...], 0.0)  # (K*C_inx, TP)

    # --- fts_X = X @ fts_cat: per-point KxK mixing via VPU broadcast FMAs -------
    # Slab i holds fts_X[:, i, :] channel-major; slabs are stacked (row blocks are
    # all multiples of 8 sublanes) so the end conv is a single big matmul.
    slabs = []
    for i in range(K):
        acc_l = jnp.zeros((C_mid, TP), jnp.float32)
        acc_f = jnp.zeros((C_inx, TP), jnp.float32)
        for j in range(K):
            xij = X[i * K + j:i * K + j + 1, :]              # (1, TP) sublane row
            acc_l = acc_l + xij * lifted[j * C_mid:(j + 1) * C_mid, :]
            acc_f = acc_f + xij * region[j * C_inx:(j + 1) * C_inx, :]
        slabs.append(acc_l)
        slabs.append(acc_f)
    stacked = jnp.concatenate(slabs, axis=0)                 # (K*(C_mid+C_inx), TP)

    # --- folded separable end conv: ONE matmul, contraction K*C_cat -------------
    out = mm(end_w_ref[...], stacked) + end_b_ref[...]       # (C_out, TP)
    o_ref[0] = jnp.maximum(out, 0.0)                         # ReLU; BatchNorm outside


def xconv_fused_pallas(pts_local, fts_raw_regional, p, C_out):
    """pts_local: (N,P,K,dims), fts_raw_regional: (N,P,K,C_in) -> (N, C_out, P)."""
    N, P, K, dims = pts_local.shape
    C_in = fts_raw_regional.shape[-1]
    KK = K * K
    C_mid = p['bd1_w'].shape[0] // K
    C_inx = p['bdd_w'].shape[0] // K
    C_cat = C_mid + C_inx

    # Wrapper-side layout plumbing: K-outer, channel-major, neighborhood-flattened.
    plocal_f = jnp.transpose(pts_local, (0, 2, 3, 1)).reshape(N, K * dims, P)
    fraw_f = jnp.transpose(fts_raw_regional, (0, 2, 3, 1)).reshape(N, K * C_in, P)

    # Point tile on the lane axis; sweep {128, 256} at realistic P (watch v7x 64 MiB VMEM).
    TP = P if P <= 128 else 128
    grid = (N, pl.cdiv(P, TP))

    def wspec(shape):
        return pl.BlockSpec(shape, lambda n, q: (0, 0))

    return pl.pallas_call(
        functools.partial(_xconv_fused_kernel, K, C_mid, C_inx),
        out_shape=jax.ShapeDtypeStruct((N, C_out, P), jnp.float32),
        grid=grid,
        in_specs=[
            pl.BlockSpec((1, K * dims, TP), lambda n, q: (n, 0, q)),
            pl.BlockSpec((1, K * C_in, TP), lambda n, q: (n, 0, q)),
            wspec((KK, K * dims)), wspec((KK, 1)),
            wspec((KK, KK)), wspec((KK, 1)),
            wspec((KK, KK)), wspec((KK, 1)),
            wspec((K * C_mid, K * dims)), wspec((K * C_mid, 1)),
            wspec((K * C_mid, K * C_mid)), wspec((K * C_mid, 1)),
            wspec((K * C_inx, K * C_in)), wspec((K * C_inx, 1)),
            wspec((C_out, K * C_cat)), wspec((C_out, 1)),
        ],
        out_specs=pl.BlockSpec((1, C_out, TP), lambda n, q: (n, 0, q)),
        compiler_params=pltpu.CompilerParams(
            dimension_semantics=("parallel", "parallel"),
            vmem_limit_bytes=32 * 1024 * 1024),
    )(plocal_f, fraw_f,
      p['xc_w'], p['xc_b'], p['xd1_w'], p['xd1_b'], p['xd2_w'], p['xd2_b'],
      p['bd1_w'], p['bd1_b'], p['bd2_w'], p['bd2_b'],
      p['bdd_w'], p['bdd_b'], p['end_w'], p['end_b'])


# ------------------------------ parameters -----------------------------------

def _uniform(key, shape, fan_in):
    s = 1.0 / float(np.sqrt(fan_in))
    return jax.random.uniform(key, shape, jnp.float32, -s, s)


def _block_diag_k(w, K):
    """(out, in) -> (K*out, K*in): K copies of w on the block diagonal."""
    w = np.asarray(w)
    o, i = w.shape
    bd = np.zeros((K * o, K * i), np.float32)
    for k in range(K):
        bd[k * o:(k + 1) * o, k * i:(k + 1) * i] = w
    return jnp.asarray(bd)


def init_params(key, C_in, C_out, dims, K):
    """PyTorch-style random init, pre-folded into channel-major kernel weights."""
    C_half = C_out // 2
    C_inx = C_half if C_in != 0 else 0            # XConv feature input channels
    C_mid = C_out // 4 if C_in != 0 else C_out // 2
    dm = min(int(np.ceil(C_out / C_in)), 4) if C_in != 0 else 1
    C_cat = C_mid + C_inx
    Cdm = C_cat * dm
    KK = K * K
    ks = jax.random.split(key, 16)
    p = {}

    # PointCNN.dense : Linear(C_in, C_out//2) + ReLU, folded per-neighbor (block-diag).
    dense_w = _uniform(ks[0], (C_half, C_in), C_in)          # torch (out, in)
    dense_b = _uniform(ks[1], (C_half,), C_in)
    p['bdd_w'] = _block_diag_k(dense_w, K)                   # (K*C_half, K*C_in)
    p['bdd_b'] = jnp.tile(dense_b, K).reshape(K * C_half, 1)

    # XConv.dense1 / dense2, block-diagonal over the K neighbors.
    d1_w = _uniform(ks[2], (C_mid, dims), dims)
    d1_b = _uniform(ks[3], (C_mid,), dims)
    d2_w = _uniform(ks[4], (C_mid, C_mid), C_mid)
    d2_b = _uniform(ks[5], (C_mid,), C_mid)
    p['bd1_w'] = _block_diag_k(d1_w, K)                      # (K*C_mid, K*dims)
    p['bd1_b'] = jnp.tile(d1_b, K).reshape(K * C_mid, 1)
    p['bd2_w'] = _block_diag_k(d2_w, K)                      # (K*C_mid, K*C_mid)
    p['bd2_b'] = jnp.tile(d2_b, K).reshape(K * C_mid, 1)

    # x_trans: Conv2d(dims, K*K, (1,K), bias=True) + Dense(K*K,K*K) + Dense(no act),
    # rewritten channel-major: column index of xc_w is k*dims + c.
    conv_w = _uniform(ks[6], (KK, dims, 1, K), dims * K)     # PyTorch OIHW
    p['xc_w'] = jnp.transpose(conv_w[:, :, 0, :], (0, 2, 1)).reshape(KK, K * dims)
    p['xc_b'] = _uniform(ks[7], (KK,), dims * K).reshape(KK, 1)
    p['xd1_w'] = _uniform(ks[8], (KK, KK), KK)               # (out, in)
    p['xd1_b'] = _uniform(ks[9], (KK,), KK).reshape(KK, 1)
    p['xd2_w'] = _uniform(ks[10], (KK, KK), KK)
    p['xd2_b'] = _uniform(ks[11], (KK,), KK).reshape(KK, 1)

    # end_conv: SepConv(C_cat -> C_out, (1,K), depth_multiplier=dm, with_bn=True):
    # depthwise (with bias) + pointwise (no bias), folded offline into one matrix:
    #   W_end[k, c, o] = sum_m dw[c*dm+m, 0, 0, k] * pw[o, c*dm+m]
    #   b_end[o]       = sum_j dw_b[j] * pw[o, j]
    dw = _uniform(ks[12], (Cdm, 1, 1, K), K)                 # depthwise OIHW
    dw_b = _uniform(ks[13], (Cdm,), K)
    pw = _uniform(ks[14], (C_out, Cdm, 1, 1), Cdm)           # pointwise
    wd = jnp.transpose(dw[:, 0, 0, :], (1, 0))               # (K, Cdm)
    pwm = jnp.transpose(pw[:, :, 0, 0], (1, 0))              # (Cdm, C_out)
    rep = np.zeros((C_cat, Cdm), np.float32)                 # 0/1 group map
    for c in range(C_cat):
        rep[c, c * dm:(c + 1) * dm] = 1.0
    end_full = jnp.einsum('cj,kj,jo->kco', jnp.asarray(rep), wd, pwm)  # (K, C_cat, C_out)
    p['end_w'] = jnp.transpose(end_full, (2, 0, 1)).reshape(C_out, K * C_cat)
    p['end_b'] = jnp.matmul(dw_b, pwm).reshape(C_out, 1)

    # BatchNorm2d(C_out) default affine init.
    p['bn_g'] = jnp.ones((C_out,), jnp.float32)
    p['bn_b'] = jnp.zeros((C_out,), jnp.float32)
    return p


# ------------------------------ forward glue ----------------------------------

def knn_indices(rep_pts, pts, K, D):
    # r_indices_func: D-dilated K nearest neighbors per representative point,
    # skipping the nearest (self) point, like knn_indices_func_cpu in PointCNN.
    d2 = jnp.sum((rep_pts[:, :, None, :] - pts[:, None, :, :]) ** 2, axis=-1)  # (N,P,M)
    _, idx = lax.top_k(-d2, K * D + 1)
    return idx[:, :, 1::D]                                                     # (N,P,K)


def select_region(pts, pts_idx):
    # TODO(synk): move this gather into the fused kernel (scalar-prefetched indices +
    # per-row DMA) so the K-expanded regional tensors never round-trip HBM.
    return jax.vmap(lambda p, i: p[i])(pts, pts_idx)


@functools.partial(jax.jit, static_argnames=("K", "D"))
def pointcnn_forward(params, rep_pts, pts, fts, K, D):
    C_out = params['bn_g'].shape[0]
    pts_idx = knn_indices(rep_pts, pts, K, D)
    pts_regional = select_region(pts, pts_idx)               # (N, P, K, dims)
    # Gather RAW features; the PointCNN input Dense (C_in -> C_out//2) is folded into
    # the fused kernel (gather commutes with a pointwise layer) -> one fewer
    # pallas_call and no HBM round trip of the lifted feature tensor.
    fts_regional = select_region(fts, pts_idx)               # (N, P, K, C_in)
    pts_local = pts_regional - rep_pts[:, :, None, :]        # (N, P, K, dims)
    # Fused XConv: input dense, dense1/dense2, x_trans MLP, X application,
    # folded SepConv, ReLU. Output is lane-dense (N, C_out, P).
    fts_conv = xconv_fused_pallas(pts_local, fts_regional, params, C_out)
    # BatchNorm2d over (N, P) per channel (training-mode batch statistics, the
    # module's default mode); small global reduction kept as XLA glue.
    mean = jnp.mean(fts_conv, axis=(0, 2), keepdims=True)
    var = jnp.mean((fts_conv - mean) ** 2, axis=(0, 2), keepdims=True)
    y = (fts_conv - mean) * lax.rsqrt(var + 1e-5)
    y = y * params['bn_g'][None, :, None] + params['bn_b'][None, :, None]
    return jnp.transpose(y, (0, 2, 1))                        # (N, P, C_out)


# ---------------------------------- main ---------------------------------------

if __name__ == "__main__":
    N, num_pts, dims = 2, 32, 3
    C_in, C_out, K, D, P = 4, 32, 8, 2, 8

    key = jax.random.PRNGKey(0)
    k_pts, k_fts, k_par = jax.random.split(key, 3)
    pts = jax.random.normal(k_pts, (N, num_pts, dims), jnp.float32)
    rep_pts = pts[:, :P, :]                       # representative points (subsample)
    fts = jax.random.normal(k_fts, (N, num_pts, C_in), jnp.float32)

    params = init_params(k_par, C_in, C_out, dims, K)

    out = pointcnn_forward(params, rep_pts, pts, fts, K=K, D=D)
    out = jax.block_until_ready(out)
    assert out.shape == (N, P, C_out) and out.dtype == jnp.float32
    assert bool(jnp.all(jnp.isfinite(out)))
    print("KERNEL_OK")
</pallas_src>

<mosaic_0001>
module attributes {stable_mosaic.version = 11 : i64} {
  func.func @_xconv_fused_kernel(%arg0: i32, %arg1: i32, %arg2: memref<1x24x8xf32, #tpu.memory_space<vmem>>, %arg3: memref<1x32x8xf32, #tpu.memory_space<vmem>>, %arg4: memref<64x24xf32, #tpu.memory_space<vmem>>, %arg5: memref<64x1xf32, #tpu.memory_space<vmem>>, %arg6: memref<64x64xf32, #tpu.memory_space<vmem>>, %arg7: memref<64x1xf32, #tpu.memory_space<vmem>>, %arg8: memref<64x64xf32, #tpu.memory_space<vmem>>, %arg9: memref<64x1xf32, #tpu.memory_space<vmem>>, %arg10: memref<64x24xf32, #tpu.memory_space<vmem>>, %arg11: memref<64x1xf32, #tpu.memory_space<vmem>>, %arg12: memref<64x64xf32, #tpu.memory_space<vmem>>, %arg13: memref<64x1xf32, #tpu.memory_space<vmem>>, %arg14: memref<128x32xf32, #tpu.memory_space<vmem>>, %arg15: memref<128x1xf32, #tpu.memory_space<vmem>>, %arg16: memref<32x192xf32, #tpu.memory_space<vmem>>, %arg17: memref<32x1xf32, #tpu.memory_space<vmem>>, %arg18: memref<1x32x8xf32, #tpu.memory_space<vmem>>) attributes {dimension_semantics = [#tpu.dimension_semantics<parallel>, #tpu.dimension_semantics<parallel>], iteration_bounds = array<i64: 2, 1>, scalar_prefetch = 0 : i64, scratch_operands = 0 : i64, tpu.core_type = #tpu.core_type<tc>, window_params = [{transform_indices = @transform_0, window_bounds = array<i64: 1, 24, 8>}, {transform_indices = @transform_1, window_bounds = array<i64: 1, 32, 8>}, {pipeline_mode = #tpu.pipeline_mode<synchronous>, transform_indices = @transform_2, window_bounds = array<i64: 64, 24>}, {pipeline_mode = #tpu.pipeline_mode<synchronous>, transform_indices = @transform_3, window_bounds = array<i64: 64, 1>}, {pipeline_mode = #tpu.pipeline_mode<synchronous>, transform_indices = @transform_4, window_bounds = array<i64: 64, 64>}, {pipeline_mode = #tpu.pipeline_mode<synchronous>, transform_indices = @transform_5, window_bounds = array<i64: 64, 1>}, {pipeline_mode = #tpu.pipeline_mode<synchronous>, transform_indices = @transform_6, window_bounds = array<i64: 64, 64>}, {pipeline_mode = #tpu.pipeline_mode<synchronous>, transform_indices = @transform_7, window_bounds = array<i64: 64, 1>}, {pipeline_mode = #tpu.pipeline_mode<synchronous>, transform_indices = @transform_8, window_bounds = array<i64: 64, 24>}, {pipeline_mode = #tpu.pipeline_mode<synchronous>, transform_indices = @transform_9, window_bounds = array<i64: 64, 1>}, {pipeline_mode = #tpu.pipeline_mode<synchronous>, transform_indices = @transform_10, window_bounds = array<i64: 64, 64>}, {pipeline_mode = #tpu.pipeline_mode<synchronous>, transform_indices = @transform_11, window_bounds = array<i64: 64, 1>}, {pipeline_mode = #tpu.pipeline_mode<synchronous>, transform_indices = @transform_12, window_bounds = array<i64: 128, 32>}, {pipeline_mode = #tpu.pipeline_mode<synchronous>, transform_indices = @transform_13, window_bounds = array<i64: 128, 1>}, {pipeline_mode = #tpu.pipeline_mode<synchronous>, transform_indices = @transform_14, window_bounds = array<i64: 32, 192>}, {pipeline_mode = #tpu.pipeline_mode<synchronous>, transform_indices = @transform_15, window_bounds = array<i64: 32, 1>}, {transform_indices = @transform_16, window_bounds = array<i64: 1, 32, 8>}]} {
    %c0 = arith.constant 0 : index
    %c0_0 = arith.constant 0 : index
    %c0_1 = arith.constant 0 : index
    %0 = vector.load %arg2[%c0, %c0_0, %c0_1] : memref<1x24x8xf32, #tpu.memory_space<vmem>>, vector<1x24x8xf32>
    %1 = vector.shape_cast %0 : vector<1x24x8xf32> to vector<24x8xf32>
    %c0_2 = arith.constant 0 : index
    %c0_3 = arith.constant 0 : index
    %c0_4 = arith.constant 0 : index
    %2 = vector.load %arg3[%c0_2, %c0_3, %c0_4] : memref<1x32x8xf32, #tpu.memory_space<vmem>>, vector<1x32x8xf32>
    %3 = vector.shape_cast %2 : vector<1x32x8xf32> to vector<32x8xf32>
    %c0_5 = arith.constant 0 : index
    %c0_6 = arith.constant 0 : index
    %4 = vector.load %arg4[%c0_5, %c0_6] : memref<64x24xf32, #tpu.memory_space<vmem>>, vector<64x24xf32>
    %5 = arith.truncf %4 : vector<64x24xf32> to vector<64x24xbf16>
    %6 = arith.truncf %1 : vector<24x8xf32> to vector<24x8xbf16>
    %cst = arith.constant dense<0.000000e+00> : vector<64x8xf32>
    %7 = tpu.matmul %5, %6, %cst {dimension_numbers = #tpu.dot_dimension_numbers<[1], [0], [0], [1], [0, 0, 1, 1], [], []>} : vector<64x24xbf16>, vector<24x8xbf16>, vector<64x8xf32> -> vector<64x8xf32>
    %c0_7 = arith.constant 0 : index
    %c0_8 = arith.constant 0 : index
    %8 = vector.load %arg5[%c0_7, %c0_8] : memref<64x1xf32, #tpu.memory_space<vmem>>, vector<64x1xf32>
    %9 = vector.broadcast %8 : vector<64x1xf32> to vector<64x8xf32>
    %10 = arith.addf %7, %9 : vector<64x8xf32>
    %cst_9 = arith.constant 0.000000e+00 : f32
    %11 = vector.broadcast %cst_9 : f32 to vector<64x8xf32>
    %12 = arith.maximumf %10, %11 : vector<64x8xf32>
    %c0_10 = arith.constant 0 : index
    %c0_11 = arith.constant 0 : index
    %13 = vector.load %arg6[%c0_10, %c0_11] : memref<64x64xf32, #tpu.memory_space<vmem>>, vector<64x64xf32>
    %14 = arith.truncf %13 : vector<64x64xf32> to vector<64x64xbf16>
    %15 = arith.truncf %12 : vector<64x8xf32> to vector<64x8xbf16>
    %cst_12 = arith.constant dense<0.000000e+00> : vector<64x8xf32>
    %16 = tpu.matmul %14, %15, %cst_12 {dimension_numbers = #tpu.dot_dimension_numbers<[1], [0], [0], [1], [0, 0, 1, 1], [], []>} : vector<64x64xbf16>, vector<64x8xbf16>, vector<64x8xf32> -> vector<64x8xf32>
    %c0_13 = arith.constant 0 : index
    %c0_14 = arith.constant 0 : index
    %17 = vector.load %arg7[%c0_13, %c0_14] : memref<64x1xf32, #tpu.memory_space<vmem>>, vector<64x1xf32>
    %18 = vector.broadcast %17 : vector<64x1xf32> to vector<64x8xf32>
    %19 = arith.addf %16, %18 : vector<64x8xf32>
    %cst_15 = arith.constant 0.000000e+00 : f32
    %20 = vector.broadcast %cst_15 : f32 to vector<64x8xf32>
    %21 = arith.maximumf %19, %20 : vector<64x8xf32>
    %c0_16 = arith.constant 0 : index
    %c0_17 = arith.constant 0 : index
    %22 = vector.load %arg8[%c0_16, %c0_17] : memref<64x64xf32, #tpu.memory_space<vmem>>, vector<64x64xf32>
    %23 = arith.truncf %22 : vector<64x64xf32> to vector<64x64xbf16>
    %24 = arith.truncf %21 : vector<64x8xf32> to vector<64x8xbf16>
    %cst_18 = arith.constant dense<0.000000e+00> : vector<64x8xf32>
    %25 = tpu.matmul %23, %24, %cst_18 {dimension_numbers = #tpu.dot_dimension_numbers<[1], [0], [0], [1], [0, 0, 1, 1], [], []>} : vector<64x64xbf16>, vector<64x8xbf16>, vector<64x8xf32> -> vector<64x8xf32>
    %c0_19 = arith.constant 0 : index
    %c0_20 = arith.constant 0 : index
    %26 = vector.load %arg9[%c0_19, %c0_20] : memref<64x1xf32, #tpu.memory_space<vmem>>, vector<64x1xf32>
    %27 = vector.broadcast %26 : vector<64x1xf32> to vector<64x8xf32>
    %28 = arith.addf %25, %27 : vector<64x8xf32>
    %c0_21 = arith.constant 0 : index
    %c0_22 = arith.constant 0 : index
    %29 = vector.load %arg10[%c0_21, %c0_22] : memref<64x24xf32, #tpu.memory_space<vmem>>, vector<64x24xf32>
    %30 = arith.truncf %29 : vector<64x24xf32> to vector<64x24xbf16>
    %31 = arith.truncf %1 : vector<24x8xf32> to vector<24x8xbf16>
    %cst_23 = arith.constant dense<0.000000e+00> : vector<64x8xf32>
    %32 = tpu.matmul %30, %31, %cst_23 {dimension_numbers = #tpu.dot_dimension_numbers<[1], [0], [0], [1], [0, 0, 1, 1], [], []>} : vector<64x24xbf16>, vector<24x8xbf16>, vector<64x8xf32> -> vector<64x8xf32>
    %c0_24 = arith.constant 0 : index
    %c0_25 = arith.constant 0 : index
    %33 = vector.load %arg11[%c0_24, %c0_25] : memref<64x1xf32, #tpu.memory_space<vmem>>, vector<64x1xf32>
    %34 = vector.broadcast %33 : vector<64x1xf32> to vector<64x8xf32>
    %35 = arith.addf %32, %34 : vector<64x8xf32>
    %cst_26 = arith.constant 0.000000e+00 : f32
    %36 = vector.broadcast %cst_26 : f32 to vector<64x8xf32>
    %37 = arith.maximumf %35, %36 : vector<64x8xf32>
    %c0_27 = arith.constant 0 : index
    %c0_28 = arith.constant 0 : index
    %38 = vector.load %arg12[%c0_27, %c0_28] : memref<64x64xf32, #tpu.memory_space<vmem>>, vector<64x64xf32>
    %39 = arith.truncf %38 : vector<64x64xf32> to vector<64x64xbf16>
    %40 = arith.truncf %37 : vector<64x8xf32> to vector<64x8xbf16>
    %cst_29 = arith.constant dense<0.000000e+00> : vector<64x8xf32>
    %41 = tpu.matmul %39, %40, %cst_29 {dimension_numbers = #tpu.dot_dimension_numbers<[1], [0], [0], [1], [0, 0, 1, 1], [], []>} : vector<64x64xbf16>, vector<64x8xbf16>, vector<64x8xf32> -> vector<64x8xf32>
    %c0_30 = arith.constant 0 : index
    %c0_31 = arith.constant 0 : index
    %42 = vector.load %arg13[%c0_30, %c0_31] : memref<64x1xf32, #tpu.memory_space<vmem>>, vector<64x1xf32>
    %43 = vector.broadcast %42 : vector<64x1xf32> to vector<64x8xf32>
    %44 = arith.addf %41, %43 : vector<64x8xf32>
    %cst_32 = arith.constant 0.000000e+00 : f32
    %45 = vector.broadcast %cst_32 : f32 to vector<64x8xf32>
    %46 = arith.maximumf %44, %45 : vector<64x8xf32>
    %c0_33 = arith.constant 0 : index
    %c0_34 = arith.constant 0 : index
    %47 = vector.load %arg14[%c0_33, %c0_34] : memref<128x32xf32, #tpu.memory_space<vmem>>, vector<128x32xf32>
    %48 = arith.truncf %47 : vector<128x32xf32> to vector<128x32xbf16>
    %49 = arith.truncf %3 : vector<32x8xf32> to vector<32x8xbf16>
    %cst_35 = arith.constant dense<0.000000e+00> : vector<128x8xf32>
    %50 = tpu.matmul %48, %49, %cst_35 {dimension_numbers = #tpu.dot_dimension_numbers<[1], [0], [0], [1], [0, 0, 1, 1], [], []>} : vector<128x32xbf16>, vector<32x8xbf16>, vector<128x8xf32> -> vector<128x8xf32>
    %c0_36 = arith.constant 0 : index
    %c0_37 = arith.constant 0 : index
    %51 = vector.load %arg15[%c0_36, %c0_37] : memref<128x1xf32, #tpu.memory_space<vmem>>, vector<128x1xf32>
    %52 = vector.broadcast %51 : vector<128x1xf32> to vector<128x8xf32>
    %53 = arith.addf %50, %52 : vector<128x8xf32>
    %cst_38 = arith.constant 0.000000e+00 : f32
    %54 = vector.broadcast %cst_38 : f32 to vector<128x8xf32>
    %55 = arith.maximumf %53, %54 : vector<128x8xf32>
    %cst_39 = arith.constant 0.000000e+00 : f32
    %56 = vector.broadcast %cst_39 : f32 to vector<8x8xf32>
    %cst_40 = arith.constant 0.000000e+00 : f32
    %57 = vector.broadcast %cst_40 : f32 to vector<16x8xf32>
    %58 = vector.extract_strided_slice %28 {offsets = [0, 0], sizes = [1, 8], strides = [1, 1]} : vector<64x8xf32> to vector<1x8xf32>
    %59 = vector.extract_strided_slice %46 {offsets = [0, 0], sizes = [8, 8], strides = [1, 1]} : vector<64x8xf32> to vector<8x8xf32>
    %60 = vector.broadcast %58 : vector<1x8xf32> to vector<8x8xf32>
    %61 = arith.mulf %60, %59 : vector<8x8xf32>
    %62 = arith.addf %56, %61 : vector<8x8xf32>
    %63 = vector.extract_strided_slice %55 {offsets = [0, 0], sizes = [16, 8], strides = [1, 1]} : vector<128x8xf32> to vector<16x8xf32>
    %64 = vector.broadcast %58 : vector<1x8xf32> to vector<16x8xf32>
    %65 = arith.mulf %64, %63 : vector<16x8xf32>
    %66 = arith.addf %57, %65 : vector<16x8xf32>
    %67 = vector.extract_strided_slice %28 {offsets = [1, 0], sizes = [1, 8], strides = [1, 1]} : vector<64x8xf32> to vector<1x8xf32>
    %68 = vector.extract_strided_slice %46 {offsets = [8, 0], sizes = [8, 8], strides = [1, 1]} : vector<64x8xf32> to vector<8x8xf32>
    %69 = vector.broadcast %67 : vector<1x8xf32> to vector<8x8xf32>
    %70 = arith.mulf %69, %68 : vector<8x8xf32>
    %71 = arith.addf %62, %70 : vector<8x8xf32>
    %72 = vector.extract_strided_slice %55 {offsets = [16, 0], sizes = [16, 8], strides = [1, 1]} : vector<128x8xf32> to vector<16x8xf32>
    %73 = vector.broadcast %67 : vector<1x8xf32> to vector<16x8xf32>
    %74 = arith.mulf %73, %72 : vector<16x8xf32>
    %75 = arith.addf %66, %74 : vector<16x8xf32>
    %76 = vector.extract_strided_slice %28 {offsets = [2, 0], sizes = [1, 8], strides = [1, 1]} : vector<64x8xf32> to vector<1x8xf32>
    %77 = vector.extract_strided_slice %46 {offsets = [16, 0], sizes = [8, 8], strides = [1, 1]} : vector<64x8xf32> to vector<8x8xf32>
    %78 = vector.broadcast %76 : vector<1x8xf32> to vector<8x8xf32>
    %79 = arith.mulf %78, %77 : vector<8x8xf32>
    %80 = arith.addf %71, %79 : vector<8x8xf32>
    %81 = vector.extract_strided_slice %55 {offsets = [32, 0], sizes = [16, 8], strides = [1, 1]} : vector<128x8xf32> to vector<16x8xf32>
    %82 = vector.broadcast %76 : vector<1x8xf32> to vector<16x8xf32>
    %83 = arith.mulf %82, %81 : vector<16x8xf32>
    %84 = arith.addf %75, %83 : vector<16x8xf32>
    %85 = vector.extract_strided_slice %28 {offsets = [3, 0], sizes = [1, 8], strides = [1, 1]} : vector<64x8xf32> to vector<1x8xf32>
    %86 = vector.extract_strided_slice %46 {offsets = [24, 0], sizes = [8, 8], strides = [1, 1]} : vector<64x8xf32> to vector<8x8xf32>
    %87 = vector.broadcast %85 : vector<1x8xf32> to vector<8x8xf32>
    %88 = arith.mulf %87, %86 : vector<8x8xf32>
    %89 = arith.addf %80, %88 : vector<8x8xf32>
    %90 = vector.extract_strided_slice %55 {offsets = [48, 0], sizes = [16, 8], strides = [1, 1]} : vector<128x8xf32> to vector<16x8xf32>
    %91 = vector.broadcast %85 : vector<1x8xf32> to vector<16x8xf32>
    %92 = arith.mulf %91, %90 : vector<16x8xf32>
    %93 = arith.addf %84, %92 : vector<16x8xf32>
    %94 = vector.extract_strided_slice %28 {offsets = [4, 0], sizes = [1, 8], strides = [1, 1]} : vector<64x8xf32> to vector<1x8xf32>
    %95 = vector.extract_strided_slice %46 {offsets = [32, 0], sizes = [8, 8], strides = [1, 1]} : vector<64x8xf32> to vector<8x8xf32>
    %96 = vector.broadcast %94 : vector<1x8xf32> to vector<8x8xf32>
    %97 = arith.mulf %96, %95 : vector<8x8xf32>
    %98 = arith.addf %89, %97 : vector<8x8xf32>
    %99 = vector.extract_strided_slice %55 {offsets = [64, 0], sizes = [16, 8], strides = [1, 1]} : vector<128x8xf32> to vector<16x8xf32>
    %100 = vector.broadcast %94 : vector<1x8xf32> to vector<16x8xf32>
    %101 = arith.mulf %100, %99 : vector<16x8xf32>
    %102 = arith.addf %93, %101 : vector<16x8xf32>
    %103 = vector.extract_strided_slice %28 {offsets = [5, 0], sizes = [1, 8], strides = [1, 1]} : vector<64x8xf32> to vector<1x8xf32>
    %104 = vector.extract_strided_slice %46 {offsets = [40, 0], sizes = [8, 8], strides = [1, 1]} : vector<64x8xf32> to vector<8x8xf32>
    %105 = vector.broadcast %103 : vector<1x8xf32> to vector<8x8xf32>
    %106 = arith.mulf %105, %104 : vector<8x8xf32>
    %107 = arith.addf %98, %106 : vector<8x8xf32>
    %108 = vector.extract_strided_slice %55 {offsets = [80, 0], sizes = [16, 8], strides = [1, 1]} : vector<128x8xf32> to vector<16x8xf32>
    %109 = vector.broadcast %103 : vector<1x8xf32> to vector<16x8xf32>
    %110 = arith.mulf %109, %108 : vector<16x8xf32>
    %111 = arith.addf %102, %110 : vector<16x8xf32>
    %112 = vector.extract_strided_slice %28 {offsets = [6, 0], sizes = [1, 8], strides = [1, 1]} : vector<64x8xf32> to vector<1x8xf32>
    %113 = vector.extract_strided_slice %46 {offsets = [48, 0], sizes = [8, 8], strides = [1, 1]} : vector<64x8xf32> to vector<8x8xf32>
    %114 = vector.broadcast %112 : vector<1x8xf32> to vector<8x8xf32>
    %115 = arith.mulf %114, %113 : vector<8x8xf32>
    %116 = arith.addf %107, %115 : vector<8x8xf32>
    %117 = vector.extract_strided_slice %55 {offsets = [96, 0], sizes = [16, 8], strides = [1, 1]} : vector<128x8xf32> to vector<16x8xf32>
    %118 = vector.broadcast %112 : vector<1x8xf32> to vector<16x8xf32>
    %119 = arith.mulf %118, %117 : vector<16x8xf32>
    %120 = arith.addf %111, %119 : vector<16x8xf32>
    %121 = vector.extract_strided_slice %28 {offsets = [7, 0], sizes = [1, 8], strides = [1, 1]} : vector<64x8xf32> to vector<1x8xf32>
    %122 = vector.extract_strided_slice %46 {offsets = [56, 0], sizes = [8, 8], strides = [1, 1]} : vector<64x8xf32> to vector<8x8xf32>
    %123 = vector.broadcast %121 : vector<1x8xf32> to vector<8x8xf32>
    %124 = arith.mulf %123, %122 : vector<8x8xf32>
    %125 = arith.addf %116, %124 : vector<8x8xf32>
    %126 = vector.extract_strided_slice %55 {offsets = [112, 0], sizes = [16, 8], strides = [1, 1]} : vector<128x8xf32> to vector<16x8xf32>
    %127 = vector.broadcast %121 : vector<1x8xf32> to vector<16x8xf32>
    %128 = arith.mulf %127, %126 : vector<16x8xf32>
    %129 = arith.addf %120, %128 : vector<16x8xf32>
    %cst_41 = arith.constant 0.000000e+00 : f32
    %130 = vector.broadcast %cst_41 : f32 to vector<8x8xf32>
    %cst_42 = arith.constant 0.000000e+00 : f32
    %131 = vector.broadcast %cst_42 : f32 to vector<16x8xf32>
    %132 = vector.extract_strided_slice %28 {offsets = [8, 0], sizes = [1, 8], strides = [1, 1]} : vector<64x8xf32> to vector<1x8xf32>
    %133 = vector.extract_strided_slice %46 {offsets = [0, 0], sizes = [8, 8], strides = [1, 1]} : vector<64x8xf32> to vector<8x8xf32>
    %134 = vector.broadcast %132 : vector<1x8xf32> to vector<8x8xf32>
    %135 = arith.mulf %134, %133 : vector<8x8xf32>
    %136 = arith.addf %130, %135 : vector<8x8xf32>
    %137 = vector.extract_strided_slice %55 {offsets = [0, 0], sizes = [16, 8], strides = [1, 1]} : vector<128x8xf32> to vector<16x8xf32>
    %138 = vector.broadcast %132 : vector<1x8xf32> to vector<16x8xf32>
    %139 = arith.mulf %138, %137 : vector<16x8xf32>
    %140 = arith.addf %131, %139 : vector<16x8xf32>
    %141 = vector.extract_strided_slice %28 {offsets = [9, 0], sizes = [1, 8], strides = [1, 1]} : vector<64x8xf32> to vector<1x8xf32>
    %142 = vector.extract_strided_slice %46 {offsets = [8, 0], sizes = [8, 8], strides = [1, 1]} : vector<64x8xf32> to vector<8x8xf32>
    %143 = vector.broadcast %141 : vector<1x8xf32> to vector<8x8xf32>
    %144 = arith.mulf %143, %142 : vector<8x8xf32>
    %145 = arith.addf %136, %144 : vector<8x8xf32>
    %146 = vector.extract_strided_slice %55 {offsets = [16, 0], sizes = [16, 8], strides = [1, 1]} : vector<128x8xf32> to vector<16x8xf32>
    %147 = vector.broadcast %141 : vector<1x8xf32> to vector<16x8xf32>
    %148 = arith.mulf %147, %146 : vector<16x8xf32>
    %149 = arith.addf %140, %148 : vector<16x8xf32>
    %150 = vector.extract_strided_slice %28 {offsets = [10, 0], sizes = [1, 8], strides = [1, 1]} : vector<64x8xf32> to vector<1x8xf32>
    %151 = vector.extract_strided_slice %46 {offsets = [16, 0], sizes = [8, 8], strides = [1, 1]} : vector<64x8xf32> to vector<8x8xf32>
    %152 = vector.broadcast %150 : vector<1x8xf32> to vector<8x8xf32>
    %153 = arith.mulf %152, %151 : vector<8x8xf32>
    %154 = arith.addf %145, %153 : vector<8x8xf32>
    %155 = vector.extract_strided_slice %55 {offsets = [32, 0], sizes = [16, 8], strides = [1, 1]} : vector<128x8xf32> to vector<16x8xf32>
    %156 = vector.broadcast %150 : vector<1x8xf32> to vector<16x8xf32>
    %157 = arith.mulf %156, %155 : vector<16x8xf32>
    %158 = arith.addf %149, %157 : vector<16x8xf32>
    %159 = vector.extract_strided_slice %28 {offsets = [11, 0], sizes = [1, 8], strides = [1, 1]} : vector<64x8xf32> to vector<1x8xf32>
    %160 = vector.extract_strided_slice %46 {offsets = [24, 0], sizes = [8, 8], strides = [1, 1]} : vector<64x8xf32> to vector<8x8xf32>
    %161 = vector.broadcast %159 : vector<1x8xf32> to vector<8x8xf32>
    %162 = arith.mulf %161, %160 : vector<8x8xf32>
    %163 = arith.addf %154, %162 : vector<8x8xf32>
    %164 = vector.extract_strided_slice %55 {offsets = [48, 0], sizes = [16, 8], strides = [1, 1]} : vector<128x8xf32> to vector<16x8xf32>
    %165 = vector.broadcast %159 : vector<1x8xf32> to vector<16x8xf32>
    %166 = arith.mulf %165, %164 : vector<16x8xf32>
    %167 = arith.addf %158, %166 : vector<16x8xf32>
    %168 = vector.extract_strided_slice %28 {offsets = [12, 0], sizes = [1, 8], strides = [1, 1]} : vector<64x8xf32> to vector<1x8xf32>
    %169 = vector.extract_strided_slice %46 {offsets = [32, 0], sizes = [8, 8], strides = [1, 1]} : vector<64x8xf32> to vector<8x8xf32>
    %170 = vector.broadcast %168 : vector<1x8xf32> to vector<8x8xf32>
    %171 = arith.mulf %170, %169 : vector<8x8xf32>
    %172 = arith.addf %163, %171 : vector<8x8xf32>
    %173 = vector.extract_strided_slice %55 {offsets = [64, 0], sizes = [16, 8], strides = [1, 1]} : vector<128x8xf32> to vector<16x8xf32>
    %174 = vector.broadcast %168 : vector<1x8xf32> to vector<16x8xf32>
    %175 = arith.mulf %174, %173 : vector<16x8xf32>
    %176 = arith.addf %167, %175 : vector<16x8xf32>
    %177 = vector.extract_strided_slice %28 {offsets = [13, 0], sizes = [1, 8], strides = [1, 1]} : vector<64x8xf32> to vector<1x8xf32>
    %178 = vector.extract_strided_slice %46 {offsets = [40, 0], sizes = [8, 8], strides = [1, 1]} : vector<64x8xf32> to vector<8x8xf32>
    %179 = vector.broadcast %177 : vector<1x8xf32> to vector<8x8xf32>
    %180 = arith.mulf %179, %178 : vector<8x8xf32>
    %181 = arith.addf %172, %180 : vector<8x8xf32>
    %182 = vector.extract_strided_slice %55 {offsets = [80, 0], sizes = [16, 8], strides = [1, 1]} : vector<128x8xf32> to vector<16x8xf32>
    %183 = vector.broadcast %177 : vector<1x8xf32> to vector<16x8xf32>
    %184 = arith.mulf %183, %182 : vector<16x8xf32>
    %185 = arith.addf %176, %184 : vector<16x8xf32>
    %186 = vector.extract_strided_slice %28 {offsets = [14, 0], sizes = [1, 8], strides = [1, 1]} : vector<64x8xf32> to vector<1x8xf32>
    %187 = vector.extract_strided_slice %46 {offsets = [48, 0], sizes = [8, 8], strides = [1, 1]} : vector<64x8xf32> to vector<8x8xf32>
    %188 = vector.broadcast %186 : vector<1x8xf32> to vector<8x8xf32>
    %189 = arith.mulf %188, %187 : vector<8x8xf32>
    %190 = arith.addf %181, %189 : vector<8x8xf32>
    %191 = vector.extract_strided_slice %55 {offsets = [96, 0], sizes = [16, 8], strides = [1, 1]} : vector<128x8xf32> to vector<16x8xf32>
    %192 = vector.broadcast %186 : vector<1x8xf32> to vector<16x8xf32>
    %193 = arith.mulf %192, %191 : vector<16x8xf32>
    %194 = arith.addf %185, %193 : vector<16x8xf32>
    %195 = vector.extract_strided_slice %28 {offsets = [15, 0], sizes = [1, 8], strides = [1, 1]} : vector<64x8xf32> to vector<1x8xf32>
    %196 = vector.extract_strided_slice %46 {offsets = [56, 0], sizes = [8, 8], strides = [1, 1]} : vector<64x8xf32> to vector<8x8xf32>
    %197 = vector.broadcast %195 : vector<1x8xf32> to vector<8x8xf32>
    %198 = arith.mulf %197, %196 : vector<8x8xf32>
    %199 = arith.addf %190, %198 : vector<8x8xf32>
    %200 = vector.extract_strided_slice %55 {offsets = [112, 0], sizes = [16, 8], strides = [1, 1]} : vector<128x8xf32> to vector<16x8xf32>
    %201 = vector.broadcast %195 : vector<1x8xf32> to vector<16x8xf32>
    %202 = arith.mulf %201, %200 : vector<16x8xf32>
    %203 = arith.addf %194, %202 : vector<16x8xf32>
    %cst_43 = arith.constant 0.000000e+00 : f32
    %204 = vector.broadcast %cst_43 : f32 to vector<8x8xf32>
    %cst_44 = arith.constant 0.000000e+00 : f32
    %205 = vector.broadcast %cst_44 : f32 to vector<16x8xf32>
    %206 = vector.extract_strided_slice %28 {offsets = [16, 0], sizes = [1, 8], strides = [1, 1]} : vector<64x8xf32> to vector<1x8xf32>
    %207 = vector.extract_strided_slice %46 {offsets = [0, 0], sizes = [8, 8], strides = [1, 1]} : vector<64x8xf32> to vector<8x8xf32>
    %208 = vector.broadcast %206 : vector<1x8xf32> to vector<8x8xf32>
    %209 = arith.mulf %208, %207 : vector<8x8xf32>
    %210 = arith.addf %204, %209 : vector<8x8xf32>
    %211 = vector.extract_strided_slice %55 {offsets = [0, 0], sizes = [16, 8], strides = [1, 1]} : vector<128x8xf32> to vector<16x8xf32>
    %212 = vector.broadcast %206 : vector<1x8xf32> to vector<16x8xf32>
    %213 = arith.mulf %212, %211 : vector<16x8xf32>
    %214 = arith.addf %205, %213 : vector<16x8xf32>
    %215 = vector.extract_strided_slice %28 {offsets = [17, 0], sizes = [1, 8], strides = [1, 1]} : vector<64x8xf32> to vector<1x8xf32>
    %216 = vector.extract_strided_slice %46 {offsets = [8, 0], sizes = [8, 8], strides = [1, 1]} : vector<64x8xf32> to vector<8x8xf32>
    %217 = vector.broadcast %215 : vector<1x8xf32> to vector<8x8xf32>
    %218 = arith.mulf %217, %216 : vector<8x8xf32>
    %219 = arith.addf %210, %218 : vector<8x8xf32>
    %220 = vector.extract_strided_slice %55 {offsets = [16, 0], sizes = [16, 8], strides = [1, 1]} : vector<128x8xf32> to vector<16x8xf32>
    %221 = vector.broadcast %215 : vector<1x8xf32> to vector<16x8xf32>
    %222 = arith.mulf %221, %220 : vector<16x8xf32>
    %223 = arith.addf %214, %222 : vector<16x8xf32>
    %224 = vector.extract_strided_slice %28 {offsets = [18, 0], sizes = [1, 8], strides = [1, 1]} : vector<64x8xf32> to vector<1x8xf32>
    %225 = vector.extract_strided_slice %46 {offsets = [16, 0], sizes = [8, 8], strides = [1, 1]} : vector<64x8xf32> to vector<8x8xf32>
    %226 = vector.broadcast %224 : vector<1x8xf32> to vector<8x8xf32>
    %227 = arith.mulf %226, %225 : vector<8x8xf32>
    %228 = arith.addf %219, %227 : vector<8x8xf32>
    %229 = vector.extract_strided_slice %55 {offsets = [32, 0], sizes = [16, 8], strides = [1, 1]} : vector<128x8xf32> to vector<16x8xf32>
    %230 = vector.broadcast %224 : vector<1x8xf32> to vector<16x8xf32>
    %231 = arith.mulf %230, %229 : vector<16x8xf32>
    %232 = arith.addf %223, %231 : vector<16x8xf32>
    %233 = vector.extract_strided_slice %28 {offsets = [19, 0], sizes = [1, 8], strides = [1, 1]} : vector<64x8xf32> to vector<1x8xf32>
    %234 = vector.extract_strided_slice %46 {offsets = [24, 0], sizes = [8, 8], strides = [1, 1]} : vector<64x8xf32> to vector<8x8xf32>
    %235 = vector.broadcast %233 : vector<1x8xf32> to vector<8x8xf32>
    %236 = arith.mulf %235, %234 : vector<8x8xf32>
    %237 = arith.addf %228, %236 : vector<8x8xf32>
    %238 = vector.extract_strided_slice %55 {offsets = [48, 0], sizes = [16, 8], strides = [1, 1]} : vector<128x8xf32> to vector<16x8xf32>
    %239 = vector.broadcast %233 : vector<1x8xf32> to vector<16x8xf32>
    %240 = arith.mulf %239, %238 : vector<16x8xf32>
    %241 = arith.addf %232, %240 : vector<16x8xf32>
    %242 = vector.extract_strided_slice %28 {offsets = [20, 0], sizes = [1, 8], strides = [1, 1]} : vector<64x8xf32> to vector<1x8xf32>
    %243 = vector.extract_strided_slice %46 {offsets = [32, 0], sizes = [8, 8], strides = [1, 1]} : vector<64x8xf32> to vector<8x8xf32>
    %244 = vector.broadcast %242 : vector<1x8xf32> to vector<8x8xf32>
    %245 = arith.mulf %244, %243 : vector<8x8xf32>
    %246 = arith.addf %237, %245 : vector<8x8xf32>
    %247 = vector.extract_strided_slice %55 {offsets = [64, 0], sizes = [16, 8], strides = [1, 1]} : vector<128x8xf32> to vector<16x8xf32>
    %248 = vector.broadcast %242 : vector<1x8xf32> to vector<16x8xf32>
    %249 = arith.mulf %248, %247 : vector<16x8xf32>
    %250 = arith.addf %241, %249 : vector<16x8xf32>
    %251 = vector.extract_strided_slice %28 {offsets = [21, 0], sizes = [1, 8], strides = [1, 1]} : vector<64x8xf32> to vector<1x8xf32>
    %252 = vector.extract_strided_slice %46 {offsets = [40, 0], sizes = [8, 8], strides = [1, 1]} : vector<64x8xf32> to vector<8x8xf32>
    %253 = vector.broadcast %251 : vector<1x8xf32> to vector<8x8xf32>
    %254 = arith.mulf %253, %252 : vector<8x8xf32>
    %255 = arith.addf %246, %254 : vector<8x8xf32>
    %256 = vector.extract_strided_slice %55 {offsets = [80, 0], sizes = [16, 8], strides = [1, 1]} : vector<128x8xf32> to vector<16x8xf32>
    %257 = vector.broadcast %251 : vector<1x8xf32> to vector<16x8xf32>
    %258 = arith.mulf %257, %256 : vector<16x8xf32>
    %259 = arith.addf %250, %258 : vector<16x8xf32>
    %260 = vector.extract_strided_slice %28 {offsets = [22, 0], sizes = [1, 8], strides = [1, 1]} : vector<64x8xf32> to vector<1x8xf32>
    %261 = vector.extract_strided_slice %46 {offsets = [48, 0], sizes = [8, 8], strides = [1, 1]} : vector<64x8xf32> to vector<8x8xf32>
    %262 = vector.broadcast %260 : vector<1x8xf32> to vector<8x8xf32>
    %263 = arith.mulf %262, %261 : vector<8x8xf32>
    %264 = arith.addf %255, %263 : vector<8x8xf32>
    %265 = vector.extract_strided_slice %55 {offsets = [96, 0], sizes = [16, 8], strides = [1, 1]} : vector<128x8xf32> to vector<16x8xf32>
    %266 = vector.broadcast %260 : vector<1x8xf32> to vector<16x8xf32>
    %267 = arith.mulf %266, %265 : vector<16x8xf32>
    %268 = arith.addf %259, %267 : vector<16x8xf32>
    %269 = vector.extract_strided_slice %28 {offsets = [23, 0], sizes = [1, 8], strides = [1, 1]} : vector<64x8xf32> to vector<1x8xf32>
    %270 = vector.extract_strided_slice %46 {offsets = [56, 0], sizes = [8, 8], strides = [1, 1]} : vector<64x8xf32> to vector<8x8xf32>
    %271 = vector.broadcast %269 : vector<1x8xf32> to vector<8x8xf32>
    %272 = arith.mulf %271, %270 : vector<8x8xf32>
    %273 = arith.addf %264, %272 : vector<8x8xf32>
    %274 = vector.extract_strided_slice %55 {offsets = [112, 0], sizes = [16, 8], strides = [1, 1]} : vector<128x8xf32> to vector<16x8xf32>
    %275 = vector.broadcast %269 : vector<1x8xf32> to vector<16x8xf32>
    %276 = arith.mulf %275, %274 : vector<16x8xf32>
    %277 = arith.addf %268, %276 : vector<16x8xf32>
    %cst_45 = arith.constant 0.000000e+00 : f32
    %278 = vector.broadcast %cst_45 : f32 to vector<8x8xf32>
    %cst_46 = arith.constant 0.000000e+00 : f32
    %279 = vector.broadcast %cst_46 : f32 to vector<16x8xf32>
    %280 = vector.extract_strided_slice %28 {offsets = [24, 0], sizes = [1, 8], strides = [1, 1]} : vector<64x8xf32> to vector<1x8xf32>
    %281 = vector.extract_strided_slice %46 {offsets = [0, 0], sizes = [8, 8], strides = [1, 1]} : vector<64x8xf32> to vector<8x8xf32>
    %282 = vector.broadcast %280 : vector<1x8xf32> to vector<8x8xf32>
    %283 = arith.mulf %282, %281 : vector<8x8xf32>
    %284 = arith.addf %278, %283 : vector<8x8xf32>
    %285 = vector.extract_strided_slice %55 {offsets = [0, 0], sizes = [16, 8], strides = [1, 1]} : vector<128x8xf32> to vector<16x8xf32>
    %286 = vector.broadcast %280 : vector<1x8xf32> to vector<16x8xf32>
    %287 = arith.mulf %286, %285 : vector<16x8xf32>
    %288 = arith.addf %279, %287 : vector<16x8xf32>
    %289 = vector.extract_strided_slice %28 {offsets = [25, 0], sizes = [1, 8], strides = [1, 1]} : vector<64x8xf32> to vector<1x8xf32>
    %290 = vector.extract_strided_slice %46 {offsets = [8, 0], sizes = [8, 8], strides = [1, 1]} : vector<64x8xf32> to vector<8x8xf32>
    %291 = vector.broadcast %289 : vector<1x8xf32> to vector<8x8xf32>
    %292 = arith.mulf %291, %290 : vector<8x8xf32>
    %293 = arith.addf %284, %292 : vector<8x8xf32>
    %294 = vector.extract_strided_slice %55 {offsets = [16, 0], sizes = [16, 8], strides = [1, 1]} : vector<128x8xf32> to vector<16x8xf32>
    %295 = vector.broadcast %289 : vector<1x8xf32> to vector<16x8xf32>
    %296 = arith.mulf %295, %294 : vector<16x8xf32>
    %297 = arith.addf %288, %296 : vector<16x8xf32>
    %298 = vector.extract_strided_slice %28 {offsets = [26, 0], sizes = [1, 8], strides = [1, 1]} : vector<64x8xf32> to vector<1x8xf32>
    %299 = vector.extract_strided_slice %46 {offsets = [16, 0], sizes = [8, 8], strides = [1, 1]} : vector<64x8xf32> to vector<8x8xf32>
    %300 = vector.broadcast %298 : vector<1x8xf32> to vector<8x8xf32>
    %301 = arith.mulf %300, %299 : vector<8x8xf32>
    %302 = arith.addf %293, %301 : vector<8x8xf32>
    %303 = vector.extract_strided_slice %55 {offsets = [32, 0], sizes = [16, 8], strides = [1, 1]} : vector<128x8xf32> to vector<16x8xf32>
    %304 = vector.broadcast %298 : vector<1x8xf32> to vector<16x8xf32>
    %305 = arith.mulf %304, %303 : vector<16x8xf32>
    %306 = arith.addf %297, %305 : vector<16x8xf32>
    %307 = vector.extract_strided_slice %28 {offsets = [27, 0], sizes = [1, 8], strides = [1, 1]} : vector<64x8xf32> to vector<1x8xf32>
    %308 = vector.extract_strided_slice %46 {offsets = [24, 0], sizes = [8, 8], strides = [1, 1]} : vector<64x8xf32> to vector<8x8xf32>
    %309 = vector.broadcast %307 : vector<1x8xf32> to vector<8x8xf32>
    %310 = arith.mulf %309, %308 : vector<8x8xf32>
    %311 = arith.addf %302, %310 : vector<8x8xf32>
    %312 = vector.extract_strided_slice %55 {offsets = [48, 0], sizes = [16, 8], strides = [1, 1]} : vector<128x8xf32> to vector<16x8xf32>
    %313 = vector.broadcast %307 : vector<1x8xf32> to vector<16x8xf32>
    %314 = arith.mulf %313, %312 : vector<16x8xf32>
    %315 = arith.addf %306, %314 : vector<16x8xf32>
    %316 = vector.extract_strided_slice %28 {offsets = [28, 0], sizes = [1, 8], strides = [1, 1]} : vector<64x8xf32> to vector<1x8xf32>
    %317 = vector.extract_strided_slice %46 {offsets = [32, 0], sizes = [8, 8], strides = [1, 1]} : vector<64x8xf32> to vector<8x8xf32>
    %318 = vector.broadcast %316 : vector<1x8xf32> to vector<8x8xf32>
    %319 = arith.mulf %318, %317 : vector<8x8xf32>
    %320 = arith.addf %311, %319 : vector<8x8xf32>
    %321 = vector.extract_strided_slice %55 {offsets = [64, 0], sizes = [16, 8], strides = [1, 1]} : vector<128x8xf32> to vector<16x8xf32>
    %322 = vector.broadcast %316 : vector<1x8xf32> to vector<16x8xf32>
    %323 = arith.mulf %322, %321 : vector<16x8xf32>
    %324 = arith.addf %315, %323 : vector<16x8xf32>
    %325 = vector.extract_strided_slice %28 {offsets = [29, 0], sizes = [1, 8], strides = [1, 1]} : vector<64x8xf32> to vector<1x8xf32>
    %326 = vector.extract_strided_slice %46 {offsets = [40, 0], sizes = [8, 8], strides = [1, 1]} : vector<64x8xf32> to vector<8x8xf32>
    %327 = vector.broadcast %325 : vector<1x8xf32> to vector<8x8xf32>
    %328 = arith.mulf %327, %326 : vector<8x8xf32>
    %329 = arith.addf %320, %328 : vector<8x8xf32>
    %330 = vector.extract_strided_slice %55 {offsets = [80, 0], sizes = [16, 8], strides = [1, 1]} : vector<128x8xf32> to vector<16x8xf32>
    %331 = vector.broadcast %325 : vector<1x8xf32> to vector<16x8xf32>
    %332 = arith.mulf %331, %330 : vector<16x8xf32>
    %333 = arith.addf %324, %332 : vector<16x8xf32>
    %334 = vector.extract_strided_slice %28 {offsets = [30, 0], sizes = [1, 8], strides = [1, 1]} : vector<64x8xf32> to vector<1x8xf32>
    %335 = vector.extract_strided_slice %46 {offsets = [48, 0], sizes = [8, 8], strides = [1, 1]} : vector<64x8xf32> to vector<8x8xf32>
    %336 = vector.broadcast %334 : vector<1x8xf32> to vector<8x8xf32>
    %337 = arith.mulf %336, %335 : vector<8x8xf32>
    %338 = arith.addf %329, %337 : vector<8x8xf32>
    %339 = vector.extract_strided_slice %55 {offsets = [96, 0], sizes = [16, 8], strides = [1, 1]} : vector<128x8xf32> to vector<16x8xf32>
    %340 = vector.broadcast %334 : vector<1x8xf32> to vector<16x8xf32>
    %341 = arith.mulf %340, %339 : vector<16x8xf32>
    %342 = arith.addf %333, %341 : vector<16x8xf32>
    %343 = vector.extract_strided_slice %28 {offsets = [31, 0], sizes = [1, 8], strides = [1, 1]} : vector<64x8xf32> to vector<1x8xf32>
    %344 = vector.extract_strided_slice %46 {offsets = [56, 0], sizes = [8, 8], strides = [1, 1]} : vector<64x8xf32> to vector<8x8xf32>
    %345 = vector.broadcast %343 : vector<1x8xf32> to vector<8x8xf32>
    %346 = arith.mulf %345, %344 : vector<8x8xf32>
    %347 = arith.addf %338, %346 : vector<8x8xf32>
    %348 = vector.extract_strided_slice %55 {offsets = [112, 0], sizes = [16, 8], strides = [1, 1]} : vector<128x8xf32> to vector<16x8xf32>
    %349 = vector.broadcast %343 : vector<1x8xf32> to vector<16x8xf32>
    %350 = arith.mulf %349, %348 : vector<16x8xf32>
    %351 = arith.addf %342, %350 : vector<16x8xf32>
    %cst_47 = arith.constant 0.000000e+00 : f32
    %352 = vector.broadcast %cst_47 : f32 to vector<8x8xf32>
    %cst_48 = arith.constant 0.000000e+00 : f32
    %353 = vector.broadcast %cst_48 : f32 to vector<16x8xf32>
    %354 = vector.extract_strided_slice %28 {offsets = [32, 0], sizes = [1, 8], strides = [1, 1]} : vector<64x8xf32> to vector<1x8xf32>
    %355 = vector.extract_strided_slice %46 {offsets = [0, 0], sizes = [8, 8], strides = [1, 1]} : vector<64x8xf32> to vector<8x8xf32>
    %356 = vector.broadcast %354 : vector<1x8xf32> to vector<8x8xf32>
    %357 = arith.mulf %356, %355 : vector<8x8xf32>
    %358 = arith.addf %352, %357 : vector<8x8xf32>
    %359 = vector.extract_strided_slice %55 {offsets = [0, 0], sizes = [16, 8], strides = [1, 1]} : vector<128x8xf32> to vector<16x8xf32>
    %360 = vector.broadcast %354 : vector<1x8xf32> to vector<16x8xf32>
    %361 = arith.mulf %360, %359 : vector<16x8xf32>
    %362 = arith.addf %353, %361 : vector<16x8xf32>
    %363 = vector.extract_strided_slice %28 {offsets = [33, 0], sizes = [1, 8], strides = [1, 1]} : vector<64x8xf32> to vector<1x8xf32>
    %364 = vector.extract_strided_slice %46 {offsets = [8, 0], sizes = [8, 8], strides = [1, 1]} : vector<64x8xf32> to vector<8x8xf32>
    %365 = vector.broadcast %363 : vector<1x8xf32> to vector<8x8xf32>
    %366 = arith.mulf %365, %364 : vector<8x8xf32>
    %367 = arith.addf %358, %366 : vector<8x8xf32>
    %368 = vector.extract_strided_slice %55 {offsets = [16, 0], sizes = [16, 8], strides = [1, 1]} : vector<128x8xf32> to vector<16x8xf32>
    %369 = vector.broadcast %363 : vector<1x8xf32> to vector<16x8xf32>
    %370 = arith.mulf %369, %368 : vector<16x8xf32>
    %371 = arith.addf %362, %370 : vector<16x8xf32>
    %372 = vector.extract_strided_slice %28 {offsets = [34, 0], sizes = [1, 8], strides = [1, 1]} : vector<64x8xf32> to vector<1x8xf32>
    %373 = vector.extract_strided_slice %46 {offsets = [16, 0], sizes = [8, 8], strides = [1, 1]} : vector<64x8xf32> to vector<8x8xf32>
    %374 = vector.broadcast %372 : vector<1x8xf32> to vector<8x8xf32>
    %375 = arith.mulf %374, %373 : vector<8x8xf32>
    %376 = arith.addf %367, %375 : vector<8x8xf32>
    %377 = vector.extract_strided_slice %55 {offsets = [32, 0], sizes = [16, 8], strides = [1, 1]} : vector<128x8xf32> to vector<16x8xf32>
    %378 = vector.broadcast %372 : vector<1x8xf32> to vector<16x8xf32>
    %379 = arith.mulf %378, %377 : vector<16x8xf32>
    %380 = arith.addf %371, %379 : vector<16x8xf32>
    %381 = vector.extract_strided_slice %28 {offsets = [35, 0], sizes = [1, 8], strides = [1, 1]} : vector<64x8xf32> to vector<1x8xf32>
    %382 = vector.extract_strided_slice %46 {offsets = [24, 0], sizes = [8, 8], strides = [1, 1]} : vector<64x8xf32> to vector<8x8xf32>
    %383 = vector.broadcast %381 : vector<1x8xf32> to vector<8x8xf32>
    %384 = arith.mulf %383, %382 : vector<8x8xf32>
    %385 = arith.addf %376, %384 : vector<8x8xf32>
    %386 = vector.extract_strided_slice %55 {offsets = [48, 0], sizes = [16, 8], strides = [1, 1]} : vector<128x8xf32> to vector<16x8xf32>
    %387 = vector.broadcast %381 : vector<1x8xf32> to vector<16x8xf32>
    %388 = arith.mulf %387, %386 : vector<16x8xf32>
    %389 = arith.addf %380, %388 : vector<16x8xf32>
    %390 = vector.extract_strided_slice %28 {offsets = [36, 0], sizes = [1, 8], strides = [1, 1]} : vector<64x8xf32> to vector<1x8xf32>
    %391 = vector.extract_strided_slice %46 {offsets = [32, 0], sizes = [8, 8], strides = [1, 1]} : vector<64x8xf32> to vector<8x8xf32>
    %392 = vector.broadcast %390 : vector<1x8xf32> to vector<8x8xf32>
    %393 = arith.mulf %392, %391 : vector<8x8xf32>
    %394 = arith.addf %385, %393 : vector<8x8xf32>
    %395 = vector.extract_strided_slice %55 {offsets = [64, 0], sizes = [16, 8], strides = [1, 1]} : vector<128x8xf32> to vector<16x8xf32>
    %396 = vector.broadcast %390 : vector<1x8xf32> to vector<16x8xf32>
    %397 = arith.mulf %396, %395 : vector<16x8xf32>
    %398 = arith.addf %389, %397 : vector<16x8xf32>
    %399 = vector.extract_strided_slice %28 {offsets = [37, 0], sizes = [1, 8], strides = [1, 1]} : vector<64x8xf32> to vector<1x8xf32>
    %400 = vector.extract_strided_slice %46 {offsets = [40, 0], sizes = [8, 8], strides = [1, 1]} : vector<64x8xf32> to vector<8x8xf32>
    %401 = vector.broadcast %399 : vector<1x8xf32> to vector<8x8xf32>
    %402 = arith.mulf %401, %400 : vector<8x8xf32>
    %403 = arith.addf %394, %402 : vector<8x8xf32>
    %404 = vector.extract_strided_slice %55 {offsets = [80, 0], sizes = [16, 8], strides = [1, 1]} : vector<128x8xf32> to vector<16x8xf32>
    %405 = vector.broadcast %399 : vector<1x8xf32> to vector<16x8xf32>
    %406 = arith.mulf %405, %404 : vector<16x8xf32>
    %407 = arith.addf %398, %406 : vector<16x8xf32>
    %408 = vector.extract_strided_slice %28 {offsets = [38, 0], sizes = [1, 8], strides = [1, 1]} : vector<64x8xf32> to vector<1x8xf32>
    %409 = vector.extract_strided_slice %46 {offsets = [48, 0], sizes = [8, 8], strides = [1, 1]} : vector<64x8xf32> to vector<8x8xf32>
    %410 = vector.broadcast %408 : vector<1x8xf32> to vector<8x8xf32>
    %411 = arith.mulf %410, %409 : vector<8x8xf32>
    %412 = arith.addf %403, %411 : vector<8x8xf32>
    %413 = vector.extract_strided_slice %55 {offsets = [96, 0], sizes = [16, 8], strides = [1, 1]} : vector<128x8xf32> to vector<16x8xf32>
    %414 = vector.broadcast %408 : vector<1x8xf32> to vector<16x8xf32>
    %415 = arith.mulf %414, %413 : vector<16x8xf32>
    %416 = arith.addf %407, %415 : vector<16x8xf32>
    %417 = vector.extract_strided_slice %28 {offsets = [39, 0], sizes = [1, 8], strides = [1, 1]} : vector<64x8xf32> to vector<1x8xf32>
    %418 = vector.extract_strided_slice %46 {offsets = [56, 0], sizes = [8, 8], strides = [1, 1]} : vector<64x8xf32> to vector<8x8xf32>
    %419 = vector.broadcast %417 : vector<1x8xf32> to vector<8x8xf32>
    %420 = arith.mulf %419, %418 : vector<8x8xf32>
    %421 = arith.addf %412, %420 : vector<8x8xf32>
    %422 = vector.extract_strided_slice %55 {offsets = [112, 0], sizes = [16, 8], strides = [1, 1]} : vector<128x8xf32> to vector<16x8xf32>
    %423 = vector.broadcast %417 : vector<1x8xf32> to vector<16x8xf32>
    %424 = arith.mulf %423, %422 : vector<16x8xf32>
    %425 = arith.addf %416, %424 : vector<16x8xf32>
    %cst_49 = arith.constant 0.000000e+00 : f32
    %426 = vector.broadcast %cst_49 : f32 to vector<8x8xf32>
    %cst_50 = arith.constant 0.000000e+00 : f32
    %427 = vector.broadcast %cst_50 : f32 to vector<16x8xf32>
    %428 = vector.extract_strided_slice %28 {offsets = [40, 0], sizes = [1, 8], strides = [1, 1]} : vector<64x8xf32> to vector<1x8xf32>
    %429 = vector.extract_strided_slice %46 {offsets = [0, 0], sizes = [8, 8], strides = [1, 1]} : vector<64x8xf32> to vector<8x8xf32>
    %430 = vector.broadcast %428 : vector<1x8xf32> to vector<8x8xf32>
    %431 = arith.mulf %430, %429 : vector<8x8xf32>
    %432 = arith.addf %426, %431 : vector<8x8xf32>
    %433 = vector.extract_strided_slice %55 {offsets = [0, 0], sizes = [16, 8], strides = [1, 1]} : vector<128x8xf32> to vector<16x8xf32>
    %434 = vector.broadcast %428 : vector<1x8xf32> to vector<16x8xf32>
    %435 = arith.mulf %434, %433 : vector<16x8xf32>
    %436 = arith.addf %427, %435 : vector<16x8xf32>
    %437 = vector.extract_strided_slice %28 {offsets = [41, 0], sizes = [1, 8], strides = [1, 1]} : vector<64x8xf32> to vector<1x8xf32>
    %438 = vector.extract_strided_slice %46 {offsets = [8, 0], sizes = [8, 8], strides = [1, 1]} : vector<64x8xf32> to vector<8x8xf32>
    %439 = vector.broadcast %437 : vector<1x8xf32> to vector<8x8xf32>
    %440 = arith.mulf %439, %438 : vector<8x8xf32>
    %441 = arith.addf %432, %440 : vector<8x8xf32>
    %442 = vector.extract_strided_slice %55 {offsets = [16, 0], sizes = [16, 8], strides = [1, 1]} : vector<128x8xf32> to vector<16x8xf32>
    %443 = vector.broadcast %437 : vector<1x8xf32> to vector<16x8xf32>
    %444 = arith.mulf %443, %442 : vector<16x8xf32>
    %445 = arith.addf %436, %444 : vector<16x8xf32>
    %446 = vector.extract_strided_slice %28 {offsets = [42, 0], sizes = [1, 8], strides = [1, 1]} : vector<64x8xf32> to vector<1x8xf32>
    %447 = vector.extract_strided_slice %46 {offsets = [16, 0], sizes = [8, 8], strides = [1, 1]} : vector<64x8xf32> to vector<8x8xf32>
    %448 = vector.broadcast %446 : vector<1x8xf32> to vector<8x8xf32>
    %449 = arith.mulf %448, %447 : vector<8x8xf32>
    %450 = arith.addf %441, %449 : vector<8x8xf32>
    %451 = vector.extract_strided_slice %55 {offsets = [32, 0], sizes = [16, 8], strides = [1, 1]} : vector<128x8xf32> to vector<16x8xf32>
    %452 = vector.broadcast %446 : vector<1x8xf32> to vector<16x8xf32>
    %453 = arith.mulf %452, %451 : vector<16x8xf32>
    %454 = arith.addf %445, %453 : vector<16x8xf32>
    %455 = vector.extract_strided_slice %28 {offsets = [43, 0], sizes = [1, 8], strides = [1, 1]} : vector<64x8xf32> to vector<1x8xf32>
    %456 = vector.extract_strided_slice %46 {offsets = [24, 0], sizes = [8, 8], strides = [1, 1]} : vector<64x8xf32> to vector<8x8xf32>
    %457 = vector.broadcast %455 : vector<1x8xf32> to vector<8x8xf32>
    %458 = arith.mulf %457, %456 : vector<8x8xf32>
    %459 = arith.addf %450, %458 : vector<8x8xf32>
    %460 = vector.extract_strided_slice %55 {offsets = [48, 0], sizes = [16, 8], strides = [1, 1]} : vector<128x8xf32> to vector<16x8xf32>
    %461 = vector.broadcast %455 : vector<1x8xf32> to vector<16x8xf32>
    %462 = arith.mulf %461, %460 : vector<16x8xf32>
    %463 = arith.addf %454, %462 : vector<16x8xf32>
    %464 = vector.extract_strided_slice %28 {offsets = [44, 0], sizes = [1, 8], strides = [1, 1]} : vector<64x8xf32> to vector<1x8xf32>
    %465 = vector.extract_strided_slice %46 {offsets = [32, 0], sizes = [8, 8], strides = [1, 1]} : vector<64x8xf32> to vector<8x8xf32>
    %466 = vector.broadcast %464 : vector<1x8xf32> to vector<8x8xf32>
    %467 = arith.mulf %466, %465 : vector<8x8xf32>
    %468 = arith.addf %459, %467 : vector<8x8xf32>
    %469 = vector.extract_strided_slice %55 {offsets = [64, 0], sizes = [16, 8], strides = [1, 1]} : vector<128x8xf32> to vector<16x8xf32>
    %470 = vector.broadcast %464 : vector<1x8xf32> to vector<16x8xf32>
    %471 = arith.mulf %470, %469 : vector<16x8xf32>
    %472 = arith.addf %463, %471 : vector<16x8xf32>
    %473 = vector.extract_strided_slice %28 {offsets = [45, 0], sizes = [1, 8], strides = [1, 1]} : vector<64x8xf32> to vector<1x8xf32>
    %474 = vector.extract_strided_slice %46 {offsets = [40, 0], sizes = [8, 8], strides = [1, 1]} : vector<64x8xf32> to vector<8x8xf32>
    %475 = vector.broadcast %473 : vector<1x8xf32> to vector<8x8xf32>
    %476 = arith.mulf %475, %474 : vector<8x8xf32>
    %477 = arith.addf %468, %476 : vector<8x8xf32>
    %478 = vector.extract_strided_slice %55 {offsets = [80, 0], sizes = [16, 8], strides = [1, 1]} : vector<128x8xf32> to vector<16x8xf32>
    %479 = vector.broadcast %473 : vector<1x8xf32> to vector<16x8xf32>
    %480 = arith.mulf %479, %478 : vector<16x8xf32>
    %481 = arith.addf %472, %480 : vector<16x8xf32>
    %482 = vector.extract_strided_slice %28 {offsets = [46, 0], sizes = [1, 8], strides = [1, 1]} : vector<64x8xf32> to vector<1x8xf32>
    %483 = vector.extract_strided_slice %46 {offsets = [48, 0], sizes = [8, 8], strides = [1, 1]} : vector<64x8xf32> to vector<8x8xf32>
    %484 = vector.broadcast %482 : vector<1x8xf32> to vector<8x8xf32>
    %485 = arith.mulf %484, %483 : vector<8x8xf32>
    %486 = arith.addf %477, %485 : vector<8x8xf32>
    %487 = vector.extract_strided_slice %55 {offsets = [96, 0], sizes = [16, 8], strides = [1, 1]} : vector<128x8xf32> to vector<16x8xf32>
    %488 = vector.broadcast %482 : vector<1x8xf32> to vector<16x8xf32>
    %489 = arith.mulf %488, %487 : vector<16x8xf32>
    %490 = arith.addf %481, %489 : vector<16x8xf32>
    %491 = vector.extract_strided_slice %28 {offsets = [47, 0], sizes = [1, 8], strides = [1, 1]} : vector<64x8xf32> to vector<1x8xf32>
    %492 = vector.extract_strided_slice %46 {offsets = [56, 0], sizes = [8, 8], strides = [1, 1]} : vector<64x8xf32> to vector<8x8xf32>
    %493 = vector.broadcast %491 : vector<1x8xf32> to vector<8x8xf32>
    %494 = arith.mulf %493, %492 : vector<8x8xf32>
    %495 = arith.addf %486, %494 : vector<8x8xf32>
    %496 = vector.extract_strided_slice %55 {offsets = [112, 0], sizes = [16, 8], strides = [1, 1]} : vector<128x8xf32> to vector<16x8xf32>
    %497 = vector.broadcast %491 : vector<1x8xf32> to vector<16x8xf32>
    %498 = arith.mulf %497, %496 : vector<16x8xf32>
    %499 = arith.addf %490, %498 : vector<16x8xf32>
    %cst_51 = arith.constant 0.000000e+00 : f32
    %500 = vector.broadcast %cst_51 : f32 to vector<8x8xf32>
    %cst_52 = arith.constant 0.000000e+00 : f32
    %501 = vector.broadcast %cst_52 : f32 to vector<16x8xf32>
    %502 = vector.extract_strided_slice %28 {offsets = [48, 0], sizes = [1, 8], strides = [1, 1]} : vector<64x8xf32> to vector<1x8xf32>
    %503 = vector.extract_strided_slice %46 {offsets = [0, 0], sizes = [8, 8], strides = [1, 1]} : vector<64x8xf32> to vector<8x8xf32>
    %504 = vector.broadcast %502 : vector<1x8xf32> to vector<8x8xf32>
    %505 = arith.mulf %504, %503 : vector<8x8xf32>
    %506 = arith.addf %500, %505 : vector<8x8xf32>
    %507 = vector.extract_strided_slice %55 {offsets = [0, 0], sizes = [16, 8], strides = [1, 1]} : vector<128x8xf32> to vector<16x8xf32>
    %508 = vector.broadcast %502 : vector<1x8xf32> to vector<16x8xf32>
    %509 = arith.mulf %508, %507 : vector<16x8xf32>
    %510 = arith.addf %501, %509 : vector<16x8xf32>
    %511 = vector.extract_strided_slice %28 {offsets = [49, 0], sizes = [1, 8], strides = [1, 1]} : vector<64x8xf32> to vector<1x8xf32>
    %512 = vector.extract_strided_slice %46 {offsets = [8, 0], sizes = [8, 8], strides = [1, 1]} : vector<64x8xf32> to vector<8x8xf32>
    %513 = vector.broadcast %511 : vector<1x8xf32> to vector<8x8xf32>
    %514 = arith.mulf %513, %512 : vector<8x8xf32>
    %515 = arith.addf %506, %514 : vector<8x8xf32>
    %516 = vector.extract_strided_slice %55 {offsets = [16, 0], sizes = [16, 8], strides = [1, 1]} : vector<128x8xf32> to vector<16x8xf32>
    %517 = vector.broadcast %511 : vector<1x8xf32> to vector<16x8xf32>
    %518 = arith.mulf %517, %516 : vector<16x8xf32>
    %519 = arith.addf %510, %518 : vector<16x8xf32>
    %520 = vector.extract_strided_slice %28 {offsets = [50, 0], sizes = [1, 8], strides = [1, 1]} : vector<64x8xf32> to vector<1x8xf32>
    %521 = vector.extract_strided_slice %46 {offsets = [16, 0], sizes = [8, 8], strides = [1, 1]} : vector<64x8xf32> to vector<8x8xf32>
    %522 = vector.broadcast %520 : vector<1x8xf32> to vector<8x8xf32>
    %523 = arith.mulf %522, %521 : vector<8x8xf32>
    %524 = arith.addf %515, %523 : vector<8x8xf32>
    %525 = vector.extract_strided_slice %55 {offsets = [32, 0], sizes = [16, 8], strides = [1, 1]} : vector<128x8xf32> to vector<16x8xf32>
    %526 = vector.broadcast %520 : vector<1x8xf32> to vector<16x8xf32>
    %527 = arith.mulf %526, %525 : vector<16x8xf32>
    %528 = arith.addf %519, %527 : vector<16x8xf32>
    %529 = vector.extract_strided_slice %28 {offsets = [51, 0], sizes = [1, 8], strides = [1, 1]} : vector<64x8xf32> to vector<1x8xf32>
    %530 = vector.extract_strided_slice %46 {offsets = [24, 0], sizes = [8, 8], strides = [1, 1]} : vector<64x8xf32> to vector<8x8xf32>
    %531 = vector.broadcast %529 : vector<1x8xf32> to vector<8x8xf32>
    %532 = arith.mulf %531, %530 : vector<8x8xf32>
    %533 = arith.addf %524, %532 : vector<8x8xf32>
    %534 = vector.extract_strided_slice %55 {offsets = [48, 0], sizes = [16, 8], strides = [1, 1]} : vector<128x8xf32> to vector<16x8xf32>
    %535 = vector.broadcast %529 : vector<1x8xf32> to vector<16x8xf32>
    %536 = arith.mulf %535, %534 : vector<16x8xf32>
    %537 = arith.addf %528, %536 : vector<16x8xf32>
    %538 = vector.extract_strided_slice %28 {offsets = [52, 0], sizes = [1, 8], strides = [1, 1]} : vector<64x8xf32> to vector<1x8xf32>
    %539 = vector.extract_strided_slice %46 {offsets = [32, 0], sizes = [8, 8], strides = [1, 1]} : vector<64x8xf32> to vector<8x8xf32>
    %540 = vector.broadcast %538 : vector<1x8xf32> to vector<8x8xf32>
    %541 = arith.mulf %540, %539 : vector<8x8xf32>
    %542 = arith.addf %533, %541 : vector<8x8xf32>
    %543 = vector.extract_strided_slice %55 {offsets = [64, 0], sizes = [16, 8], strides = [1, 1]} : vector<128x8xf32> to vector<16x8xf32>
    %544 = vector.broadcast %538 : vector<1x8xf32> to vector<16x8xf32>
    %545 = arith.mulf %544, %543 : vector<16x8xf32>
    %546 = arith.addf %537, %545 : vector<16x8xf32>
    %547 = vector.extract_strided_slice %28 {offsets = [53, 0], sizes = [1, 8], strides = [1, 1]} : vector<64x8xf32> to vector<1x8xf32>
    %548 = vector.extract_strided_slice %46 {offsets = [40, 0], sizes = [8, 8], strides = [1, 1]} : vector<64x8xf32> to vector<8x8xf32>
    %549 = vector.broadcast %547 : vector<1x8xf32> to vector<8x8xf32>
    %550 = arith.mulf %549, %548 : vector<8x8xf32>
    %551 = arith.addf %542, %550 : vector<8x8xf32>
    %552 = vector.extract_strided_slice %55 {offsets = [80, 0], sizes = [16, 8], strides = [1, 1]} : vector<128x8xf32> to vector<16x8xf32>
    %553 = vector.broadcast %547 : vector<1x8xf32> to vector<16x8xf32>
    %554 = arith.mulf %553, %552 : vector<16x8xf32>
    %555 = arith.addf %546, %554 : vector<16x8xf32>
    %556 = vector.extract_strided_slice %28 {offsets = [54, 0], sizes = [1, 8], strides = [1, 1]} : vector<64x8xf32> to vector<1x8xf32>
    %557 = vector.extract_strided_slice %46 {offsets = [48, 0], sizes = [8, 8], strides = [1, 1]} : vector<64x8xf32> to vector<8x8xf32>
    %558 = vector.broadcast %556 : vector<1x8xf32> to vector<8x8xf32>
    %559 = arith.mulf %558, %557 : vector<8x8xf32>
    %560 = arith.addf %551, %559 : vector<8x8xf32>
    %561 = vector.extract_strided_slice %55 {offsets = [96, 0], sizes = [16, 8], strides = [1, 1]} : vector<128x8xf32> to vector<16x8xf32>
    %562 = vector.broadcast %556 : vector<1x8xf32> to vector<16x8xf32>
    %563 = arith.mulf %562, %561 : vector<16x8xf32>
    %564 = arith.addf %555, %563 : vector<16x8xf32>
    %565 = vector.extract_strided_slice %28 {offsets = [55, 0], sizes = [1, 8], strides = [1, 1]} : vector<64x8xf32> to vector<1x8xf32>
    %566 = vector.extract_strided_slice %46 {offsets = [56, 0], sizes = [8, 8], strides = [1, 1]} : vector<64x8xf32> to vector<8x8xf32>
    %567 = vector.broadcast %565 : vector<1x8xf32> to vector<8x8xf32>
    %568 = arith.mulf %567, %566 : vector<8x8xf32>
    %569 = arith.addf %560, %568 : vector<8x8xf32>
    %570 = vector.extract_strided_slice %55 {offsets = [112, 0], sizes = [16, 8], strides = [1, 1]} : vector<128x8xf32> to vector<16x8xf32>
    %571 = vector.broadcast %565 : vector<1x8xf32> to vector<16x8xf32>
    %572 = arith.mulf %571, %570 : vector<16x8xf32>
    %573 = arith.addf %564, %572 : vector<16x8xf32>
    %cst_53 = arith.constant 0.000000e+00 : f32
    %574 = vector.broadcast %cst_53 : f32 to vector<8x8xf32>
    %cst_54 = arith.constant 0.000000e+00 : f32
    %575 = vector.broadcast %cst_54 : f32 to vector<16x8xf32>
    %576 = vector.extract_strided_slice %28 {offsets = [56, 0], sizes = [1, 8], strides = [1, 1]} : vector<64x8xf32> to vector<1x8xf32>
    %577 = vector.extract_strided_slice %46 {offsets = [0, 0], sizes = [8, 8], strides = [1, 1]} : vector<64x8xf32> to vector<8x8xf32>
    %578 = vector.broadcast %576 : vector<1x8xf32> to vector<8x8xf32>
    %579 = arith.mulf %578, %577 : vector<8x8xf32>
    %580 = arith.addf %574, %579 : vector<8x8xf32>
    %581 = vector.extract_strided_slice %55 {offsets = [0, 0], sizes = [16, 8], strides = [1, 1]} : vector<128x8xf32> to vector<16x8xf32>
    %582 = vector.broadcast %576 : vector<1x8xf32> to vector<16x8xf32>
    %583 = arith.mulf %582, %581 : vector<16x8xf32>
    %584 = arith.addf %575, %583 : vector<16x8xf32>
    %585 = vector.extract_strided_slice %28 {offsets = [57, 0], sizes = [1, 8], strides = [1, 1]} : vector<64x8xf32> to vector<1x8xf32>
    %586 = vector.extract_strided_slice %46 {offsets = [8, 0], sizes = [8, 8], strides = [1, 1]} : vector<64x8xf32> to vector<8x8xf32>
    %587 = vector.broadcast %585 : vector<1x8xf32> to vector<8x8xf32>
    %588 = arith.mulf %587, %586 : vector<8x8xf32>
    %589 = arith.addf %580, %588 : vector<8x8xf32>
    %590 = vector.extract_strided_slice %55 {offsets = [16, 0], sizes = [16, 8], strides = [1, 1]} : vector<128x8xf32> to vector<16x8xf32>
    %591 = vector.broadcast %585 : vector<1x8xf32> to vector<16x8xf32>
    %592 = arith.mulf %591, %590 : vector<16x8xf32>
    %593 = arith.addf %584, %592 : vector<16x8xf32>
    %594 = vector.extract_strided_slice %28 {offsets = [58, 0], sizes = [1, 8], strides = [1, 1]} : vector<64x8xf32> to vector<1x8xf32>
    %595 = vector.extract_strided_slice %46 {offsets = [16, 0], sizes = [8, 8], strides = [1, 1]} : vector<64x8xf32> to vector<8x8xf32>
    %596 = vector.broadcast %594 : vector<1x8xf32> to vector<8x8xf32>
    %597 = arith.mulf %596, %595 : vector<8x8xf32>
    %598 = arith.addf %589, %597 : vector<8x8xf32>
    %599 = vector.extract_strided_slice %55 {offsets = [32, 0], sizes = [16, 8], strides = [1, 1]} : vector<128x8xf32> to vector<16x8xf32>
    %600 = vector.broadcast %594 : vector<1x8xf32> to vector<16x8xf32>
    %601 = arith.mulf %600, %599 : vector<16x8xf32>
    %602 = arith.addf %593, %601 : vector<16x8xf32>
    %603 = vector.extract_strided_slice %28 {offsets = [59, 0], sizes = [1, 8], strides = [1, 1]} : vector<64x8xf32> to vector<1x8xf32>
    %604 = vector.extract_strided_slice %46 {offsets = [24, 0], sizes = [8, 8], strides = [1, 1]} : vector<64x8xf32> to vector<8x8xf32>
    %605 = vector.broadcast %603 : vector<1x8xf32> to vector<8x8xf32>
    %606 = arith.mulf %605, %604 : vector<8x8xf32>
    %607 = arith.addf %598, %606 : vector<8x8xf32>
    %608 = vector.extract_strided_slice %55 {offsets = [48, 0], sizes = [16, 8], strides = [1, 1]} : vector<128x8xf32> to vector<16x8xf32>
    %609 = vector.broadcast %603 : vector<1x8xf32> to vector<16x8xf32>
    %610 = arith.mulf %609, %608 : vector<16x8xf32>
    %611 = arith.addf %602, %610 : vector<16x8xf32>
    %612 = vector.extract_strided_slice %28 {offsets = [60, 0], sizes = [1, 8], strides = [1, 1]} : vector<64x8xf32> to vector<1x8xf32>
    %613 = vector.extract_strided_slice %46 {offsets = [32, 0], sizes = [8, 8], strides = [1, 1]} : vector<64x8xf32> to vector<8x8xf32>
    %614 = vector.broadcast %612 : vector<1x8xf32> to vector<8x8xf32>
    %615 = arith.mulf %614, %613 : vector<8x8xf32>
    %616 = arith.addf %607, %615 : vector<8x8xf32>
    %617 = vector.extract_strided_slice %55 {offsets = [64, 0], sizes = [16, 8], strides = [1, 1]} : vector<128x8xf32> to vector<16x8xf32>
    %618 = vector.broadcast %612 : vector<1x8xf32> to vector<16x8xf32>
    %619 = arith.mulf %618, %617 : vector<16x8xf32>
    %620 = arith.addf %611, %619 : vector<16x8xf32>
    %621 = vector.extract_strided_slice %28 {offsets = [61, 0], sizes = [1, 8], strides = [1, 1]} : vector<64x8xf32> to vector<1x8xf32>
    %622 = vector.extract_strided_slice %46 {offsets = [40, 0], sizes = [8, 8], strides = [1, 1]} : vector<64x8xf32> to vector<8x8xf32>
    %623 = vector.broadcast %621 : vector<1x8xf32> to vector<8x8xf32>
    %624 = arith.mulf %623, %622 : vector<8x8xf32>
    %625 = arith.addf %616, %624 : vector<8x8xf32>
    %626 = vector.extract_strided_slice %55 {offsets = [80, 0], sizes = [16, 8], strides = [1, 1]} : vector<128x8xf32> to vector<16x8xf32>
    %627 = vector.broadcast %621 : vector<1x8xf32> to vector<16x8xf32>
    %628 = arith.mulf %627, %626 : vector<16x8xf32>
    %629 = arith.addf %620, %628 : vector<16x8xf32>
    %630 = vector.extract_strided_slice %28 {offsets = [62, 0], sizes = [1, 8], strides = [1, 1]} : vector<64x8xf32> to vector<1x8xf32>
    %631 = vector.extract_strided_slice %46 {offsets = [48, 0], sizes = [8, 8], strides = [1, 1]} : vector<64x8xf32> to vector<8x8xf32>
    %632 = vector.broadcast %630 : vector<1x8xf32> to vector<8x8xf32>
    %633 = arith.mulf %632, %631 : vector<8x8xf32>
    %634 = arith.addf %625, %633 : vector<8x8xf32>
    %635 = vector.extract_strided_slice %55 {offsets = [96, 0], sizes = [16, 8], strides = [1, 1]} : vector<128x8xf32> to vector<16x8xf32>
    %636 = vector.broadcast %630 : vector<1x8xf32> to vector<16x8xf32>
    %637 = arith.mulf %636, %635 : vector<16x8xf32>
    %638 = arith.addf %629, %637 : vector<16x8xf32>
    %639 = vector.extract_strided_slice %28 {offsets = [63, 0], sizes = [1, 8], strides = [1, 1]} : vector<64x8xf32> to vector<1x8xf32>
    %640 = vector.extract_strided_slice %46 {offsets = [56, 0], sizes = [8, 8], strides = [1, 1]} : vector<64x8xf32> to vector<8x8xf32>
    %641 = vector.broadcast %639 : vector<1x8xf32> to vector<8x8xf32>
    %642 = arith.mulf %641, %640 : vector<8x8xf32>
    %643 = arith.addf %634, %642 : vector<8x8xf32>
    %644 = vector.extract_strided_slice %55 {offsets = [112, 0], sizes = [16, 8], strides = [1, 1]} : vector<128x8xf32> to vector<16x8xf32>
    %645 = vector.broadcast %639 : vector<1x8xf32> to vector<16x8xf32>
    %646 = arith.mulf %645, %644 : vector<16x8xf32>
    %647 = arith.addf %638, %646 : vector<16x8xf32>
    %648 = tpu.concatenate %125, %129, %199, %203, %273, %277, %347, %351, %421, %425, %495, %499, %569, %573, %643, %647 in 0 : vector<8x8xf32>, vector<16x8xf32>, vector<8x8xf32>, vector<16x8xf32>, vector<8x8xf32>, vector<16x8xf32>, vector<8x8xf32>, vector<16x8xf32>, vector<8x8xf32>, vector<16x8xf32>, vector<8x8xf32>, vector<16x8xf32>, vector<8x8xf32>, vector<16x8xf32>, vector<8x8xf32>, vector<16x8xf32> -> vector<192x8xf32>
    %c0_55 = arith.constant 0 : index
    %c0_56 = arith.constant 0 : index
    %649 = vector.load %arg16[%c0_55, %c0_56] : memref<32x192xf32, #tpu.memory_space<vmem>>, vector<32x192xf32>
    %650 = arith.truncf %649 : vector<32x192xf32> to vector<32x192xbf16>
    %651 = arith.truncf %648 : vector<192x8xf32> to vector<192x8xbf16>
    %cst_57 = arith.constant dense<0.000000e+00> : vector<32x8xf32>
    %652 = tpu.matmul %650, %651, %cst_57 {dimension_numbers = #tpu.dot_dimension_numbers<[1], [0], [0], [1], [0, 0, 1, 1], [], []>} : vector<32x192xbf16>, vector<192x8xbf16>, vector<32x8xf32> -> vector<32x8xf32>
    %c0_58 = arith.constant 0 : index
    %c0_59 = arith.constant 0 : index
    %653 = vector.load %arg17[%c0_58, %c0_59] : memref<32x1xf32, #tpu.memory_space<vmem>>, vector<32x1xf32>
    %654 = vector.broadcast %653 : vector<32x1xf32> to vector<32x8xf32>
    %655 = arith.addf %652, %654 : vector<32x8xf32>
    %cst_60 = arith.constant 0.000000e+00 : f32
    %656 = vector.broadcast %cst_60 : f32 to vector<32x8xf32>
    %657 = arith.maximumf %655, %656 : vector<32x8xf32>
    %c0_61 = arith.constant 0 : index
    %c0_62 = arith.constant 0 : index
    %c0_63 = arith.constant 0 : index
    %658 = vector.load %arg18[%c0_61, %c0_62, %c0_63] : memref<1x32x8xf32, #tpu.memory_space<vmem>>, vector<1x32x8xf32>
    %659 = vector.shape_cast %658 : vector<1x32x8xf32> to vector<32x8xf32>
    %660 = vector.shape_cast %657 : vector<32x8xf32> to vector<1x32x8xf32>
    tpu.vector_store %arg18[%c0_61, %c0_62, %c0_63], %660 {strides = array<i32>} : memref<1x32x8xf32, #tpu.memory_space<vmem>>, vector<1x32x8xf32>,
    return
  }
  func.func @transform_0(%arg0: i32, %arg1: i32) -> (i32, i32, i32) {
    %c0_i32 = arith.constant 0 : i32
    %c0_i32_0 = arith.constant 0 : i32
    return %arg0, %c0_i32, %arg1 : i32, i32, i32
  }
  func.func @transform_1(%arg0: i32, %arg1: i32) -> (i32, i32, i32) {
    %c0_i32 = arith.constant 0 : i32
    %c0_i32_0 = arith.constant 0 : i32
    return %arg0, %c0_i32, %arg1 : i32, i32, i32
  }
  func.func @transform_2(%arg0: i32, %arg1: i32) -> (i32, i32) {
    %c0_i32 = arith.constant 0 : i32
    %c0_i32_0 = arith.constant 0 : i32
    %c0_i32_1 = arith.constant 0 : i32
    return %c0_i32, %c0_i32_0 : i32, i32
  }
  func.func @transform_3(%arg0: i32, %arg1: i32) -> (i32, i32) {
    %c0_i32 = arith.constant 0 : i32
    %c0_i32_0 = arith.constant 0 : i32
    %c0_i32_1 = arith.constant 0 : i32
    return %c0_i32, %c0_i32_0 : i32, i32
  }
  func.func @transform_4(%arg0: i32, %arg1: i32) -> (i32, i32) {
    %c0_i32 = arith.constant 0 : i32
    %c0_i32_0 = arith.constant 0 : i32
    %c0_i32_1 = arith.constant 0 : i32
    return %c0_i32, %c0_i32_0 : i32, i32
  }
  func.func @transform_5(%arg0: i32, %arg1: i32) -> (i32, i32) {
    %c0_i32 = arith.constant 0 : i32
    %c0_i32_0 = arith.constant 0 : i32
    %c0_i32_1 = arith.constant 0 : i32
    return %c0_i32, %c0_i32_0 : i32, i32
  }
  func.func @transform_6(%arg0: i32, %arg1: i32) -> (i32, i32) {
    %c0_i32 = arith.constant 0 : i32
    %c0_i32_0 = arith.constant 0 : i32
    %c0_i32_1 = arith.constant 0 : i32
    return %c0_i32, %c0_i32_0 : i32, i32
  }
  func.func @transform_7(%arg0: i32, %arg1: i32) -> (i32, i32) {
    %c0_i32 = arith.constant 0 : i32
    %c0_i32_0 = arith.constant 0 : i32
    %c0_i32_1 = arith.constant 0 : i32
    return %c0_i32, %c0_i32_0 : i32, i32
  }
  func.func @transform_8(%arg0: i32, %arg1: i32) -> (i32, i32) {
    %c0_i32 = arith.constant 0 : i32
    %c0_i32_0 = arith.constant 0 : i32
    %c0_i32_1 = arith.constant 0 : i32
    return %c0_i32, %c0_i32_0 : i32, i32
  }
  func.func @transform_9(%arg0: i32, %arg1: i32) -> (i32, i32) {
    %c0_i32 = arith.constant 0 : i32
    %c0_i32_0 = arith.constant 0 : i32
    %c0_i32_1 = arith.constant 0 : i32
    return %c0_i32, %c0_i32_0 : i32, i32
  }
  func.func @transform_10(%arg0: i32, %arg1: i32) -> (i32, i32) {
    %c0_i32 = arith.constant 0 : i32
    %c0_i32_0 = arith.constant 0 : i32
    %c0_i32_1 = arith.constant 0 : i32
    return %c0_i32, %c0_i32_0 : i32, i32
  }
  func.func @transform_11(%arg0: i32, %arg1: i32) -> (i32, i32) {
    %c0_i32 = arith.constant 0 : i32
    %c0_i32_0 = arith.constant 0 : i32
    %c0_i32_1 = arith.constant 0 : i32
    return %c0_i32, %c0_i32_0 : i32, i32
  }
  func.func @transform_12(%arg0: i32, %arg1: i32) -> (i32, i32) {
    %c0_i32 = arith.constant 0 : i32
    %c0_i32_0 = arith.constant 0 : i32
    %c0_i32_1 = arith.constant 0 : i32
    return %c0_i32, %c0_i32_0 : i32, i32
  }
  func.func @transform_13(%arg0: i32, %arg1: i32) -> (i32, i32) {
    %c0_i32 = arith.constant 0 : i32
    %c0_i32_0 = arith.constant 0 : i32
    %c0_i32_1 = arith.constant 0 : i32
    return %c0_i32, %c0_i32_0 : i32, i32
  }
  func.func @transform_14(%arg0: i32, %arg1: i32) -> (i32, i32) {
    %c0_i32 = arith.constant 0 : i32
    %c0_i32_0 = arith.constant 0 : i32
    %c0_i32_1 = arith.constant 0 : i32
    return %c0_i32, %c0_i32_0 : i32, i32
  }
  func.func @transform_15(%arg0: i32, %arg1: i32) -> (i32, i32) {
    %c0_i32 = arith.constant 0 : i32
    %c0_i32_0 = arith.constant 0 : i32
    %c0_i32_1 = arith.constant 0 : i32
    return %c0_i32, %c0_i32_0 : i32, i32
  }
  func.func @transform_16(%arg0: i32, %arg1: i32) -> (i32, i32, i32) {
    %c0_i32 = arith.constant 0 : i32
    %c0_i32_0 = arith.constant 0 : i32
    return %arg0, %c0_i32, %arg1 : i32, i32, i32
  }
}

</mosaic_0001>

<bundles_post_ra>
// kernel: neg.1
= control target key start
LH: loop header
LB: loop body
LE: loop exit
PB: predicated region body
PF: predicated region fallthrough
CT: control target
= control target key end

     0   :  { %s40_s0 = inlined_call_operand.vmem [shape: f32[2,8,32], index: 0, kind: input, shape index: {}]   ;;  %s41_s1 = inlined_call_operand.vmem [shape: f32[2,8,32], index: 1, kind: output, shape index: {}]  }
   0x1   :  { %v2_v0 = vld [vmem:[%s40_s0] sm:$0xff]  ;;  %v16_v1 = vld [vmem:[%s40_s0 + $0x8] sm:$0xff] }
   0x2   :  { %v5_v2 = vxor.u32 2147483648, %v2_v0  ;;  %v12_v3 = vxor.u32 2147483648, %v16_v1 }
   0x4   :  { %7 = vst [vmem:[%s41_s1] sm:$0xff] %v5_v2  ;;  %17 = vst [vmem:[%s41_s1 + $0x8] sm:$0xff] %v12_v3 }

// kernel: pointcnn_forward.1
= control target key start
LH: loop header
LB: loop body
LE: loop exit
PB: predicated region body
PF: predicated region fallthrough
CT: control target
= control target key end

     0   :  { %s2764_s21 = smov 0   ;;  %s2766_s22 = smov 0   ;;  %s3900_s0 = inlined_call_operand.vmem [shape: f32[2,24,8], index: 0, kind: input, shape index: {}]   ;;  %s3901_s1 = inlined_call_operand.vmem [shape: f32[2,32,8], index: 1, kind: input, shape index: {}]   ;;  %s3902_s2 = inlined_call_operand.vmem [shape: f32[64,24], index: 2, kind: input, shape index: {}]   ;;  %s3903_s3 = inlined_call_operand.vmem [shape: f32[64,1], index: 3, kind: input, shape index: {}]   ;;  %s3904_s4 = inlined_call_operand.vmem [shape: f32[64,64], index: 4, kind: input, shape index: {}]   ;;  %s3905_s5 = inlined_call_operand.vmem [shape: f32[64,1], index: 5, kind: input, shape index: {}]   ;;  %s3906_s6 = inlined_call_operand.vmem [shape: f32[64,64], index: 6, kind: input, shape index: {}]   ;;  %s3907_s7 = inlined_call_operand.vmem [shape: f32[64,1], index: 7, kind: input, shape index: {}]   ;;  %s3908_s8 = inlined_call_operand.vmem [shape: f32[64,24], index: 8, kind: input, shape index: {}]   ;;  %s3909_s9 = inlined_call_operand.vmem [shape: f32[64,1], index: 9, kind: input, shape index: {}]   ;;  %s3910_s10 = inlined_call_operand.vmem [shape: f32[64,64], index: 10, kind: input, shape index: {}]   ;;  %s3911_s11 = inlined_call_operand.vmem [shape: f32[64,1], index: 11, kind: input, shape index: {}]   ;;  %s3912_s12 = inlined_call_operand.vmem [shape: f32[128,32], index: 12, kind: input, shape index: {}]   ;;  %s3913_s13 = inlined_call_operand.vmem [shape: f32[128,1], index: 13, kind: input, shape index: {}]   ;;  %s3914_s14 = inlined_call_operand.vmem [shape: f32[32,192], index: 14, kind: input, shape index: {}]   ;;  %s3915_s15 = inlined_call_operand.vmem [shape: f32[32,1], index: 15, kind: input, shape index: {}]   ;;  %s3916_s16 = inlined_call_operand.vmem [shape: f32[2,32,8], index: 16, kind: output, shape index: {}]  }
   0x1   :  { %3996 = sst [smem:[#allocation51_spill]] %s3900_s0  ;;  %s2768_s23 = smov 0  }
   0x2 LB: > { %s38_s24 = sadd.s32 1, %s2672_s22  ;;  %p2446_p0 = scmp.ge.s32.totalorder %s2676_s23, 1  ;;  %s2676_s23 = sphi %s2768_s23, %s26_s23   ;;  %s2672_s22 = sphi %s2766_s22, %s4104_s22   ;;  %s2668_s21 = sphi %s2764_s21, %s4103_s21  }
   0x3   : > { %p40_p1 = scmp.ge.s32.totalorder %s38_s24, 2  ;;  %p496_p2 = scmp.lt.s32.totalorder %s2676_s23, 3 }
   0x5   : > { %s4106_s24 = smov (%p40_p1, %s38_s24), 0  ;;  %p497_p3 = pnand %p2446_p0, %p496_p2 }
   0x7   : > { %500 = sbr.rel (%p497_p3) target bundleno = 1020 (0x3fc), region = 84 }
   0xc   : > { %v612_v0 = vld [vmem:[%s3903_s3 + $0x30] sm:$0xff]  ;;  %v610_v1 = vld [vmem:[%s3903_s3 + $0x20] sm:$0xff]  ;;  %p560_p4 = scmp.lt.s32.totalorder %s2668_s21, 1  ;;  %v3917_v2 = vmov 0   ;;  %v613_v4 = vld [vmem:[%s3903_s3 + $0x38] sm:$0xff]  ;;  %vm654_vm0 = vcmask 195584  }
   0xd   : > { %2653 = vset.pattern.permute.xlu1 %v3917_v2  ;;  %2652 = vset.pattern.permute.xlu0 %v3917_v2  ;;  %v592_v3 = vld [vmem:[%s3902_s2] sm:$0xff]  ;;  %v611_v5 = vld [vmem:[%s3903_s3 + $0x28] sm:$0xff]  ;;  %v609_v8 = vld [vmem:[%s3903_s3 + $0x18] sm:$0xff]  ;;  %s3997_s18 = sld [smem:[#allocation51_spill]]  ;;  %vm667_vm1 = vcmask 1043456   ;;  %vm808_vm2 = vcmask 523264  }
   0xe   : > { %646 = vperm.xlu0 %2652, %v612_v0   ;;  %636 = vperm.xlu1 %2653, %v610_v1   ;;  %s4108_s21 = smov (!%p560_p4, %s2668_s21), 1  ;;  %v593_v6 = vld [vmem:[%s3902_s2 + $0x8] sm:$0xff]  ;;  %v608_v9 = vld [vmem:[%s3903_s3 + $0x10] sm:$0xff]  ;;  %v606_v17 = vld [vmem:[%s3903_s3] sm:$0xff]  ;;  %vm1451_vm3 = vcmask 261120   ;;  %vm2336_vm4 = vcmask 64512  }
   0xf   : > { %s2626_s26 = smul.u32 24, %s4108_s21  ;;  %v600_v7 = vpack.c.bf16 %v593_v6, %v592_v3  ;;  %v607_v16 = vld [vmem:[%s3903_s3 + $0x8] sm:$0xff]  ;;  %v594_v18 = vld [vmem:[%s3902_s2 + $0x10] sm:$0xff]  ;;  %v595_v19 = vld [vmem:[%s3902_s2 + $0x18] sm:$0xff]  ;;  %s2484_s0 = sshll.u32 %s4108_s21, 5 }
  0x10   : > { %v596_v20 = vld [vmem:[%s3902_s2 + $0x20] sm:$0xff]  ;;  %v597_v21 = vld [vmem:[%s3902_s2 + $0x28] sm:$0xff]  ;;  %v767_v22 = vld [vmem:[%s3905_s5 + $0x38] sm:$0xff]  ;;  %v601_v24 = vpack.c.bf16 %v595_v19, %v594_v18  ;;  %s575_s27 = scalar_lea.vmem %s3901_s1, %s2484_s0 }
  0x11   : > { %2536 = vmatprep.mubr.msk.bf16.mxu1 %vm654_vm0, %v600_v7  ;;  %v766_v23 = vld [vmem:[%s3905_s5 + $0x30] sm:$0xff]  ;;  %v602_v25 = vpack.c.bf16 %v597_v21, %v596_v20  ;;  %v765_v26 = vld [vmem:[%s3905_s5 + $0x28] sm:$0xff]  ;;  %v764_v27 = vld [vmem:[%s3905_s5 + $0x20] sm:$0xff] }
  0x12   : > { %651 = vperm.xlu0 %2652, %v613_v4   ;;  %641 = vperm.xlu1 %2653, %v611_v5   ;;  %v598_v28 = vld [vmem:[%s3902_s2 + $0x30] sm:$0xff]  ;;  %v599_v29 = vld [vmem:[%s3902_s2 + $0x38] sm:$0xff]  ;;  %v761_v33 = vld [vmem:[%s3905_s5 + $0x8] sm:$0xff] }
  0x13   : > { %s567_s19 = scalar_lea.vmem %s3997_s18, %s2626_s26  ;;  %v763_v30 = vld [vmem:[%s3905_s5 + $0x18] sm:$0xff]  ;;  %v762_v31 = vld [vmem:[%s3905_s5 + $0x10] sm:$0xff]  ;;  %v603_v32 = vpack.c.bf16 %v599_v29, %v598_v28  ;;  %v760_v34 = vld [vmem:[%s3905_s5] sm:$0xff] }
  0x14   : > { %v587_v10 = vld [vmem:[%s567_s19 + $0x10] sm:$0xff]  ;;  %v585_v11 = vld [vmem:[%s567_s19] sm:$0xff]  ;;  %v586_v12 = vld [vmem:[%s567_s19 + $0x8] sm:$0xff] }
  0x15   : > { %v2815_v13 = vpack.c.bf16 %v587_v10, %v587_v10  ;;  %v2817_v14 = vpack.c.bf16 %v586_v12, %v585_v11  ;;  %v1054_v35 = vld [vmem:[%s3909_s9 + $0x38] sm:$0xff]  ;;  %v1053_v36 = vld [vmem:[%s3909_s9 + $0x30] sm:$0xff]  ;;  %v1052_v37 = vld [vmem:[%s3909_s9 + $0x28] sm:$0xff] }
  0x16   : > { %631 = vperm.xlu1 %2653, %v609_v8   ;;  %626 = vperm.xlu0 %2652, %v608_v9   ;;  %v1051_v38 = vld [vmem:[%s3909_s9 + $0x20] sm:$0xff]  ;;  %v1050_v39 = vld [vmem:[%s3909_s9 + $0x18] sm:$0xff]  ;;  %v1049_v40 = vld [vmem:[%s3909_s9 + $0x10] sm:$0xff] }
  0x17   : > { %v2821_v15 = vsel %vm667_vm1, %v2815_v13, 0  ;;  %2624 = vmatprep.subr.msk.bf16.mxu1 %vm667_vm1, %v2815_v13  ;;  %v1048_v41 = vld [vmem:[%s3909_s9 + $0x8] sm:$0xff]  ;;  %v1047_v42 = vld [vmem:[%s3909_s9] sm:$0xff]  ;;  %v1358_v47 = vld [vmem:[%s3913_s13 + $0x18] sm:$0xff] }
  0x18   : > { %2533 = vmatpush3.bf16.msra.mxu1 %v2821_v15  ;;  %v915_v43 = vld [vmem:[%s3907_s7 + $0x28] sm:$0xff]  ;;  %v914_v44 = vld [vmem:[%s3907_s7 + $0x20] sm:$0xff]  ;;  %v1198_v50 = vld [vmem:[%s3911_s11 + $0x10] sm:$0xff] }
  0x19   : > { %2534 = vmatprep.subr.bf16.mxu1 %v2817_v14  ;;  %v1197_v45 = vld [vmem:[%s3911_s11 + $0x8] sm:$0xff]  ;;  %v1196_v46 = vld [vmem:[%s3911_s11] sm:$0xff]  ;;  %v1199_v52 = vld [vmem:[%s3911_s11 + $0x18] sm:$0xff] }
  0x1a   : > { %621 = vperm.xlu1 %2653, %v607_v16   ;;  %616 = vperm.xlu0 %2652, %v606_v17   ;;  %v1356_v48 = vld [vmem:[%s3913_s13 + $0x8] sm:$0xff]  ;;  %v1355_v51 = vld [vmem:[%s3913_s13] sm:$0xff]  ;;  %v1362_v53 = vld [vmem:[%s3913_s13 + $0x38] sm:$0xff] }
  0x1b   : > { %v1360_v49 = vld [vmem:[%s3913_s13 + $0x28] sm:$0xff]  ;;  %v1357_v54 = vld [vmem:[%s3913_s13 + $0x10] sm:$0xff]  ;;  %v1359_v55 = vld [vmem:[%s3913_s13 + $0x20] sm:$0xff] }
  0x1c   : > { %2535 = vmatpush3.bf16.msra.mxu1 %v2817_v14  ;;  %v1200_v56 = vld [vmem:[%s3911_s11 + $0x20] sm:$0xff]  ;;  %v913_v57 = vld [vmem:[%s3907_s7 + $0x18] sm:$0xff]  ;;  %v1364_v58 = vld [vmem:[%s3913_s13 + $0x48] sm:$0xff] }
  0x1d   : > { %v1361_v59 = vld [vmem:[%s3913_s13 + $0x30] sm:$0xff]  ;;  %v1201_v60 = vld [vmem:[%s3911_s11 + $0x28] sm:$0xff]  ;;  %v1366_v62 = vld [vmem:[%s3913_s13 + $0x58] sm:$0xff] }
  0x1e   : > { %805 = vperm.xlu1 %2653, %v767_v22   ;;  %800 = vperm.xlu0 %2652, %v766_v23   ;;  %v1202_v61 = vld [vmem:[%s3911_s11 + $0x30] sm:$0xff]  ;;  %v1368_v63 = vld [vmem:[%s3913_s13 + $0x68] sm:$0xff]  ;;  %v1363_v0 = vld [vmem:[%s3913_s13 + $0x40] sm:$0xff] }
  0x1f   : > { %2537 = vmatmul.mubr.msk.bf16.vlgmr.msra.gmra.mxu1 %vm654_vm0, %v601_v24  ;;  %v1203_v1 = vld [vmem:[%s3911_s11 + $0x38] sm:$0xff]  ;;  %v912_v3 = vld [vmem:[%s3907_s7 + $0x10] sm:$0xff]  ;;  %v1367_v7 = vld [vmem:[%s3913_s13 + $0x60] sm:$0xff] }
  0x20   : > { %2540 = vmatprep.mubr.msk.bf16.mxu1 %vm654_vm0, %v602_v25  ;;  %v1370_v4 = vld [vmem:[%s3913_s13 + $0x78] sm:$0xff]  ;;  %v1365_v5 = vld [vmem:[%s3913_s13 + $0x50] sm:$0xff]  ;;  %v910_v8 = vld [vmem:[%s3907_s7] sm:$0xff] }
  0x21   : > { %v1369_v6 = vld [vmem:[%s3913_s13 + $0x70] sm:$0xff]  ;;  %v911_v9 = vld [vmem:[%s3907_s7 + $0x8] sm:$0xff]  ;;  %v917_v11 = vld [vmem:[%s3907_s7 + $0x38] sm:$0xff] }
  0x22   : > { %795 = vperm.xlu1 %2653, %v765_v26   ;;  %790 = vperm.xlu0 %2652, %v764_v27   ;;  %v916_v10 = vld [vmem:[%s3907_s7 + $0x30] sm:$0xff]  ;;  %v2254_v12 = vld [vmem:[%s3915_s15 + $0x8] sm:$0xff]  ;;  %v2253_v16 = vld [vmem:[%s3915_s15] sm:$0xff] }
  0x23   : > { %v744_v17 = vld [vmem:[%s3904_s4] sm:$0xff]  ;;  %v745_v18 = vld [vmem:[%s3904_s4 + $0x8] sm:$0xff]  ;;  %v2256_v19 = vld [vmem:[%s3915_s15 + $0x18] sm:$0xff] }
  0x24   : > { %v2255_v20 = vld [vmem:[%s3915_s15 + $0x10] sm:$0xff]  ;;  %v752_v21 = vpack.c.bf16 %v745_v18, %v744_v17 }
  0x26   : > { %785 = vperm.xlu1 %2653, %v763_v30   ;;  %780 = vperm.xlu0 %2652, %v762_v31  }
  0x27   : > { %2541 = vmatmul.mubr.msk.bf16.gmra.mxu1 %vm654_vm0, %v603_v32 }
  0x28   : > { %2552 = vmatprep.mubr.msk.bf16.mxu1 %vm808_vm2, %v752_v21  ;;  %v1329_v21 = vld [vmem:[%s3912_s12] sm:$0xff] }
  0x2a   : > { %775 = vperm.xlu1 %2653, %v761_v33   ;;  %770 = vperm.xlu0 %2652, %v760_v34  }
  0x2e   : > { %1092 = vperm.xlu1 %2653, %v1054_v35   ;;  %1087 = vperm.xlu0 %2652, %v1053_v36  }
  0x32   : > { %1082 = vperm.xlu1 %2653, %v1052_v37   ;;  %1077 = vperm.xlu0 %2652, %v1051_v38  }
  0x36   : > { %1072 = vperm.xlu1 %2653, %v1050_v39   ;;  %1067 = vperm.xlu0 %2652, %v1049_v40  }
  0x3a   : > { %1062 = vperm.xlu1 %2653, %v1048_v41   ;;  %1057 = vperm.xlu0 %2652, %v1047_v42  }
  0x3e   : > { %945 = vperm.xlu1 %2653, %v915_v43   ;;  %940 = vperm.xlu0 %2652, %v914_v44  }
  0x42   : > { %1211 = vperm.xlu1 %2653, %v1197_v45   ;;  %1206 = vperm.xlu0 %2652, %v1196_v46  }
  0x46   : > { %1388 = vperm.xlu1 %2653, %v1358_v47   ;;  %1378 = vperm.xlu0 %2652, %v1356_v48  }
  0x4a   : > { %1398 = vperm.xlu1 %2653, %v1360_v49   ;;  %1216 = vperm.xlu0 %2652, %v1198_v50  }
  0x4e   : > { %1373 = vperm.xlu1 %2653, %v1355_v51   ;;  %1221 = vperm.xlu0 %2652, %v1199_v52  }
  0x52   : > { %1408 = vperm.xlu1 %2653, %v1362_v53   ;;  %1383 = vperm.xlu0 %2652, %v1357_v54  }
  0x56   : > { %1393 = vperm.xlu1 %2653, %v1359_v55   ;;  %1226 = vperm.xlu0 %2652, %v1200_v56  }
  0x5a   : > { %935 = vperm.xlu1 %2653, %v913_v57   ;;  %1418 = vperm.xlu0 %2652, %v1364_v58   ;;  %v746_v58 = vld [vmem:[%s3904_s4 + $0x10] sm:$0xff] }
  0x5e   : > { %1403 = vperm.xlu1 %2653, %v1361_v59   ;;  %1231 = vperm.xlu0 %2652, %v1201_v60   ;;  %v747_v59 = vld [vmem:[%s3904_s4 + $0x18] sm:$0xff]  ;;  %v748_v60 = vld [vmem:[%s3904_s4 + $0x20] sm:$0xff] }
  0x62   : > { %1236 = vperm.xlu1 %2653, %v1202_v61   ;;  %1428 = vperm.xlu0 %2652, %v1366_v62   ;;  %v749_v61 = vld [vmem:[%s3904_s4 + $0x28] sm:$0xff]  ;;  %v753_v62 = vpack.c.bf16 %v747_v59, %v746_v58 }
  0x66   : > { %1438 = vperm.xlu1 %2653, %v1368_v63   ;;  %1413 = vperm.xlu0 %2652, %v1363_v0   ;;  %v754_v63 = vpack.c.bf16 %v749_v61, %v748_v60  ;;  %v590_v0 = vld [vmem:[%s575_s27 + $0x10] sm:$0xff] }
  0x6a   : > { %1241 = vperm.xlu1 %2653, %v1203_v1   ;;  %930 = vperm.xlu0 %2652, %v912_v3   ;;  %v591_v1 = vld [vmem:[%s575_s27 + $0x18] sm:$0xff]  ;;  %v750_v3 = vld [vmem:[%s3904_s4 + $0x30] sm:$0xff] }
  0x6e   : > { %1448 = vperm.xlu1 %2653, %v1370_v4   ;;  %1423 = vperm.xlu0 %2652, %v1365_v5   ;;  %v751_v4 = vld [vmem:[%s3904_s4 + $0x38] sm:$0xff]  ;;  %v1354_v5 = vpack.c.bf16 %v591_v1, %v590_v0 }
  0x72   : > { %1443 = vperm.xlu1 %2653, %v1369_v6   ;;  %1433 = vperm.xlu0 %2652, %v1367_v7   ;;  %v755_v6 = vpack.c.bf16 %v751_v4, %v750_v3 }
  0x76   : > { %920 = vperm.xlu1 %2653, %v910_v8   ;;  %925 = vperm.xlu0 %2652, %v911_v9   ;;  %v1037_v8 = vld [vmem:[%s3908_s8 + $0x10] sm:$0xff]  ;;  %v1038_v9 = vld [vmem:[%s3908_s8 + $0x18] sm:$0xff] }
  0x7a   : > { %950 = vperm.xlu1 %2653, %v916_v10   ;;  %955 = vperm.xlu0 %2652, %v917_v11   ;;  %v1039_v10 = vld [vmem:[%s3908_s8 + $0x20] sm:$0xff] }
  0x7b   : > { %v588_v11 = vld [vmem:[%s575_s27] sm:$0xff] }
  0x7e   : > { %2264 = vperm.xlu1 %2653, %v2254_v12   ;;  %2259 = vperm.xlu0 %2652, %v2253_v16   ;;  %v589_v12 = vld [vmem:[%s575_s27 + $0x8] sm:$0xff]  ;;  %v1044_v16 = vpack.c.bf16 %v1038_v9, %v1037_v8  ;;  %s583_s27 = scalar_lea.vmem %s3916_s16, %s2484_s0 }
  0x7f   : > { %v1353_v18 = vpack.c.bf16 %v589_v12, %v588_v11 }
  0x82   : > { %2274 = vperm.xlu1 %2653, %v2256_v19   ;;  %2269 = vperm.xlu0 %2652, %v2255_v20   ;;  %v1041_v19 = vld [vmem:[%s3908_s8 + $0x30] sm:$0xff]  ;;  %v1042_v20 = vld [vmem:[%s3908_s8 + $0x38] sm:$0xff] }
  0x89   : > { %v637_v22 = vpop.permute.xlu1 %636  ;;  %v647_v24 = vpop.permute.xlu0 %646 }
  0x8d   : > { %v642_v27 = vpop.permute.xlu1 %641  ;;  %v652_v29 = vpop.permute.xlu0 %651 }
  0x91   : > { %v632_v33 = vpop.permute.xlu1 %631  ;;  %v627_v37 = vpop.permute.xlu0 %626 }
  0x95   : > { %v622_v47 = vpop.permute.xlu1 %621  ;;  %v617_v51 = vpop.permute.xlu0 %616 }
  0xdf   : > { %v2538_v23 = vpop.f32.mrf.mxu1 }
  0xe0   : > { %v714_v43 = vadd.f32 %v2538_v23, %v627_v37  ;;  %v1046_v23 = vpack.c.bf16 %v1042_v20, %v1041_v19  ;;  %v1339_v37 = vld [vmem:[%s3912_s12 + $0x50] sm:$0xff] }
  0xe1   : > { %v705_v25 = vpop.f32.mrf.mxu1 }
  0xe2   : > { %v738_v52 = vmax.f32 %v714_v43, 0.0  ;;  %v706_v53 = vadd.f32 %v705_v25, %v617_v51  ;;  %v1331_v25 = vld [vmem:[%s3912_s12 + $0x10] sm:$0xff] }
  0xe3   : > { %v2539_v26 = vpop.f32.mrf.mxu1  ;;  %v1343_v43 = vld [vmem:[%s3912_s12 + $0x70] sm:$0xff] }
  0xe4   : > { %v717_v39 = vadd.f32 %v2539_v26, %v632_v33  ;;  %v736_v56 = vmax.f32 %v706_v53, 0.0  ;;  %v1332_v26 = vld [vmem:[%s3912_s12 + $0x18] sm:$0xff]  ;;  %v1337_v33 = vld [vmem:[%s3912_s12 + $0x40] sm:$0xff] }
  0xe5   : > { %v708_v28 = vpop.f32.mrf.mxu1 }
  0xe6   : > { %v739_v48 = vmax.f32 %v717_v39, 0.0  ;;  %v709_v49 = vadd.f32 %v708_v28, %v622_v47  ;;  %v1334_v28 = vld [vmem:[%s3912_s12 + $0x28] sm:$0xff]  ;;  %v1341_v39 = vld [vmem:[%s3912_s12 + $0x60] sm:$0xff] }
  0xe7   : > { %v2542_v30 = vpop.f32.mrf.mxu1  ;;  %v895_v47 = vld [vmem:[%s3906_s6 + $0x8] sm:$0xff] }
  0xe8   : > { %v730_v32 = vadd.f32 %v2542_v30, %v647_v24  ;;  %v757_v54 = vpack.c.bf16 %v739_v48, %v738_v52  ;;  %v737_v55 = vmax.f32 %v709_v49, 0.0  ;;  %v806_v49 = vpop.permute.xlu1 %805 }
  0xe9   : > { %v721_v31 = vpop.f32.mrf.mxu1 }
  0xea   : > { %v722_v35 = vadd.f32 %v721_v31, %v637_v22  ;;  %v742_v40 = vmax.f32 %v730_v32, 0.0  ;;  %v756_v57 = vpack.c.bf16 %v737_v55, %v736_v56  ;;  %v1330_v22 = vld [vmem:[%s3912_s12 + $0x8] sm:$0xff]  ;;  %v1335_v31 = vld [vmem:[%s3912_s12 + $0x30] sm:$0xff]  ;;  %v1336_v32 = vld [vmem:[%s3912_s12 + $0x38] sm:$0xff] }
  0xeb   : > { %v2543_v34 = vpop.f32.mrf.mxu1  ;;  %v1345_v24 = vpack.c.bf16 %v1330_v22, %v1329_v21 }
  0xec   : > { %v733_v36 = vadd.f32 %v2543_v34, %v652_v29  ;;  %v740_v44 = vmax.f32 %v722_v35, 0.0  ;;  %v1346_v29 = vpack.c.bf16 %v1332_v26, %v1331_v25  ;;  %v1338_v34 = vld [vmem:[%s3912_s12 + $0x48] sm:$0xff]  ;;  %v1348_v35 = vpack.c.bf16 %v1336_v32, %v1335_v31  ;;  %v796_v51 = vpop.permute.xlu1 %795 }
  0xed   : > { %v724_v38 = vpop.f32.mrf.mxu1 }
  0xee   : > { %v743_v41 = vmax.f32 %v733_v36, 0.0  ;;  %v725_v42 = vadd.f32 %v724_v38, %v642_v27  ;;  %v1333_v27 = vld [vmem:[%s3912_s12 + $0x20] sm:$0xff]  ;;  %v1349_v36 = vpack.c.bf16 %v1338_v34, %v1337_v33  ;;  %v1340_v38 = vld [vmem:[%s3912_s12 + $0x58] sm:$0xff]  ;;  %v896_v33 = vld [vmem:[%s3906_s6 + $0x10] sm:$0xff] }
  0xef   : > { %v1347_v30 = vpack.c.bf16 %v1334_v28, %v1333_v27  ;;  %v897_v34 = vld [vmem:[%s3906_s6 + $0x18] sm:$0xff] }
  0xf0   : > { %v759_v45 = vpack.c.bf16 %v743_v41, %v742_v40  ;;  %v741_v46 = vmax.f32 %v725_v42, 0.0  ;;  %v1342_v40 = vld [vmem:[%s3912_s12 + $0x68] sm:$0xff]  ;;  %v1350_v41 = vpack.c.bf16 %v1340_v38, %v1339_v37  ;;  %v786_v55 = vpop.permute.xlu1 %785 }
  0xf1   : > { %v1351_v42 = vpack.c.bf16 %v1342_v40, %v1341_v39  ;;  %v898_v39 = vld [vmem:[%s3906_s6 + $0x20] sm:$0xff]  ;;  %v899_v40 = vld [vmem:[%s3906_s6 + $0x28] sm:$0xff] }
  0xf2   : > { %v758_v50 = vpack.c.bf16 %v741_v46, %v740_v44  ;;  %2544 = vmatprep.subr.bf16.mxu1 %v759_v45  ;;  %v1344_v44 = vld [vmem:[%s3912_s12 + $0x78] sm:$0xff]  ;;  %v894_v46 = vld [vmem:[%s3906_s6] sm:$0xff] }
  0xf3   : > { %2545 = vmatpush3.bf16.msra.mxu1 %v759_v45  ;;  %v1352_v45 = vpack.c.bf16 %v1344_v44, %v1343_v43  ;;  %v902_v48 = vpack.c.bf16 %v895_v47, %v894_v46  ;;  %v903_v43 = vpack.c.bf16 %v897_v34, %v896_v33 }
  0xf4   : > { %2546 = vmatprep.subr.bf16.mxu1 %v758_v50  ;;  %v776_v60 = vpop.permute.xlu1 %775 }
  0xf5   : > { %2568 = vmatprep.mubr.msk.bf16.mxu0 %vm808_vm2, %v902_v48  ;;  %v904_v48 = vpack.c.bf16 %v899_v40, %v898_v39 }
  0xf7   : > { %2547 = vmatpush3.bf16.msra.mxu1 %v758_v50  ;;  %v801_v50 = vpop.permute.xlu0 %800 }
  0xf8   : > { %2548 = vmatprep.subr.bf16.mxu1 %v757_v54 }
  0xfb   : > { %2549 = vmatpush3.bf16.msra.mxu1 %v757_v54  ;;  %v791_v52 = vpop.permute.xlu0 %790 }
  0xfc   : > { %2550 = vmatprep.subr.bf16.mxu1 %v756_v57 }
  0xff   : > { %2551 = vmatpush3.bf16.msra.mxu1 %v756_v57  ;;  %v781_v57 = vpop.permute.xlu0 %780 }
 0x100   : > { %2625 = vmatprep.subr.msk.bf16.mxu1 %vm667_vm1, %v2815_v13  ;;  %v1035_v13 = vld [vmem:[%s3908_s8] sm:$0xff] }
 0x102   : > { %2553 = vmatmul.mubr.msk.bf16.vlgmr.msra.gmra.mxu1 %vm808_vm2, %v753_v62 }
 0x103   : > { %2577 = vmatpush3.bf16.msra.mxu1 %v2821_v15  ;;  %2556 = vmatprep.mubr.msk.bf16.mxu1 %vm808_vm2, %v754_v63  ;;  %v1036_v15 = vld [vmem:[%s3908_s8 + $0x8] sm:$0xff]  ;;  %v771_v63 = vpop.permute.xlu0 %770 }
 0x104   : > { %2578 = vmatprep.subr.bf16.mxu1 %v2817_v14  ;;  %v1043_v7 = vpack.c.bf16 %v1036_v15, %v1035_v13 }
 0x107   : > { %2579 = vmatpush3.bf16.msra.mxu1 %v2817_v14  ;;  %v1040_v14 = vld [vmem:[%s3908_s8 + $0x28] sm:$0xff]  ;;  %v1088_v12 = vpop.permute.xlu0 %1087 }
 0x108   : > { %2604 = vmatprep.subr.bf16.mxu1 %v1354_v5  ;;  %v1045_v17 = vpack.c.bf16 %v1040_v14, %v1039_v10 }
 0x10a   : > { %2557 = vmatmul.mubr.msk.bf16.gmra.mxu1 %vm808_vm2, %v755_v6 }
 0x10b   : > { %2580 = vmatprep.mubr.msk.bf16.mxu1 %vm654_vm0, %v1043_v7  ;;  %v1093_v7 = vpop.permute.xlu1 %1092  ;;  %v1078_v27 = vpop.permute.xlu0 %1077 }
 0x112   : > { %2581 = vmatmul.mubr.msk.bf16.vlgmr.msra.gmra.mxu1 %vm654_vm0, %v1044_v16 }
 0x113   : > { %2584 = vmatprep.mubr.msk.bf16.mxu1 %vm654_vm0, %v1045_v17  ;;  %2605 = vmatpush3.bf16.msra.mxu1 %v1354_v5 }
 0x114   : > { %2606 = vmatprep.subr.bf16.mxu1 %v1353_v18 }
 0x117   : > { %2607 = vmatpush3.bf16.msra.mxu1 %v1353_v18 }
 0x11a   : > { %2585 = vmatmul.mubr.msk.bf16.gmra.mxu1 %vm654_vm0, %v1046_v23  ;;  %v1083_v23 = vpop.permute.xlu1 %1082 }
 0x11b   : > { %2608 = vmatprep.mubr.msk.bf16.mxu1 %vm1451_vm3, %v1345_v24 }
 0x122   : > { %2609 = vmatmul.mubr.msk.bf16.vlgmr.msra.gmra.mxu1 %vm1451_vm3, %v1346_v29 }
 0x123   : > { %2612 = vmatprep.mubr.msk.bf16.mxu1 %vm1451_vm3, %v1347_v30 }
 0x12a   : > { %2613 = vmatmul.mubr.msk.bf16.gmra.mxu1 %vm1451_vm3, %v1348_v35  ;;  %v1073_v35 = vpop.permute.xlu1 %1072 }
 0x12b   : > { %2616 = vmatprep.mubr.msk.bf16.mxu1 %vm1451_vm3, %v1349_v36 }
 0x132   : > { %2617 = vmatmul.mubr.msk.bf16.gmra.mxu1 %vm1451_vm3, %v1350_v41  ;;  %v1068_v41 = vpop.permute.xlu0 %1067 }
 0x133   : > { %2620 = vmatprep.mubr.msk.bf16.mxu1 %vm1451_vm3, %v1351_v42 }
 0x13a   : > { %2621 = vmatmul.mubr.msk.bf16.gmra.mxu1 %vm1451_vm3, %v1352_v45 }
 0x1c2   : > { %v2554_v53 = vpop.f32.mrf.mxu1 }
 0x1c3   : > { %v864_v9 = vadd.f32 %v2554_v53, %v781_v57  ;;  %v1063_v53 = vpop.permute.xlu1 %1062  ;;  %v1058_v57 = vpop.permute.xlu0 %1057 }
 0x1c4   : > { %v855_v54 = vpop.f32.mrf.mxu1 }
 0x1c5   : > { %v888_v21 = vmax.f32 %v864_v9, 0.0  ;;  %v856_v22 = vadd.f32 %v855_v54, %v771_v63  ;;  %v1181_v63 = vld [vmem:[%s3910_s10 + $0x8] sm:$0xff] }
 0x1c6   : > { %v2555_v56 = vpop.f32.mrf.mxu1 }
 0x1c7   : > { %v867_v13 = vadd.f32 %v2555_v56, %v786_v55  ;;  %v886_v29 = vmax.f32 %v856_v22, 0.0 }
 0x1c8   : > { %v858_v58 = vpop.f32.mrf.mxu1 }
 0x1c9   : > { %v889_v17 = vmax.f32 %v867_v13, 0.0  ;;  %v859_v18 = vadd.f32 %v858_v58, %v776_v60  ;;  %v900_v58 = vld [vmem:[%s3906_s6 + $0x30] sm:$0xff] }
 0x1ca   : > { %v2558_v59 = vpop.f32.mrf.mxu1 }
 0x1cb   : > { %v880_v62 = vadd.f32 %v2558_v59, %v801_v50  ;;  %v907_v25 = vpack.c.bf16 %v889_v17, %v888_v21  ;;  %v887_v26 = vmax.f32 %v859_v18, 0.0  ;;  %v901_v59 = vld [vmem:[%s3906_s6 + $0x38] sm:$0xff]  ;;  %v3193_v17 = vpop.permute.xlu0 %940 }
 0x1cc   : > { %v871_v61 = vpop.f32.mrf.mxu1 }
 0x1cd   : > { %v872_v1 = vadd.f32 %v871_v61, %v791_v52  ;;  %v892_v15 = vmax.f32 %v880_v62, 0.0  ;;  %v906_v31 = vpack.c.bf16 %v887_v26, %v886_v29  ;;  %v1180_v62 = vld [vmem:[%s3910_s10] sm:$0xff] }
 0x1ce   : > { %v2559_v0 = vpop.f32.mrf.mxu1 }
 0x1cf   : > { %v883_v3 = vadd.f32 %v2559_v0, %v806_v49  ;;  %v890_v10 = vmax.f32 %v872_v1, 0.0 }
 0x1d0   : > { %v874_v4 = vpop.f32.mrf.mxu1 }
 0x1d1   : > { %v893_v5 = vmax.f32 %v883_v3, 0.0  ;;  %v875_v6 = vadd.f32 %v874_v4, %v796_v51  ;;  %v905_v3 = vpack.c.bf16 %v901_v59, %v900_v58  ;;  %v1188_v4 = vpack.c.bf16 %v1181_v63, %v1180_v62 }
 0x1d2   : > { %v2582_v8 = vpop.f32.mrf.mxu1 }
 0x1d3   : > { %v891_v14 = vmax.f32 %v875_v6, 0.0  ;;  %v909_v11 = vpack.c.bf16 %v893_v5, %v892_v15  ;;  %v1150_v49 = vadd.f32 %v2582_v8, %v1068_v41  ;;  %v1182_v5 = vld [vmem:[%s3910_s10 + $0x10] sm:$0xff]  ;;  %v1183_v6 = vld [vmem:[%s3910_s10 + $0x18] sm:$0xff]  ;;  %v1185_v8 = vld [vmem:[%s3910_s10 + $0x28] sm:$0xff] }
 0x1d4   : > { %v1141_v16 = vpop.f32.mrf.mxu1  ;;  %v1189_v9 = vpack.c.bf16 %v1183_v6, %v1182_v5 }
 0x1d5   : > { %v908_v19 = vpack.c.bf16 %v891_v14, %v890_v10  ;;  %2560 = vmatprep.subr.bf16.mxu0 %v909_v11  ;;  %v1174_v60 = vmax.f32 %v1150_v49, 0.0  ;;  %v1142_v61 = vadd.f32 %v1141_v16, %v1058_v57  ;;  %v1186_v14 = vld [vmem:[%s3910_s10 + $0x30] sm:$0xff]  ;;  %v3191_v16 = vpop.permute.xlu1 %945 }
 0x1d6   : > { %2561 = vmatpush3.bf16.msra.mxu0 %v909_v11  ;;  %v2583_v20 = vpop.f32.mrf.mxu1  ;;  %v1187_v11 = vld [vmem:[%s3910_s10 + $0x38] sm:$0xff] }
 0x1d7   : > { %2562 = vmatprep.subr.bf16.mxu0 %v908_v19  ;;  %v1153_v44 = vadd.f32 %v2583_v20, %v1073_v35  ;;  %v1172_v13 = vmax.f32 %v1142_v61, 0.0  ;;  %v1589_v61 = vlaneseq }
 0x1d8   : > { %v1144_v24 = vpop.f32.mrf.mxu1 }
 0x1d9   : > { %v1175_v54 = vmax.f32 %v1153_v44, 0.0  ;;  %v1145_v55 = vadd.f32 %v1144_v24, %v1063_v53  ;;  %v3195_v18 = vpop.permute.xlu1 %1211 }
 0x1da   : > { %2563 = vmatpush3.bf16.msra.mxu0 %v908_v19  ;;  %v2586_v28 = vpop.f32.mrf.mxu1  ;;  %v3197_v19 = vpop.permute.xlu0 %1206 }
 0x1db   : > { %2564 = vmatprep.subr.bf16.mxu0 %v907_v25  ;;  %v1166_v32 = vadd.f32 %v2586_v28, %v1088_v12  ;;  %v1193_v0 = vpack.c.bf16 %v1175_v54, %v1174_v60  ;;  %v1173_v1 = vmax.f32 %v1145_v55, 0.0  ;;  %v1191_v12 = vpack.c.bf16 %v1187_v11, %v1186_v14 }
 0x1dc   : > { %v1157_v30 = vpop.f32.mrf.mxu1 }
 0x1dd   : > { %v1158_v37 = vadd.f32 %v1157_v30, %v1078_v27  ;;  %v1178_v45 = vmax.f32 %v1166_v32, 0.0  ;;  %v1192_v15 = vpack.c.bf16 %v1173_v1, %v1172_v13  ;;  %v1389_v20 = vpop.permute.xlu1 %1388 }
 0x1de   : > { %2565 = vmatpush3.bf16.msra.mxu0 %v907_v25  ;;  %v2587_v36 = vpop.f32.mrf.mxu1  ;;  %v1379_v21 = vpop.permute.xlu0 %1378 }
 0x1df   : > { %v1169_v38 = vadd.f32 %v2587_v36, %v1093_v7  ;;  %2566 = vmatprep.subr.bf16.mxu0 %v906_v31  ;;  %v1176_v50 = vmax.f32 %v1158_v37, 0.0  ;;  %v1184_v7 = vld [vmem:[%s3910_s10 + $0x20] sm:$0xff] }
 0x1e0   : > { %v1160_v42 = vpop.f32.mrf.mxu1  ;;  %v1190_v10 = vpack.c.bf16 %v1185_v8, %v1184_v7  ;;  %v1590_v7 = vshrl.u32 %v1589_v61, 7 }
 0x1e1   : > { %v1179_v46 = vmax.f32 %v1169_v38, 0.0  ;;  %v1161_v47 = vadd.f32 %v1160_v42, %v1083_v23  ;;  %v1399_v23 = vpop.permute.xlu1 %1398 }
 0x1e2   : > { %2567 = vmatpush3.bf16.msra.mxu0 %v906_v31  ;;  %v2610_v22 = vpop.f32.mrf.mxu1  ;;  %v3199_v24 = vpop.permute.xlu0 %1216 }
 0x1e3   : > { %v1195_v51 = vpack.c.bf16 %v1179_v46, %v1178_v45  ;;  %v1177_v52 = vmax.f32 %v1161_v47, 0.0 }
 0x1e4   : > { %v1510_v25 = vpop.f32.mrf.mxu1 }
 0x1e5   : > { %v1194_v56 = vpack.c.bf16 %v1177_v52, %v1176_v50  ;;  %2569 = vmatmul.mubr.msk.bf16.vlgmr.msra.gmra.mxu0 %vm808_vm2, %v903_v43  ;;  %2588 = vmatprep.subr.bf16.mxu0 %v1195_v51  ;;  %v1374_v26 = vpop.permute.xlu1 %1373 }
 0x1e6   : > { %2589 = vmatpush3.bf16.msra.mxu0 %v1195_v51  ;;  %2572 = vmatprep.mubr.msk.bf16.mxu0 %vm808_vm2, %v904_v48  ;;  %v3201_v27 = vpop.permute.xlu0 %1221  ;;  %v2611_v28 = vpop.f32.mrf.mxu1  ;;  %v1511_v57 = vadd.f32 %v1510_v25, %v1374_v26 }
 0x1e7   : > { %2590 = vmatprep.subr.bf16.mxu0 %v1194_v56  ;;  %v1522_v58 = vadd.f32 %v2611_v28, %v1389_v20 }
 0x1e8   : > { %v1513_v29 = vpop.f32.mrf.mxu1  ;;  %v3215_v13 = vmax.f32 %v1511_v57, 0.0  ;;  %v3268_v57 = vsub.s32 7, %v1590_v7 }
 0x1e9   : > { %v1409_v30 = vpop.permute.xlu1 %1408  ;;  %v1514_v59 = vadd.f32 %v1513_v29, %v1379_v21 }
 0x1ea   : > { %2591 = vmatpush3.bf16.msra.mxu0 %v1194_v56  ;;  %v1384_v31 = vpop.permute.xlu0 %1383  ;;  %v2614_v32 = vpop.f32.mrf.mxu1  ;;  %3999 = vst [vmem:[#allocation3_spill] sm:$0xff] %v3215_v13 }
 0x1eb   : > { %2592 = vmatprep.subr.bf16.mxu0 %v1193_v0  ;;  %v1519_v55 = vadd.f32 %v2610_v22, %v1384_v31  ;;  %v3219_v5 = vmax.f32 %v1514_v59, 0.0  ;;  %v2232_v31 = vld [vmem:[%s3914_s14 + $0x18] sm:$0xff] }
 0x1ec   : > { %v1526_v35 = vpop.f32.mrf.mxu1 }
 0x1ed   : > { %2573 = vmatmul.mubr.msk.bf16.gmra.mxu0 %vm808_vm2, %v905_v3  ;;  %v1394_v33 = vpop.permute.xlu1 %1393  ;;  %4001 = vst [vmem:[#allocation5_spill] sm:$0xff] %v3219_v5 }
 0x1ee   : > { %2593 = vmatpush3.bf16.msra.mxu0 %v1193_v0  ;;  %2596 = vmatprep.mubr.msk.bf16.mxu0 %vm808_vm2, %v1188_v4  ;;  %v3203_v34 = vpop.permute.xlu0 %1226  ;;  %v2615_v36 = vpop.f32.mrf.mxu1  ;;  %v1527_v63 = vadd.f32 %v1526_v35, %v1394_v33  ;;  %v3213_v4 = vmax.f32 %v1519_v55, 0.0  ;;  %v3239_v33 = vsub.s32 1, %v1590_v7  ;;  %v3241_v35 = vsub.s32 2, %v1590_v7 }
 0x1ef   : > { %2594 = vmatprep.subr.bf16.mxu0 %v1192_v15  ;;  %v1538_v0 = vadd.f32 %v2615_v36, %v1409_v30  ;;  %v2230_v30 = vld [vmem:[%s3914_s14 + $0x8] sm:$0xff] }
 0x1f0   : > { %v1529_v39 = vpop.f32.mrf.mxu1  ;;  %3998 = vst [vmem:[#allocation2_spill] sm:$0xff] %v3213_v4  ;;  %4005 = vst [vmem:[#allocation9_spill] sm:$0xff] %v3239_v33  ;;  %v2238_v36 = vpack.c.bf16 %v2232_v31, %v2230_v30 }
 0x1f1   : > { %v3205_v37 = vpop.permute.xlu1 %935  ;;  %v1530_v1 = vadd.f32 %v1529_v39, %v1399_v23  ;;  %4006 = vst [vmem:[#allocation10_spill] sm:$0xff] %v3241_v35  ;;  %v3243_v39 = vsub.s32 3, %v1590_v7 }
 0x1f2   : > { %2595 = vmatpush3.bf16.msra.mxu0 %v1192_v15  ;;  %v1419_v38 = vpop.permute.xlu0 %1418  ;;  %v2618_v42 = vpop.f32.mrf.mxu1  ;;  %v3217_v15 = vmax.f32 %v1522_v58, 0.0 }
 0x1f3   : > { %2283 = vmatprep.subr.bf16.mxu0 %v3917_v2  ;;  %v3227_v14 = vmax.f32 %v1530_v1, 0.0  ;;  %4007 = vst [vmem:[#allocation11_spill] sm:$0xff] %v3243_v39 }
 0x1f4   : > { %v1542_v43 = vpop.f32.mrf.mxu1  ;;  %4000 = vst [vmem:[#allocation4_spill] sm:$0xff] %v3217_v15 }
 0x1f5   : > { %2597 = vmatmul.mubr.msk.bf16.vlgmr.msra.gmra.mxu0 %vm808_vm2, %v1189_v9  ;;  %v1404_v40 = vpop.permute.xlu1 %1403  ;;  %v3223_v9 = vmax.f32 %v1527_v63, 0.0  ;;  %4003 = vst [vmem:[#allocation7_spill] sm:$0xff] %v3227_v14 }
 0x1f6   : > { %2600 = vmatprep.mubr.msk.bf16.mxu0 %vm808_vm2, %v1190_v10  ;;  %v3207_v41 = vpop.permute.xlu0 %1231  ;;  %v2619_v46 = vpop.f32.mrf.mxu1  ;;  %v1535_v62 = vadd.f32 %v2614_v32, %v1404_v40  ;;  %v3225_v10 = vmax.f32 %v1538_v0, 0.0  ;;  %v3237_v32 = vsub.s32 0, %v1590_v7  ;;  %v3245_v40 = vsub.s32 4, %v1590_v7 }
 0x1f8   : > { %v1545_v49 = vpop.f32.mrf.mxu1  ;;  %v3221_v8 = vmax.f32 %v1535_v62, 0.0  ;;  %4002 = vst [vmem:[#allocation6_spill] sm:$0xff] %v3225_v10  ;;  %4004 = vst [vmem:[#allocation8_spill] sm:$0xff] %v3237_v32 }
 0x1f9   : > { %v3209_v44 = vpop.permute.xlu1 %1236  ;;  %v1546_v23 = vadd.f32 %v1545_v49, %v1419_v38  ;;  %4008 = vst [vmem:[#allocation12_spill] sm:$0xff] %v3245_v40 }
 0x1fa   : > { %v1429_v45 = vpop.permute.xlu0 %1428  ;;  %v2622_v50 = vpop.f32.mrf.mxu1 }
 0x1fb   : > { %v1554_v22 = vadd.f32 %v2619_v46, %v1429_v45 }
 0x1fc   : > { %v1558_v53 = vpop.f32.mrf.mxu1 }
 0x1fd   : > { %2601 = vmatmul.mubr.msk.bf16.gmra.mxu0 %vm808_vm2, %v1191_v12  ;;  %v1439_v47 = vpop.permute.xlu1 %1438  ;;  %v3253_v46 = vmax.f32 %v1554_v22, 0.0 }
 0x1fe   : > { %v1414_v48 = vpop.permute.xlu0 %1413  ;;  %v2623_v60 = vpop.f32.mrf.mxu1  ;;  %2480 = vmatprep.mubr.msk.bf16.mxu0 %vm808_vm2, %v2238_v36 }
 0x1ff   : > { %v1543_v21 = vadd.f32 %v1542_v43, %v1414_v48  ;;  %v3249_v43 = vsub.s32 6, %v1590_v7  ;;  %4011 = vst [vmem:[#allocation15_spill] sm:$0xff] %v3253_v46 }
 0x200   : > { %v1561_v6 = vpop.f32.mrf.mxu1 }
 0x201   : > { %v3211_v51 = vpop.permute.xlu1 %1241  ;;  %v1562_v29 = vadd.f32 %v1561_v6, %v1439_v47  ;;  %4010 = vst [vmem:[#allocation14_spill] sm:$0xff] %v3249_v43  ;;  %v3251_v45 = vmax.f32 %v1543_v21, 0.0  ;;  %v3255_v47 = vmax.f32 %v1546_v23, 0.0 }
 0x202   : > { %v931_v52 = vpop.permute.xlu0 %930 }
 0x203   : > { %4012 = vst [vmem:[#allocation16_spill] sm:$0xff] %v3255_v47 }
 0x205   : > { %v1449_v54 = vpop.permute.xlu1 %1448 }
 0x206   : > { %v1424_v56 = vpop.permute.xlu0 %1423  ;;  %v1570_v28 = vadd.f32 %v2623_v60, %v1449_v54  ;;  %v3266_v54 = vmax.f32 %v1562_v29, 0.0 }
 0x207   : > { %v1551_v3 = vadd.f32 %v2618_v42, %v1424_v56  ;;  %v3247_v42 = vsub.s32 5, %v1590_v7 }
 0x209   : > { %v1444_v11 = vpop.permute.xlu1 %1443  ;;  %v3229_v20 = vmax.f32 %v1551_v3, 0.0  ;;  %4009 = vst [vmem:[#allocation13_spill] sm:$0xff] %v3247_v42 }
 0x20a   : > { %v1434_v12 = vpop.permute.xlu0 %1433  ;;  %v1567_v25 = vadd.f32 %v2622_v50, %v1444_v11 }
 0x20b   : > { %v1559_v26 = vadd.f32 %v1558_v53, %v1434_v12  ;;  %v3264_v53 = vmax.f32 %v1570_v28, 0.0 }
 0x20c   : > { %v3260_v49 = vmax.f32 %v1567_v25, 0.0 }
 0x20d   : > { %v3262_v50 = vmax.f32 %v1559_v26, 0.0  ;;  %v921_v56 = vpop.permute.xlu1 %920 }
 0x20e   : > { %v926_v23 = vpop.permute.xlu0 %925 }
 0x2a5   : > { %v2570_v38 = vpop.f32.mrf.mxu0 }
 0x2a6   : > { %v3257_v48 = vadd.f32 %v2570_v38, %v931_v52 }
 0x2a7   : > { %v1004_v55 = vpop.f32.mrf.mxu0 }
 0x2a8   : > { %4013 = vst [vmem:[#allocation17_spill] sm:$0xff] %v3257_v48  ;;  %v3272_v58 = vrot.slane %v3257_v48, %v3237_v32  ;;  %v3276_v52 = vrot.slane %v3257_v48, %v3239_v33  ;;  %v3280_v59 = vrot.slane %v3257_v48, %v3241_v35  ;;  %v3284_v61 = vrot.slane %v3257_v48, %v3243_v39 }
 0x2a9   : > { %v2571_v60 = vpop.f32.mrf.mxu0  ;;  %v3288_v62 = vrot.slane %v3257_v48, %v3245_v40  ;;  %v3292_v63 = vrot.slane %v3257_v48, %v3247_v42  ;;  %v3296_v0 = vrot.slane %v3257_v48, %v3249_v43  ;;  %v3298_v1 = vadd.f32 %v1004_v55, %v921_v56  ;;  %v951_v56 = vpop.permute.xlu1 %950 }
 0x2aa   : > { %4014 = vst [vmem:[#allocation18_spill] sm:$0xff] %v3272_v58  ;;  %4015 = vst [vmem:[#allocation19_spill] sm:$0xff] %v3276_v52  ;;  %v3301_v3 = vadd.f32 %v2571_v60, %v3205_v37  ;;  %v3305_v6 = vmul.f32 %v3272_v58, %v3219_v5  ;;  %v3309_v7 = vmul.f32 %v3276_v52, %v3217_v15  ;;  %v956_v58 = vpop.permute.xlu0 %955 }
 0x2ab   : > { %4016 = vst [vmem:[#allocation20_spill] sm:$0xff] %v3280_v59  ;;  %4017 = vst [vmem:[#allocation21_spill] sm:$0xff] %v3284_v61  ;;  %v1007_v11 = vpop.f32.mrf.mxu0  ;;  %v3313_v12 = vmul.f32 %v3280_v59, %v3227_v14  ;;  %v3317_v21 = vmul.f32 %v3284_v61, %v3225_v10  ;;  %v3321_v37 = vmul.f32 %v3288_v62, %v3255_v47 }
 0x2ac   : > { %4018 = vst [vmem:[#allocation22_spill] sm:$0xff] %v3288_v62  ;;  %4019 = vst [vmem:[#allocation23_spill] sm:$0xff] %v3292_v63  ;;  %v3325_v22 = vmul.f32 %v3292_v63, %v3253_v46  ;;  %v3329_v25 = vrot.slane %v3301_v3, %v3237_v32  ;;  %v3333_v26 = vrot.slane %v3301_v3, %v3239_v33 }
 0x2ad   : > { %4020 = vst [vmem:[#allocation24_spill] sm:$0xff] %v3296_v0  ;;  %4021 = vst [vmem:[#allocation25_spill] sm:$0xff] %v3298_v1  ;;  %v3337_v28 = vrot.slane %v3301_v3, %v3241_v35  ;;  %v3341_v29 = vmul.f32 %v3296_v0, %v3266_v54  ;;  %v3343_v30 = vadd.f32 %v1007_v11, %v926_v23  ;;  %v2574_v31 = vpop.f32.mrf.mxu0 }
 0x2ae   : > { %4022 = vst [vmem:[#allocation26_spill] sm:$0xff] %v3305_v6  ;;  %4023 = vst [vmem:[#allocation27_spill] sm:$0xff] %v3309_v7  ;;  %v3347_v36 = vrot.slane %v3301_v3, %v3243_v39  ;;  %v3351_v38 = vrot.slane %v3301_v3, %v3245_v40  ;;  %v3355_v55 = vrot.slane %v3301_v3, %v3247_v42 }
 0x2af   : > { %4024 = vst [vmem:[#allocation28_spill] sm:$0xff] %v3313_v12  ;;  %4025 = vst [vmem:[#allocation29_spill] sm:$0xff] %v3317_v21  ;;  %v1835_v60 = vmul.f32 %v3329_v25, %v3215_v13  ;;  %v1836_v11 = vmul.f32 %v3329_v25, %v3219_v5  ;;  %v1845_v23 = vmul.f32 %v3333_v26, %v3213_v4 }
 0x2b0   : > { %4026 = vst [vmem:[#allocation30_spill] sm:$0xff] %v3321_v37  ;;  %4027 = vst [vmem:[#allocation31_spill] sm:$0xff] %v3325_v22  ;;  %v3365_v2 = vrot.slane %v3301_v3, %v3249_v43  ;;  %v3367_v1 = vadd.f32 %v2574_v31, %v951_v56  ;;  %v1846_v0 = vmul.f32 %v3333_v26, %v3217_v15 }
 0x2b1   : > { %4028 = vst [vmem:[#allocation32_spill] sm:$0xff] %v3329_v25  ;;  %4029 = vst [vmem:[#allocation33_spill] sm:$0xff] %v3333_v26  ;;  %v3373_v63 = vmul.f32 %v3337_v28, %v3223_v9  ;;  %v3377_v62 = vmul.f32 %v3337_v28, %v3227_v14  ;;  %v3380_v59 = vadd.f32 %v1845_v23, %v1835_v60 }
 0x2b2   : > { %4030 = vst [vmem:[#allocation34_spill] sm:$0xff] %v3337_v28  ;;  %4031 = vst [vmem:[#allocation35_spill] sm:$0xff] %v3341_v29  ;;  %v3384_v31 = vmul.f32 %v3347_v36, %v3221_v8  ;;  %v3388_v56 = vmul.f32 %v3347_v36, %v3225_v10  ;;  %v3390_v29 = vadd.f32 %v1846_v0, %v1836_v11 }
 0x2b3   : > { %4032 = vst [vmem:[#allocation36_spill] sm:$0xff] %v3343_v30  ;;  %4033 = vst [vmem:[#allocation37_spill] sm:$0xff] %v3347_v36  ;;  %v1020_v30 = vpop.f32.mrf.mxu0  ;;  %v3394_v52 = vmul.f32 %v3351_v38, %v3251_v45  ;;  %v3411_v11 = vmul.f32 %v3355_v55, %v3253_v46 }
 0x2b4   : > { %4034 = vst [vmem:[#allocation38_spill] sm:$0xff] %v3351_v38  ;;  %4035 = vst [vmem:[#allocation39_spill] sm:$0xff] %v3355_v55  ;;  %v1021_v61 = vadd.f32 %v1020_v30, %v3193_v17  ;;  %v3398_v17 = vmul.f32 %v3351_v38, %v3255_v47  ;;  %v3402_v30 = vmul.f32 %v3355_v55, %v3229_v20 }
 0x2b5   : > { %4036 = vst [vmem:[#allocation40_spill] sm:$0xff] %v3367_v1  ;;  %v2575_v1 = vpop.f32.mrf.mxu0  ;;  %4037 = vst [vmem:[#allocation41_spill] sm:$0xff] %v3411_v11 }
 0x2b6   : > { %v1912_v60 = vrot.slane %v1021_v61, %v3237_v32  ;;  %v3406_v23 = vrot.slane %v1021_v61, %v3239_v33  ;;  %v1932_v0 = vrot.slane %v1021_v61, %v3241_v35  ;;  %v1942_v38 = vrot.slane %v1021_v61, %v3243_v39 }
 0x2b7   : > { %v1023_v22 = vpop.f32.mrf.mxu0  ;;  %v3415_v36 = vrot.slane %v1021_v61, %v3245_v40  ;;  %v3418_v37 = vrot.slane %v1021_v61, %v3247_v42  ;;  %v3421_v28 = vrot.slane %v1021_v61, %v3249_v43  ;;  %v3423_v26 = vadd.f32 %v2575_v1, %v956_v58 }
 0x2b8   : > { %v1024_v21 = vadd.f32 %v1023_v22, %v3191_v16  ;;  %v1916_v55 = vmul.f32 %v1912_v60, %v3219_v5  ;;  %v1926_v25 = vmul.f32 %v3406_v23, %v3217_v15  ;;  %v1936_v48 = vmul.f32 %v1932_v0, %v3227_v14 }
 0x2b9   : > { %4038 = vst [vmem:[#allocation42_spill] sm:$0xff] %v3423_v26  ;;  %v2598_v12 = vpop.f32.mrf.mxu0  ;;  %v1946_v11 = vmul.f32 %v1942_v38, %v3225_v10  ;;  %v1956_v7 = vmul.f32 %v3415_v36, %v3255_v47  ;;  %v1966_v6 = vmul.f32 %v3418_v37, %v3253_v46  ;;  %v1976_v16 = vmul.f32 %v3421_v28, %v3266_v54 }
 0x2ba   : > { %v1299_v58 = vadd.f32 %v2598_v12, %v3199_v24  ;;  %v1928_v1 = vadd.f32 %v1926_v25, %v1916_v55  ;;  %v3439_v22 = vrot.slane %v1021_v61, %v3268_v57  ;;  %v3442_v14 = vrot.slane %v1024_v21, %v3237_v32 }
 0x2bb   : > { %v1290_v26 = vpop.f32.mrf.mxu0  ;;  %v3445_v10 = vrot.slane %v1024_v21, %v3239_v33  ;;  %v3448_v47 = vrot.slane %v1024_v21, %v3241_v35  ;;  %v3451_v46 = vrot.slane %v1024_v21, %v3243_v39  ;;  %v3457_v61 = vrot.slane %v1024_v21, %v3245_v40 }
 0x2bc   : > { %4039 = vst [vmem:[#allocation43_spill] sm:$0xff] %v3442_v14  ;;  %v3453_v24 = vmax.f32 %v1299_v58, 0.0  ;;  %v1291_v12 = vadd.f32 %v1290_v26, %v3197_v19  ;;  %v1938_v25 = vadd.f32 %v1936_v48, %v1928_v1  ;;  %v1986_v15 = vmul.f32 %v3439_v22, %v3264_v53 }
 0x2bd   : > { %4040 = vst [vmem:[#allocation44_spill] sm:$0xff] %v3445_v10  ;;  %4041 = vst [vmem:[#allocation45_spill] sm:$0xff] %v3448_v47  ;;  %v2599_v55 = vpop.f32.mrf.mxu0  ;;  %v3462_v5 = vrot.slane %v1024_v21, %v3247_v42  ;;  %v3465_v35 = vrot.slane %v1024_v21, %v3249_v43  ;;  %v1915_v39 = vmul.f32 %v1912_v60, %v3215_v13 }
 0x2be   : > { %4042 = vst [vmem:[#allocation46_spill] sm:$0xff] %v3451_v46  ;;  %4043 = vst [vmem:[#allocation47_spill] sm:$0xff] %v3457_v61  ;;  %v3468_v58 = vmax.f32 %v1291_v12, 0.0  ;;  %v1302_v19 = vadd.f32 %v2599_v55, %v3201_v27  ;;  %v1948_v48 = vadd.f32 %v1946_v11, %v1938_v25  ;;  %v3472_v26 = vrot.slane %v1024_v21, %v3268_v57 }
 0x2bf   : > { %4044 = vst [vmem:[#allocation48_spill] sm:$0xff] %v3462_v5  ;;  %4045 = vst [vmem:[#allocation49_spill] sm:$0xff] %v3465_v35  ;;  %v1293_v1 = vpop.f32.mrf.mxu0  ;;  %v2013_v40 = vmul.f32 %v3448_v47, %v3453_v24  ;;  %v1925_v42 = vmul.f32 %v3406_v23, %v3213_v4  ;;  %v1933_v43 = vmul.f32 %v1932_v0, %v3453_v24 }
 0x2c0   : > { %4046 = vst [vmem:[#allocation50_spill] sm:$0xff] %v3472_v26  ;;  %v1935_v33 = vmul.f32 %v1932_v0, %v3223_v9  ;;  %v3480_v32 = vmax.f32 %v1302_v19, 0.0  ;;  %v1294_v12 = vadd.f32 %v1293_v1, %v3195_v18  ;;  %v1958_v27 = vadd.f32 %v1956_v7, %v1948_v48 }
 0x2c1   : > { %v1945_v11 = vmul.f32 %v1942_v38, %v3221_v8  ;;  %v2602_v21 = vpop.f32.mrf.mxu0  ;;  %v1993_v25 = vmul.f32 %v3442_v14, %v3468_v58  ;;  %v1913_v55 = vmul.f32 %v1912_v60, %v3468_v58  ;;  %v1927_v47 = vadd.f32 %v1925_v42, %v1915_v39 }
 0x2c2   : > { %v1955_v4 = vmul.f32 %v3415_v36, %v3251_v45  ;;  %v3489_v13 = vmax.f32 %v1294_v12, 0.0  ;;  %v1315_v0 = vadd.f32 %v2602_v21, %v3209_v44  ;;  %v1968_v19 = vadd.f32 %v1966_v6, %v1958_v27 }
 0x2c3   : > { %v1965_v18 = vmul.f32 %v3418_v37, %v3229_v20  ;;  %v1306_v7 = vpop.f32.mrf.mxu0  ;;  %v2023_v48 = vmul.f32 %v3451_v46, %v3480_v32  ;;  %v1937_v1 = vadd.f32 %v1935_v33, %v1927_v47  ;;  %v1943_v14 = vmul.f32 %v1942_v38, %v3480_v32 }
 0x2c4   : > { %v1975_v39 = vmul.f32 %v3421_v28, %v3262_v50  ;;  %v3499_v42 = vmax.f32 %v1315_v0, 0.0  ;;  %v1307_v60 = vadd.f32 %v1306_v7, %v3203_v34  ;;  %v1978_v12 = vadd.f32 %v1976_v16, %v1968_v19 }
 0x2c5   : > { %v2003_v44 = vmul.f32 %v3445_v10, %v3489_v13  ;;  %v2603_v6 = vpop.f32.mrf.mxu0  ;;  %v1923_v27 = vmul.f32 %v3406_v23, %v3489_v13  ;;  %v1947_v21 = vadd.f32 %v1945_v11, %v1937_v1  ;;  %v1985_v33 = vmul.f32 %v3439_v22, %v3260_v49 }
 0x2c6   : > { %v1857_v47 = vadd.f32 %v3373_v63, %v3380_v59  ;;  %v3510_v38 = vmax.f32 %v1307_v60, 0.0  ;;  %v1318_v0 = vadd.f32 %v2603_v6, %v3211_v51  ;;  %v1858_v16 = vadd.f32 %v3377_v62, %v3390_v29  ;;  %v4047_v6 = vld [vmem:[#allocation26_spill] sm:$0xff] }
 0x2c7   : > { %v2004_v34 = vadd.f32 %v2003_v44, %v1993_v25  ;;  %v1309_v19 = vpop.f32.mrf.mxu0  ;;  %v1988_v7 = vadd.f32 %v1986_v15, %v1978_v12  ;;  %v2053_v23 = vmul.f32 %v3465_v35, %v3499_v42  ;;  %v1924_v11 = vadd.f32 %v1923_v27, %v1913_v55  ;;  %v4048_v27 = vld [vmem:[#allocation27_spill] sm:$0xff] }
 0x2c8   : > { %v1957_v1 = vadd.f32 %v1955_v4, %v1947_v21  ;;  %v3517_v46 = vmax.f32 %v1318_v0, 0.0  ;;  %v1310_v10 = vadd.f32 %v1309_v19, %v3207_v41  ;;  %v1973_v63 = vmul.f32 %v3421_v28, %v3499_v42 }
 0x2c9   : > { %v2014_v59 = vadd.f32 %v2013_v40, %v2004_v34  ;;  %v2033_v51 = vmul.f32 %v3457_v61, %v3510_v38  ;;  %v1934_v25 = vadd.f32 %v1933_v43, %v1924_v11  ;;  %v1867_v15 = vadd.f32 %v3384_v31, %v1857_v47  ;;  %v4051_v11 = vld [vmem:[#allocation28_spill] sm:$0xff] }
 0x2ca   : > { %v1967_v62 = vadd.f32 %v1965_v18, %v1957_v1  ;;  %v3525_v29 = vmax.f32 %v1310_v10, 0.0  ;;  %v2063_v4 = vmul.f32 %v3472_v26, %v3517_v46  ;;  %v1953_v41 = vmul.f32 %v3415_v36, %v3510_v38 }
 0x2cb   : > { %v2024_v60 = vadd.f32 %v2023_v48, %v2014_v59  ;;  %v1944_v40 = vadd.f32 %v1943_v14, %v1934_v25  ;;  %v1983_v28 = vmul.f32 %v3439_v22, %v3517_v46  ;;  %v1868_v55 = vadd.f32 %v3388_v56, %v1858_v16  ;;  %v4052_v25 = vld [vmem:[#allocation32_spill] sm:$0xff] }
 0x2cc   : > { %v1877_v43 = vadd.f32 %v3394_v52, %v1867_v15  ;;  %v2043_v10 = vmul.f32 %v3462_v5, %v3525_v29  ;;  %v1963_v31 = vmul.f32 %v3418_v37, %v3525_v29  ;;  %v1977_v48 = vadd.f32 %v1975_v39, %v1967_v62  ;;  %v4049_v39 = vld [vmem:[#allocation41_spill] sm:$0xff] }
 0x2cd   : > { %v2034_v18 = vadd.f32 %v2033_v51, %v2024_v60  ;;  %v1954_v12 = vadd.f32 %v1953_v41, %v1944_v40  ;;  %v1878_v44 = vadd.f32 %v3398_v17, %v1868_v55  ;;  %v1895_v36 = vmul.f32 %v3365_v2, %v3262_v50  ;;  %v4050_v17 = vld [vmem:[#allocation17_spill] sm:$0xff] }
 0x2ce   : > { %v1887_v14 = vadd.f32 %v3402_v30, %v1877_v43  ;;  %v1896_v52 = vmul.f32 %v3365_v2, %v3266_v54  ;;  %v1902_v56 = vrot.slane %v3301_v3, %v3268_v57  ;;  %v1768_v21 = vadd.f32 %v4048_v27, %v4047_v6  ;;  %v4053_v41 = vld [vmem:[#allocation29_spill] sm:$0xff] }
 0x2cf   : > { %v2044_v22 = vadd.f32 %v2043_v10, %v2034_v18  ;;  %v1964_v37 = vadd.f32 %v1963_v31, %v1954_v12  ;;  %v1888_v47 = vadd.f32 %v4049_v39, %v1878_v44  ;;  %v3552_v30 = vrot.slane %v4050_v17, %v3268_v57  ;;  %v4054_v55 = vld [vmem:[#allocation33_spill] sm:$0xff]  ;;  %v4062_v17 = vld [vmem:[#allocation18_spill] sm:$0xff] }
 0x2d0   : > { %v1897_v0 = vadd.f32 %v1895_v36, %v1887_v14  ;;  %v1987_v16 = vadd.f32 %v1985_v33, %v1977_v48  ;;  %v1905_v19 = vmul.f32 %v1902_v56, %v3260_v49  ;;  %v1778_v1 = vadd.f32 %v4051_v11, %v1768_v21  ;;  %v4056_v48 = vld [vmem:[#allocation30_spill] sm:$0xff]  ;;  %v4060_v21 = vld [vmem:[#allocation31_spill] sm:$0xff] }
 0x2d1   : > { %v2054_v34 = vadd.f32 %v2053_v23, %v2044_v22  ;;  %v1974_v59 = vadd.f32 %v1973_v63, %v1964_v37  ;;  %v1898_v51 = vadd.f32 %v1896_v52, %v1888_v47  ;;  %v1906_v3 = vmul.f32 %v1902_v56, %v3264_v53  ;;  %v4055_v63 = vld [vmem:[#allocation34_spill] sm:$0xff]  ;;  %v4064_v11 = vld [vmem:[#allocation19_spill] sm:$0xff] }
 0x2d2   : > { %v1833_v62 = vmul.f32 %v4052_v25, %v3468_v58  ;;  %v1907_v60 = vadd.f32 %v1905_v19, %v1897_v0  ;;  %v1788_v40 = vadd.f32 %v4053_v41, %v1778_v1  ;;  %v1843_v43 = vmul.f32 %v4054_v55, %v3489_v13  ;;  %v4058_v52 = vld [vmem:[#allocation38_spill] sm:$0xff] }
 0x2d3   : > { %v2064_v15 = vadd.f32 %v2063_v4, %v2054_v34  ;;  %v1984_v23 = vadd.f32 %v1983_v28, %v1974_v59  ;;  %v1908_v33 = vadd.f32 %v1906_v3, %v1898_v51  ;;  %v1826_v18 = vmul.f32 %v3552_v30, %v3264_v53  ;;  %v4057_v4 = vld [vmem:[#allocation37_spill] sm:$0xff]  ;;  %v4059_v28 = vld [vmem:[#allocation39_spill] sm:$0xff]  ;;  %v4065_v59 = vld [vmem:[#allocation2_spill] sm:$0xff] }
 0x2d4   : > { %v1853_v10 = vmul.f32 %v4055_v63, %v3453_v24  ;;  %v1798_v12 = vadd.f32 %v4056_v48, %v1788_v40  ;;  %v1844_v44 = vadd.f32 %v1843_v43, %v1833_v62  ;;  %v1863_v14 = vmul.f32 %v4057_v4, %v3480_v32  ;;  %v4066_v3 = vld [vmem:[#allocation35_spill] sm:$0xff]  ;;  %v4068_v40 = vld [vmem:[#allocation21_spill] sm:$0xff]  ;;  %v4069_v63 = vld [vmem:[#allocation22_spill] sm:$0xff] }
 0x2d5   : > { %v2248_v31 = vpack.c.bf16 %v2064_v15, %v1988_v7  ;;  %v2247_v36 = vpack.c.bf16 %v1987_v16, %v1984_v23  ;;  %v2246_v22 = vpack.c.bf16 %v1908_v33, %v1907_v60  ;;  %v1873_v6 = vmul.f32 %v4058_v52, %v3510_v38  ;;  %v4063_v16 = vld [vmem:[#allocation3_spill] sm:$0xff] }
 0x2d6   : > { %v1883_v27 = vmul.f32 %v4059_v28, %v3525_v29  ;;  %v1808_v37 = vadd.f32 %v4060_v21, %v1798_v12  ;;  %v1854_v39 = vadd.f32 %v1853_v10, %v1844_v44  ;;  %v1893_v7 = vmul.f32 %v3365_v2, %v3499_v42  ;;  %v4067_v2 = vld [vmem:[#allocation20_spill] sm:$0xff]  ;;  %v4070_v44 = vld [vmem:[#allocation23_spill] sm:$0xff] }
 0x2d7   : > { %2284 = vmatpush1.bf16.msra.mxu0 %v2248_v31  ;;  %v1903_v47 = vmul.f32 %v1902_v56, %v3517_v46  ;;  %v4061_v0 = vmov 0   ;;  %v1753_v34 = vmul.f32 %v4062_v17, %v3468_v58  ;;  %v1755_v19 = vmul.f32 %v4062_v17, %v4063_v16  ;;  %v4073_v17 = vld [vmem:[#allocation36_spill] sm:$0xff] }
 0x2d8   : > { %2285 = vmatprep.subr.bf16.mxu0 %v4061_v0  ;;  %v1763_v1 = vmul.f32 %v4064_v11, %v3489_v13  ;;  %v1765_v51 = vmul.f32 %v4064_v11, %v4065_v59  ;;  %v1818_v25 = vadd.f32 %v4066_v3, %v1808_v37  ;;  %v1864_v62 = vadd.f32 %v1863_v14, %v1854_v39  ;;  %v4072_v39 = vld [vmem:[#allocation8_spill] sm:$0xff]  ;;  %v4076_v3 = vld [vmem:[#allocation11_spill] sm:$0xff] }
 0x2d9   : > { %v1773_v56 = vmul.f32 %v4067_v2, %v3453_v24  ;;  %v1775_v15 = vmul.f32 %v4067_v2, %v3223_v9  ;;  %v1783_v55 = vmul.f32 %v4068_v40, %v3480_v32  ;;  %v1785_v43 = vmul.f32 %v4068_v40, %v3221_v8 }
 0x2da   : > { %v1764_v60 = vadd.f32 %v1763_v1, %v1753_v34  ;;  %v1767_v41 = vadd.f32 %v1765_v51, %v1755_v19  ;;  %v1828_v23 = vadd.f32 %v1826_v18, %v1818_v25  ;;  %v1874_v33 = vadd.f32 %v1873_v6, %v1864_v62  ;;  %v4071_v18 = vld [vmem:[#allocation24_spill] sm:$0xff]  ;;  %v4074_v19 = vld [vmem:[#allocation9_spill] sm:$0xff]  ;;  %v4075_v1 = vld [vmem:[#allocation10_spill] sm:$0xff] }
 0x2db   : > { %2286 = vmatpush1.bf16.msra.mxu0 %v2247_v36  ;;  %v1793_v10 = vmul.f32 %v4069_v63, %v3510_v38  ;;  %v1795_v31 = vmul.f32 %v4069_v63, %v3251_v45  ;;  %v1803_v4 = vmul.f32 %v4070_v44, %v3525_v29  ;;  %v1805_v14 = vmul.f32 %v4070_v44, %v3229_v20  ;;  %v4077_v62 = vld [vmem:[#allocation12_spill] sm:$0xff] }
 0x2dc   : > { %2287 = vmatprep.subr.bf16.mxu0 %v4061_v0  ;;  %v1774_v48 = vadd.f32 %v1773_v56, %v1764_v60  ;;  %v1777_v12 = vadd.f32 %v1775_v15, %v1767_v41  ;;  %v1884_v52 = vadd.f32 %v1883_v27, %v1874_v33  ;;  %v1813_v36 = vmul.f32 %v4071_v18, %v3499_v42 }
 0x2dd   : > { %v1815_v6 = vmul.f32 %v4071_v18, %v3262_v50  ;;  %v1823_v28 = vmul.f32 %v3552_v30, %v3517_v46  ;;  %v3612_v34 = vrot.slane %v4073_v17, %v4072_v39  ;;  %v3616_v11 = vrot.slane %v4073_v17, %v4074_v19 }
 0x2de   : > { %v1784_v21 = vadd.f32 %v1783_v55, %v1774_v48  ;;  %v1787_v37 = vadd.f32 %v1785_v43, %v1777_v12  ;;  %v1894_v27 = vadd.f32 %v1893_v7, %v1884_v52  ;;  %v3620_v51 = vrot.slane %v4073_v17, %v4075_v1  ;;  %v4078_v7 = vld [vmem:[#allocation5_spill] sm:$0xff]  ;;  %v4079_v43 = vld [vmem:[#allocation4_spill] sm:$0xff] }
 0x2df   : > { %2288 = vmatpush1.bf16.msra.mxu0 %v2246_v22  ;;  %v3624_v25 = vrot.slane %v4073_v17, %v4076_v3  ;;  %v3628_v2 = vrot.slane %v4073_v17, %v4077_v62  ;;  %v1675_v22 = vmul.f32 %v3612_v34, %v4063_v16  ;;  %v1676_v60 = vmul.f32 %v3612_v34, %v4078_v7 }
 0x2e0   : > { %2289 = vmatprep.subr.bf16.mxu0 %v4061_v0  ;;  %v1794_v56 = vadd.f32 %v1793_v10, %v1784_v21  ;;  %v1797_v15 = vadd.f32 %v1795_v31, %v1787_v37  ;;  %v1904_v41 = vadd.f32 %v1903_v47, %v1894_v27  ;;  %v1825_v40 = vmul.f32 %v3552_v30, %v3260_v49  ;;  %v4080_v31 = vld [vmem:[#allocation7_spill] sm:$0xff]  ;;  %v4081_v37 = vld [vmem:[#allocation6_spill] sm:$0xff] }
 0x2e1   : > { %v1685_v55 = vmul.f32 %v3616_v11, %v4065_v59  ;;  %v1686_v33 = vmul.f32 %v3616_v11, %v4079_v43  ;;  %v1695_v10 = vmul.f32 %v3620_v51, %v3223_v9  ;;  %v1696_v12 = vmul.f32 %v3620_v51, %v4080_v31 }
 0x2e2   : > { %v1804_v63 = vadd.f32 %v1803_v4, %v1794_v56  ;;  %v1807_v48 = vadd.f32 %v1805_v14, %v1797_v15  ;;  %v2245_v44 = vpack.c.bf16 %v1904_v41, %v1828_v23  ;;  %v1705_v30 = vmul.f32 %v3624_v25, %v3221_v8  ;;  %v4082_v15 = vld [vmem:[#allocation13_spill] sm:$0xff]  ;;  %v4083_v23 = vld [vmem:[#allocation14_spill] sm:$0xff] }
 0x2e3   : > { %v1687_v52 = vadd.f32 %v1685_v55, %v1675_v22  ;;  %v1688_v47 = vadd.f32 %v1686_v33, %v1676_v60  ;;  %v1706_v27 = vmul.f32 %v3624_v25, %v4081_v37  ;;  %v1715_v4 = vmul.f32 %v3628_v2, %v3251_v45  ;;  %v4084_v41 = vld [vmem:[#allocation25_spill] sm:$0xff] }
 0x2e4   : > { %v1814_v18 = vadd.f32 %v1813_v36, %v1804_v63  ;;  %v1817_v21 = vadd.f32 %v1815_v6, %v1807_v48  ;;  %2290 = vmatpush1.bf16.msra.mxu0 %v2245_v44  ;;  %v1722_v26 = vrot.slane %v4073_v17, %v4082_v15  ;;  %v1732_v22 = vrot.slane %v4073_v17, %v4083_v23  ;;  %v4085_v48 = vld [vmem:[#allocation16_spill] sm:$0xff] }
 0x2e5   : > { %v1697_v14 = vadd.f32 %v1695_v10, %v1687_v52  ;;  %v1698_v56 = vadd.f32 %v1696_v12, %v1688_v47  ;;  %2291 = vmatprep.subr.bf16.mxu0 %v4061_v0  ;;  %v1742_v6 = vrot.slane %v4073_v17, %v3268_v57  ;;  %v1592_v55 = vrot.slane %v4084_v41, %v4072_v39  ;;  %v4086_v52 = vld [vmem:[#allocation15_spill] sm:$0xff] }
 0x2e6   : > { %v1824_v60 = vadd.f32 %v1823_v28, %v1814_v18  ;;  %v1827_v36 = vadd.f32 %v1825_v40, %v1817_v21  ;;  %v1716_v10 = vmul.f32 %v3628_v2, %v4085_v48  ;;  %v1725_v12 = vmul.f32 %v1722_v26, %v3229_v20 }
 0x2e7   : > { %v1707_v33 = vadd.f32 %v1705_v30, %v1697_v14  ;;  %v1708_v63 = vadd.f32 %v1706_v27, %v1698_v56  ;;  %v1726_v47 = vmul.f32 %v1722_v26, %v4086_v52  ;;  %v1735_v35 = vmul.f32 %v1732_v22, %v3262_v50 }
 0x2e8   : > { %v2244_v44 = vpack.c.bf16 %v1827_v36, %v1824_v60  ;;  %v1736_v28 = vmul.f32 %v1732_v22, %v3266_v54  ;;  %v1745_v17 = vmul.f32 %v1742_v6, %v3260_v49  ;;  %v1596_v21 = vmul.f32 %v1592_v55, %v4078_v7 }
 0x2e9   : > { %v1717_v40 = vadd.f32 %v1715_v4, %v1707_v33  ;;  %v1718_v18 = vadd.f32 %v1716_v10, %v1708_v63  ;;  %v1602_v30 = vrot.slane %v4084_v41, %v4074_v19  ;;  %v1612_v27 = vrot.slane %v4084_v41, %v4075_v1 }
 0x2ea   : > { %2292 = vmatpush1.bf16.msra.mxu0 %v2244_v44  ;;  %v1622_v14 = vrot.slane %v4084_v41, %v4076_v3  ;;  %v1632_v56 = vrot.slane %v4084_v41, %v4077_v62  ;;  %v1642_v36 = vrot.slane %v4084_v41, %v4082_v15  ;;  %v1652_v33 = vrot.slane %v4084_v41, %v4083_v23 }
 0x2eb   : > { %2293 = vmatprep.subr.bf16.mxu0 %v4061_v0  ;;  %v1727_v4 = vadd.f32 %v1725_v12, %v1717_v40  ;;  %v1728_v60 = vadd.f32 %v1726_v47, %v1718_v18  ;;  %v1746_v63 = vmul.f32 %v1742_v6, %v3264_v53  ;;  %v1606_v10 = vmul.f32 %v1602_v30, %v4079_v43 }
 0x2ec   : > { %v1616_v44 = vmul.f32 %v1612_v27, %v4080_v31  ;;  %v1626_v5 = vmul.f32 %v1622_v14, %v4081_v37  ;;  %v1636_v7 = vmul.f32 %v1632_v56, %v4085_v48  ;;  %v1646_v12 = vmul.f32 %v1642_v36, %v4086_v52 }
 0x2ed   : > { %v1737_v61 = vadd.f32 %v1735_v35, %v1727_v4  ;;  %v1738_v62 = vadd.f32 %v1736_v28, %v1728_v60  ;;  %v1608_v47 = vadd.f32 %v1606_v10, %v1596_v21  ;;  %v1662_v40 = vrot.slane %v4084_v41, %v3268_v57 }
 0x2ee   : > { %v1673_v18 = vmul.f32 %v3612_v34, %v3468_v58  ;;  %v1683_v23 = vmul.f32 %v3616_v11, %v3489_v13  ;;  %v1656_v37 = vmul.f32 %v1652_v33, %v3266_v54  ;;  %v1693_v35 = vmul.f32 %v3620_v51, %v3453_v24 }
 0x2ef   : > { %v1747_v15 = vadd.f32 %v1745_v17, %v1737_v61  ;;  %v1748_v31 = vadd.f32 %v1746_v63, %v1738_v62  ;;  %v1618_v28 = vadd.f32 %v1616_v44, %v1608_v47  ;;  %v1666_v4 = vmul.f32 %v1662_v40, %v3264_v53 }
 0x2f0   : > { %v1684_v21 = vadd.f32 %v1683_v23, %v1673_v18  ;;  %v1703_v41 = vmul.f32 %v3624_v25, %v3480_v32  ;;  %v1713_v34 = vmul.f32 %v3628_v2, %v3510_v38  ;;  %v1723_v11 = vmul.f32 %v1722_v26, %v3525_v29 }
 0x2f1   : > { %v2243_v60 = vpack.c.bf16 %v1748_v31, %v1747_v15  ;;  %v1733_v61 = vmul.f32 %v1732_v22, %v3499_v42  ;;  %v1628_v62 = vadd.f32 %v1626_v5, %v1618_v28  ;;  %v1743_v63 = vmul.f32 %v1742_v6, %v3517_v46 }
 0x2f2   : > { %v1694_v17 = vadd.f32 %v1693_v35, %v1684_v21  ;;  %v1595_v51 = vmul.f32 %v1592_v55, %v4063_v16  ;;  %v1593_v23 = vmul.f32 %v1592_v55, %v3468_v58  ;;  %v1603_v10 = vmul.f32 %v1602_v30, %v3489_v13 }
 0x2f3   : > { %2294 = vmatpush1.bf16.msra.mxu0 %v2243_v60  ;;  %v1605_v25 = vmul.f32 %v1602_v30, %v4065_v59  ;;  %v1613_v31 = vmul.f32 %v1612_v27, %v3453_v24  ;;  %v1638_v26 = vadd.f32 %v1636_v7, %v1628_v62  ;;  %v1615_v5 = vmul.f32 %v1612_v27, %v3223_v9 }
 0x2f4   : > { %2295 = vmatprep.subr.bf16.mxu0 %v4061_v0  ;;  %v1704_v2 = vadd.f32 %v1703_v41, %v1694_v17  ;;  %v1623_v15 = vmul.f32 %v1622_v14, %v3480_v32  ;;  %v1604_v22 = vadd.f32 %v1603_v10, %v1593_v23  ;;  %v1625_v44 = vmul.f32 %v1622_v14, %v3221_v8 }
 0x2f5   : > { %v1607_v6 = vadd.f32 %v1605_v25, %v1595_v51  ;;  %v1633_v55 = vmul.f32 %v1632_v56, %v3510_v38  ;;  %v1648_v47 = vadd.f32 %v1646_v12, %v1638_v26  ;;  %v1635_v30 = vmul.f32 %v1632_v56, %v3251_v45  ;;  %v4087_v12 = vld [vmem:[#allocation42_spill] sm:$0xff] }
 0x2f6   : > { %v1714_v18 = vadd.f32 %v1713_v34, %v1704_v2  ;;  %v1643_v35 = vmul.f32 %v1642_v36, %v3525_v29  ;;  %v1614_v28 = vadd.f32 %v1613_v31, %v1604_v22  ;;  %v1645_v7 = vmul.f32 %v1642_v36, %v3229_v20  ;;  %v4088_v31 = vld [vmem:[#allocation5_spill] sm:$0xff] }
 0x2f7   : > { %v1617_v21 = vadd.f32 %v1615_v5, %v1607_v6  ;;  %v1653_v27 = vmul.f32 %v1652_v33, %v3499_v42  ;;  %v1658_v41 = vadd.f32 %v1656_v37, %v1648_v47  ;;  %v1655_v62 = vmul.f32 %v1652_v33, %v3262_v50 }
 0x2f8   : > { %v1724_v60 = vadd.f32 %v1723_v11, %v1714_v18  ;;  %v1663_v14 = vmul.f32 %v1662_v40, %v3517_v46  ;;  %v1624_v17 = vadd.f32 %v1623_v15, %v1614_v28  ;;  %v3722_v34 = vrot.slane %v4087_v12, %v4072_v39 }
 0x2f9   : > { %v1627_v51 = vadd.f32 %v1625_v44, %v1617_v21  ;;  %v3726_v56 = vrot.slane %v4087_v12, %v4074_v19  ;;  %v1665_v36 = vmul.f32 %v1662_v40, %v3260_v49  ;;  %v3731_v37 = vrot.slane %v4087_v12, %v4075_v1  ;;  %v4089_v44 = vld [vmem:[#allocation7_spill] sm:$0xff]  ;;  %v4090_v21 = vld [vmem:[#allocation12_spill] sm:$0xff] }
 0x2fa   : > { %v1734_v23 = vadd.f32 %v1733_v61, %v1724_v60  ;;  %v3735_v33 = vrot.slane %v4087_v12, %v4076_v3  ;;  %v1634_v11 = vadd.f32 %v1633_v55, %v1624_v17  ;;  %v2155_v25 = vmul.f32 %v3722_v34, %v4063_v16  ;;  %v4091_v60 = vld [vmem:[#allocation13_spill] sm:$0xff] }
 0x2fb   : > { %v1637_v10 = vadd.f32 %v1635_v30, %v1627_v51  ;;  %v2156_v26 = vmul.f32 %v3722_v34, %v4088_v31  ;;  %v1668_v2 = vadd.f32 %v1666_v4, %v1658_v41  ;;  %v2165_v40 = vmul.f32 %v3726_v56, %v4065_v59  ;;  %v4092_v51 = vld [vmem:[#allocation6_spill] sm:$0xff] }
 0x2fc   : > { %v1744_v61 = vadd.f32 %v1743_v63, %v1734_v23  ;;  %v2166_v5 = vmul.f32 %v3726_v56, %v4079_v43  ;;  %v1644_v15 = vadd.f32 %v1643_v35, %v1634_v11  ;;  %v2175_v6 = vmul.f32 %v3731_v37, %v3223_v9  ;;  %v4093_v11 = vld [vmem:[#allocation14_spill] sm:$0xff] }
 0x2fd   : > { %v1647_v22 = vadd.f32 %v1645_v7, %v1637_v10  ;;  %v2176_v55 = vmul.f32 %v3731_v37, %v4089_v44  ;;  %v2167_v18 = vadd.f32 %v2165_v40, %v2155_v25  ;;  %v2185_v4 = vmul.f32 %v3735_v33, %v3221_v8 }
 0x2fe   : > { %v2242_v47 = vpack.c.bf16 %v1744_v61, %v1668_v2  ;;  %v2168_v30 = vadd.f32 %v2166_v5, %v2156_v26  ;;  %v1654_v63 = vadd.f32 %v1653_v27, %v1644_v15  ;;  %v2192_v41 = vrot.slane %v4087_v12, %v4090_v21 }
 0x2ff   : > { %v1657_v28 = vadd.f32 %v1655_v62, %v1647_v22  ;;  %v2202_v35 = vrot.slane %v4087_v12, %v4091_v60  ;;  %v2177_v7 = vadd.f32 %v2175_v6, %v2167_v18  ;;  %v2186_v23 = vmul.f32 %v3735_v33, %v4092_v51 }
 0x300   : > { %2296 = vmatpush1.bf16.msra.mxu0 %v2242_v47  ;;  %v2178_v17 = vadd.f32 %v2176_v55, %v2168_v30  ;;  %v2212_v10 = vrot.slane %v4087_v12, %v4093_v11  ;;  %v1664_v25 = vadd.f32 %v1663_v14, %v1654_v63  ;;  %v2195_v2 = vmul.f32 %v2192_v41, %v3251_v45  ;;  %v4094_v14 = vld [vmem:[#allocation40_spill] sm:$0xff] }
 0x301   : > { %2297 = vmatprep.subr.bf16.mxu0 %v4061_v0  ;;  %v1667_v27 = vadd.f32 %v1665_v36, %v1657_v28  ;;  %v2187_v62 = vadd.f32 %v2185_v4, %v2177_v7  ;;  %v2196_v61 = vmul.f32 %v2192_v41, %v4085_v48  ;;  %v2205_v5 = vmul.f32 %v2202_v35, %v3229_v20 }
 0x302   : > { %v2188_v26 = vadd.f32 %v2186_v23, %v2178_v17  ;;  %v2206_v15 = vmul.f32 %v2202_v35, %v4086_v52  ;;  %v2222_v22 = vrot.slane %v4087_v12, %v3268_v57  ;;  %v2215_v47 = vmul.f32 %v2212_v10, %v3262_v50 }
 0x303   : > { %v2241_v40 = vpack.c.bf16 %v1667_v27, %v1664_v25  ;;  %v2197_v6 = vadd.f32 %v2195_v2, %v2187_v62  ;;  %v2072_v36 = vrot.slane %v4094_v14, %v4072_v39  ;;  %v2216_v18 = vmul.f32 %v2212_v10, %v3266_v54 }
 0x304   : > { %v2198_v55 = vadd.f32 %v2196_v61, %v2188_v26  ;;  %v2082_v30 = vrot.slane %v4094_v14, %v4074_v19  ;;  %v2092_v4 = vrot.slane %v4094_v14, %v4075_v1  ;;  %v2102_v63 = vrot.slane %v4094_v14, %v4076_v3 }
 0x305   : > { %2298 = vmatpush1.bf16.msra.mxu0 %v2241_v40  ;;  %v2207_v12 = vadd.f32 %v2205_v5, %v2197_v6  ;;  %v2076_v7 = vmul.f32 %v2072_v36, %v4088_v31  ;;  %v2112_v39 = vrot.slane %v4094_v14, %v4090_v21  ;;  %v2225_v17 = vmul.f32 %v2222_v22, %v3260_v49 }
 0x306   : > { %2307 = vmatprep.subr.bf16.mxu0 %v4061_v0  ;;  %v2208_v28 = vadd.f32 %v2206_v15, %v2198_v55  ;;  %v2226_v23 = vmul.f32 %v2222_v22, %v3264_v53  ;;  %v2086_v19 = vmul.f32 %v2082_v30, %v4079_v43  ;;  %v2122_v1 = vrot.slane %v4094_v14, %v4091_v60 }
 0x307   : > { %v2217_v25 = vadd.f32 %v2215_v47, %v2207_v12  ;;  %v2096_v27 = vmul.f32 %v2092_v4, %v4089_v44  ;;  %v2132_v62 = vrot.slane %v4094_v14, %v4093_v11  ;;  %v3790_v21 = vrot.slane %v4094_v14, %v3268_v57 }
 0x308   : > { %v2218_v3 = vadd.f32 %v2216_v18, %v2208_v28  ;;  %v2088_v26 = vadd.f32 %v2086_v19, %v2076_v7  ;;  %v2153_v2 = vmul.f32 %v3722_v34, %v3468_v58  ;;  %v2163_v61 = vmul.f32 %v3726_v56, %v3489_v13 }
 0x309   : > { %v2227_v40 = vadd.f32 %v2225_v17, %v2217_v25  ;;  %v2106_v5 = vmul.f32 %v2102_v63, %v4092_v51  ;;  %v2116_v15 = vmul.f32 %v2112_v39, %v4085_v48  ;;  %v2126_v11 = vmul.f32 %v2122_v1, %v4086_v52 }
 0x30a   : > { %v2228_v60 = vadd.f32 %v2226_v23, %v2218_v3  ;;  %v2098_v6 = vadd.f32 %v2096_v27, %v2088_v26  ;;  %v2164_v55 = vadd.f32 %v2163_v61, %v2153_v2  ;;  %v2173_v57 = vmul.f32 %v3731_v37, %v3453_v24 }
 0x30b   : > { %v2136_v14 = vmul.f32 %v2132_v62, %v3266_v54  ;;  %v2146_v34 = vmul.f32 %v3790_v21, %v3264_v53  ;;  %v2183_v56 = vmul.f32 %v3735_v33, %v3480_v32  ;;  %v2193_v28 = vmul.f32 %v2192_v41, %v3510_v38 }
 0x30c   : > { %v2252_v47 = vpack.c.bf16 %v2228_v60, %v2227_v40  ;;  %v2108_v18 = vadd.f32 %v2106_v5, %v2098_v6  ;;  %v2174_v12 = vadd.f32 %v2173_v57, %v2164_v55  ;;  %v2203_v7 = vmul.f32 %v2202_v35, %v3525_v29 }
 0x30d   : > { %v2073_v17 = vmul.f32 %v2072_v36, %v3468_v58  ;;  %v2075_v37 = vmul.f32 %v2072_v36, %v4063_v16  ;;  %v2083_v23 = vmul.f32 %v2082_v30, %v3489_v13  ;;  %v2085_v19 = vmul.f32 %v2082_v30, %v4065_v59 }
 0x30e   : > { %2308 = vmatpush2.bf16.msra.mxu0 %v2252_v47  ;;  %v2118_v25 = vadd.f32 %v2116_v15, %v2108_v18  ;;  %v2184_v3 = vadd.f32 %v2183_v56, %v2174_v12  ;;  %v2213_v33 = vmul.f32 %v2212_v10, %v3499_v42  ;;  %v2223_v27 = vmul.f32 %v2222_v22, %v3517_v46  ;;  %v4097_v12 = vld [vmem:[#allocation45_spill] sm:$0xff] }
 0x30f   : > { %2309 = vmatprep.subr.bf16.mxu0 %v4061_v0  ;;  %v2084_v41 = vadd.f32 %v2083_v23, %v2073_v17  ;;  %v2087_v26 = vadd.f32 %v2085_v19, %v2075_v37  ;;  %v2093_v35 = vmul.f32 %v2092_v4, %v3453_v24  ;;  %v2095_v58 = vmul.f32 %v2092_v4, %v3223_v9  ;;  %v4098_v23 = vld [vmem:[#allocation46_spill] sm:$0xff] }
 0x310   : > { %v2128_v2 = vadd.f32 %v2126_v11, %v2118_v25  ;;  %v2194_v36 = vadd.f32 %v2193_v28, %v2184_v3  ;;  %v2103_v13 = vmul.f32 %v2102_v63, %v3480_v32  ;;  %v2105_v30 = vmul.f32 %v2102_v63, %v3221_v8  ;;  %v4095_v32 = vld [vmem:[#allocation43_spill] sm:$0xff] }
 0x311   : > { %v2094_v61 = vadd.f32 %v2093_v35, %v2084_v41  ;;  %v2097_v40 = vadd.f32 %v2095_v58, %v2087_v26  ;;  %v2113_v60 = vmul.f32 %v2112_v39, %v3510_v38  ;;  %v2115_v10 = vmul.f32 %v2112_v39, %v3251_v45  ;;  %v4096_v39 = vld [vmem:[#allocation44_spill] sm:$0xff] }
 0x312   : > { %v2138_v5 = vadd.f32 %v2136_v14, %v2128_v2  ;;  %v2204_v22 = vadd.f32 %v2203_v7, %v2194_v36  ;;  %v2123_v15 = vmul.f32 %v2122_v1, %v3525_v29  ;;  %v2125_v24 = vmul.f32 %v2122_v1, %v3229_v20  ;;  %v4100_v35 = vld [vmem:[#allocation48_spill] sm:$0xff] }
 0x313   : > { %v2104_v6 = vadd.f32 %v2103_v13, %v2094_v61  ;;  %v2107_v4 = vadd.f32 %v2105_v30, %v2097_v40  ;;  %v2133_v11 = vmul.f32 %v2132_v62, %v3499_v42  ;;  %v1995_v55 = vmul.f32 %v4095_v32, %v4063_v16 }
 0x314   : > { %v2214_v63 = vadd.f32 %v2213_v33, %v2204_v22  ;;  %v2135_v57 = vmul.f32 %v2132_v62, %v3262_v50  ;;  %v1996_v38 = vmul.f32 %v4095_v32, %v4088_v31  ;;  %v2005_v47 = vmul.f32 %v4096_v39, %v4065_v59  ;;  %v4099_v33 = vld [vmem:[#allocation47_spill] sm:$0xff]  ;;  %v2260_v32 = vpop.permute.xlu0 %2259 }
 0x315   : > { %v2114_v14 = vadd.f32 %v2113_v60, %v2104_v6  ;;  %v2117_v29 = vadd.f32 %v2115_v10, %v2107_v4  ;;  %v2143_v1 = vmul.f32 %v3790_v21, %v3517_v46  ;;  %v2006_v42 = vmul.f32 %v4096_v39, %v4079_v43  ;;  %v4102_v60 = vld [vmem:[#allocation50_spill] sm:$0xff]  ;;  %v2235_v4 = vld [vmem:[%s3914_s14 + $0x30] sm:$0xff]  ;;  %v2265_v39 = vpop.permute.xlu1 %2264 }
 0x316   : > { %v2148_v56 = vadd.f32 %v2146_v34, %v2138_v5  ;;  %v2224_v18 = vadd.f32 %v2223_v27, %v2214_v63  ;;  %v2007_v16 = vadd.f32 %v2005_v47, %v1995_v55  ;;  %v2015_v62 = vmul.f32 %v4097_v12, %v3223_v9  ;;  %v2233_v6 = vld [vmem:[%s3914_s14 + $0x20] sm:$0xff] }
 0x317   : > { %v2124_v28 = vadd.f32 %v2123_v15, %v2114_v14  ;;  %v2127_v7 = vadd.f32 %v2125_v24, %v2117_v29  ;;  %v2008_v31 = vadd.f32 %v2006_v42, %v1996_v38  ;;  %v2016_v59 = vmul.f32 %v4097_v12, %v4089_v44 }
 0x318   : > { %v2251_v17 = vpack.c.bf16 %v2224_v18, %v2148_v56  ;;  %v2145_v37 = vmul.f32 %v3790_v21, %v3260_v49  ;;  %v2017_v46 = vadd.f32 %v2015_v62, %v2007_v16  ;;  %v2025_v43 = vmul.f32 %v4098_v23, %v3221_v8  ;;  %v2270_v42 = vpop.permute.xlu0 %2269 }
 0x319   : > { %v2134_v34 = vadd.f32 %v2133_v11, %v2124_v28  ;;  %v2137_v19 = vadd.f32 %v2135_v57, %v2127_v7  ;;  %v2018_v25 = vadd.f32 %v2016_v59, %v2008_v31  ;;  %v2026_v9 = vmul.f32 %v4098_v23, %v4092_v51  ;;  %v2275_v62 = vpop.permute.xlu1 %2274 }
 0x31a   : > { %2310 = vmatpush2.bf16.msra.mxu0 %v2251_v17  ;;  %v2027_v3 = vadd.f32 %v2025_v43, %v2017_v46  ;;  %v2035_v27 = vmul.f32 %v4099_v33, %v3251_v45  ;;  %v2036_v26 = vmul.f32 %v4099_v33, %v4085_v48  ;;  %v2045_v58 = vmul.f32 %v4100_v35, %v3229_v20  ;;  %v4101_v45 = vld [vmem:[#allocation49_spill] sm:$0xff] }
 0x31b   : > { %2311 = vmatprep.subr.bf16.mxu0 %v4061_v0  ;;  %v2144_v44 = vadd.f32 %v2143_v1, %v2134_v34  ;;  %v2147_v41 = vadd.f32 %v2145_v37, %v2137_v19  ;;  %v2028_v21 = vadd.f32 %v2026_v9, %v2018_v25  ;;  %v2046_v51 = vmul.f32 %v4100_v35, %v4086_v52 }
 0x31c   : > { %v2037_v8 = vadd.f32 %v2035_v27, %v2027_v3  ;;  %v2055_v30 = vmul.f32 %v4101_v45, %v3262_v50  ;;  %v2056_v40 = vmul.f32 %v4101_v45, %v3266_v54  ;;  %v2065_v20 = vmul.f32 %v4102_v60, %v3260_v49  ;;  %v2229_v50 = vld [vmem:[%s3914_s14] sm:$0xff]  ;;  %v2231_v54 = vld [vmem:[%s3914_s14 + $0x10] sm:$0xff]  ;;  %v2236_v49 = vld [vmem:[%s3914_s14 + $0x38] sm:$0xff] }
 0x31d   : > { %v2250_v2 = vpack.c.bf16 %v2147_v41, %v2144_v44  ;;  %v2038_v36 = vadd.f32 %v2036_v26, %v2028_v21  ;;  %v2066_v5 = vmul.f32 %v4102_v60, %v3264_v53  ;;  %v2237_v15 = vpack.c.bf16 %v2231_v54, %v2229_v50 }
 0x31e   : > { %v2047_v13 = vadd.f32 %v2045_v58, %v2037_v8  ;;  %v2239_v11 = vpack.c.bf16 %v2235_v4, %v2233_v6 }
 0x31f   : > { %2312 = vmatpush2.bf16.msra.mxu0 %v2250_v2  ;;  %v2048_v61 = vadd.f32 %v2046_v51, %v2038_v36 }
 0x320   : > { %2313 = vmatprep.subr.bf16.mxu0 %v4061_v0  ;;  %v2057_v48 = vadd.f32 %v2055_v30, %v2047_v13  ;;  %v2234_v0 = vld [vmem:[%s3914_s14 + $0x28] sm:$0xff] }
 0x321   : > { %v2058_v10 = vadd.f32 %v2056_v40, %v2048_v61  ;;  %v2240_v24 = vpack.c.bf16 %v2236_v49, %v2234_v0 }
 0x322   : > { %v2067_v52 = vadd.f32 %v2065_v20, %v2057_v48 }
 0x323   : > { %v2068_v22 = vadd.f32 %v2066_v5, %v2058_v10 }
 0x325   : > { %v2249_v53 = vpack.c.bf16 %v2068_v22, %v2067_v52 }
 0x327   : > { %2314 = vmatpush2.bf16.msra.mxu0 %v2249_v53 }
 0x32a   : > { %2316 = vmatmul.mubr.bf16.vlgmr.msra.gmra.mxu0 %v2237_v15 }
 0x32b   : > { %2481 = vmatprep.mubr.msk.bf16.mxu0 %vm808_vm2, %v2240_v24 }
 0x332   : > { %2324 = vmatmul.mubr.bf16.gmra.mxu0 %v2239_v11 }
 0x3ea   : > { %v2317_v55 = vpop.f32.mrf.mxu0 }
 0x3eb   : > { %v2318_v63 = vadd.f32 %v2317_v55, %v2260_v32 }
 0x3ec   : > { %v2319_v57 = vpop.f32.mrf.mxu0 }
 0x3ed   : > { %v2332_v38 = vmax.f32 %v2318_v63, 0.0 }
 0x3ee   : > { %v2320_v47 = vpop.f32.mrf.mxu0 }
 0x3ef   : > { %2337 = vst.msk [vmem:[%s583_s27] sm:$0xff] %vm2336_vm4, %v2332_v38  ;;  %v2321_v14 = vadd.f32 %v2320_v47, %v2265_v39 }
 0x3f0   : > { %v2322_v29 = vpop.f32.mrf.mxu0 }
 0x3f1   : > { %v2333_v1 = vmax.f32 %v2321_v14, 0.0 }
 0x3f2   : > { %v2325_v56 = vpop.f32.mrf.mxu0 }
 0x3f3   : > { %2338 = vst.msk [vmem:[%s583_s27 + $0x8] sm:$0xff] %vm2336_vm4, %v2333_v1  ;;  %v2326_v18 = vadd.f32 %v2325_v56, %v2270_v42 }
 0x3f4   : > { %v2327_v16 = vpop.f32.mrf.mxu0 }
 0x3f5   : > { %v2334_v12 = vmax.f32 %v2326_v18, 0.0 }
 0x3f6   : > { %v2328_v28 = vpop.f32.mrf.mxu0 }
 0x3f7   : > { %2339 = vst.msk [vmem:[%s583_s27 + $0x10] sm:$0xff] %vm2336_vm4, %v2334_v12  ;;  %v2329_v7 = vadd.f32 %v2328_v28, %v2275_v62 }
 0x3f8   : > { %v2330_v31 = vpop.f32.mrf.mxu0 }
 0x3f9   : > { %v2335_v59 = vmax.f32 %v2329_v7, 0.0 }
 0x3fb   : > { %2340 = vst.msk [vmem:[%s583_s27 + $0x18] sm:$0xff] %vm2336_vm4, %v2335_v59 }
 0x3fc PF: > { %s26_s23 = sadd.s32 1, %s2676_s23   ;;  %s4103_s21 = smov %s2672_s22 }
 0x3fd   : > { %p23_p5 = scmp.ge.s32.totalorder %s26_s23, 4   ;;  %s4104_s22 = smov %s4106_s24 }
 0x3ff   :  { %25 = sbr.rel (!%p23_p5) target bundleno = 2 (0x2), region = 117 }

</bundles_post_ra>
